<compile_context>
chip_gen: v6e
topology: v6e:2x2x1
jax: 0.10.0
libtpu: 0.0.40
codegen_flags: <defaults>
</compile_context>

<pallas_src>
import functools
import math

import jax
import jax.numpy as jnp
import numpy as np
from jax.experimental import pallas as pl
from jax.experimental.pallas import tpu as pltpu


# ----------------------------------------------------------------------------
# Fused decoder kernel
# ----------------------------------------------------------------------------
def _mmdecoder_kernel(z_ref, zt_ref,
                      m_b1, p_b1, m_b2, p_b2,
                      m_u01, p_u01, m_u02, p_u02,
                      m_u11, p_u11, m_u12, p_u12,
                      g_ref, bh0_ref, bw0_ref, bh1_ref, bw1_ref, bh2_ref, bw2_ref,
                      o_ref, canvas,
                      *, N, H0, W0, CIN, CZ, CMID, COUT, TOP):
    # Zero the staging canvas once: the halo rows just above / below the live block stay zero
    # for every conv stage (row counts only grow), so vertically shifted reads that fall
    # outside the current activation are clean zeros (and are masked anyway).
    canvas[...] = jnp.zeros(canvas.shape, jnp.float32)

    def conv3x3(x, m_ref, p_ref, H, W, Cin, Cout, bn_relu):
        """3x3 'same' conv (+bias, optional training-mode BatchNorm + ReLU).

        x: (N*H, W*Cin).  Horizontal taps + width-edge handling live inside the block-banded
        matrices m_ref[ky] of shape (W*Cin, W*Cout); vertical taps are +/-1 row shifts of the
        zero-haloed canvas, masked at the top / bottom image rows.
        """
        NH, Lin, Lout = N * H, W * Cin, W * Cout
        canvas[TOP:TOP + NH, 0:Lin] = x                          # single staging store
        h = jax.lax.broadcasted_iota(jnp.int32, (NH, 1), 0) & (H - 1)   # row index in image
        t0 = canvas[TOP:TOP + NH, 0:Lin]
        tm = jnp.where(h >= 1, canvas[TOP - 1:TOP - 1 + NH, 0:Lin], 0.0)
        tp = jnp.where(h < H - 1, canvas[TOP + 1:TOP + 1 + NH, 0:Lin], 0.0)
        acc = jnp.dot(tm.astype(jnp.bfloat16), m_ref[0], preferred_element_type=jnp.float32)
        acc = acc + jnp.dot(t0.astype(jnp.bfloat16), m_ref[1],
                            preferred_element_type=jnp.float32)
        acc = acc + jnp.dot(tp.astype(jnp.bfloat16), m_ref[2],
                            preferred_element_type=jnp.float32)

        prm = p_ref[...]                                         # (3, W*Cout): bias/gamma/beta
        y = acc + prm[0:1, :]
        if bn_relu:
            cnt = NH * W                                         # elements per channel = N*H*W

            def coset_sum(row):
                # Exact per-channel sum of a (1, W*Cout) row, broadcast back to every (w, c)
                # lane, via log2(W) rotate-and-add steps (direction-independent).
                s = Cout
                while s < Lout:
                    row = row + pltpu.roll(row, shift=s, axis=1)
                    s *= 2
                return row

            mean = coset_sum(jnp.sum(y, axis=0, keepdims=True)) / cnt
            ex2 = coset_sum(jnp.sum(y * y, axis=0, keepdims=True)) / cnt
            var = jnp.maximum(ex2 - mean * mean, 0.0)            # clamp one-pass cancellation
            y = (y - mean) * (jax.lax.rsqrt(var + 1e-5) * prm[1:2, :]) + prm[2:3, :]
            y = jnp.maximum(y, 0.0)
        return y

    def resize(x, bh_ref, bw_ref):
        """Separable bilinear resize: block-diag row pass, then per-channel column pass."""
        y = jnp.dot(bh_ref[...], x, preferred_element_type=jnp.float32)
        return jnp.dot(y, bw_ref[...], preferred_element_type=jnp.float32)

    # ---- bottleneck: conv+BN+relu, conv+BN+relu ---------------------------------------------
    x = conv3x3(z_ref[...], m_b1, p_b1, H0, W0, CIN, CZ, True)
    x = conv3x3(x, m_b2, p_b2, H0, W0, CZ, CZ, True)

    # ---- channel attention: zz * sum_c((zz / ||zz||) * z_text) -------------------------------
    NH0, L0 = N * H0, W0 * CZ
    zt = zt_ref[...]                                             # (N, W0*CZ)
    ztb = jnp.concatenate(
        [jnp.broadcast_to(zt[n:n + 1, :], (H0, L0)) for n in range(N)], axis=0)
    pair = jnp.concatenate([x * x, x * ztb], axis=0)             # (2*NH0, L0)
    g = jnp.dot(pair, g_ref[...], preferred_element_type=jnp.float32)  # per-(n,h,w) group sums
    x = x * (g[NH0:2 * NH0, :] * jax.lax.rsqrt(g[0:NH0, :]))

    # ---- up0 (func='relu'): upsample x2, conv+BN+relu, conv+BN+relu --------------------------
    x = resize(x, bh0_ref, bw0_ref)
    H1, W1 = 2 * H0, 2 * W0
    x = conv3x3(x, m_u01, p_u01, H1, W1, CZ, CMID, True)
    x = conv3x3(x, m_u02, p_u02, H1, W1, CMID, CMID, True)

    # ---- up1 (func='None'): upsample x2, conv+BN+relu, conv (no BN / activation) -------------
    x = resize(x, bh1_ref, bw1_ref)
    H2, W2 = 2 * H1, 2 * W1
    x = conv3x3(x, m_u11, p_u11, H2, W2, CMID, COUT, True)
    x = conv3x3(x, m_u12, p_u12, H2, W2, COUT, COUT, False)

    # ---- final bilinear resize (align_corners=True) fused with sigmoid -----------------------
    o_ref[...] = jax.nn.sigmoid(resize(x, bh2_ref, bw2_ref))


# ----------------------------------------------------------------------------
# Host-side operand builders (shape-static; run at trace time)
# ----------------------------------------------------------------------------
def _bilinear_matrix(n_in, n_out, align_corners):
    """1-D PyTorch-compatible bilinear interpolation matrix, shape (n_out, n_in)."""
    idx = np.arange(n_out, dtype=np.float64)
    if align_corners:
        src = idx * ((n_in - 1) / (n_out - 1)) if n_out > 1 else np.zeros((n_out,))
    else:
        src = np.maximum((idx + 0.5) * (n_in / n_out) - 0.5, 0.0)   # PyTorch clamps at 0
    i0 = np.clip(np.floor(src).astype(np.int64), 0, n_in - 1)
    i1 = np.minimum(i0 + 1, n_in - 1)
    w1 = src - i0
    w0 = 1.0 - w1
    M = np.zeros((n_out, n_in), np.float64)
    M[np.arange(n_out), i0] += w0
    M[np.arange(n_out), i1] += w1
    return M


def _resize_operands(N, hin, win, hout, wout, C, align_corners):
    """Separable bilinear resize as two small f32 matmul operands."""
    Bh = _bilinear_matrix(hin, hout, align_corners)                   # (hout, hin)
    Bw = _bilinear_matrix(win, wout, align_corners)                   # (wout, win)
    bh = jnp.asarray(np.kron(np.eye(N), Bh), jnp.float32)             # (N*hout, N*hin)
    bw = jnp.asarray(np.kron(Bw.T, np.eye(C)), jnp.float32)           # (win*C, wout*C)
    return bh, bw


def _conv_operands(p, name, W):
    """Block-banded conv matrices (3, W*Cin, W*Cout) bf16 + bias/gamma/beta rows (3, W*Cout)."""
    w4 = p[name + '_w']                                  # (3, 3, Cin, Cout) = (ky, kx, ci, co)
    sup = np.eye(W, k=1, dtype=np.float32)               # kx=0 -> output column w reads w-1
    dia = np.eye(W, dtype=np.float32)                    # kx=1 -> column w
    sub = np.eye(W, k=-1, dtype=np.float32)              # kx=2 -> column w+1
    mats = [jnp.kron(sup, w4[ky, 0]) + jnp.kron(dia, w4[ky, 1]) + jnp.kron(sub, w4[ky, 2])
            for ky in range(3)]
    m = jnp.stack(mats).astype(jnp.bfloat16)             # (3, W*Cin, W*Cout)
    rows = jnp.stack([jnp.tile(p[name + '_b'], W),
                      jnp.tile(p[name + '_g'], W),
                      jnp.tile(p[name + '_beta'], W)]).astype(jnp.float32)   # (3, W*Cout)
    return m, rows


# ----------------------------------------------------------------------------
# Forward pass (mirrors MMDecoder.forward) -- single pallas_call
# ----------------------------------------------------------------------------
def mmdecoder_forward(z, z_text, p, out_size):
    """z: (N, H, W, Cin) NHWC, z_text: (N, z_size) -> (N, out_size[0], out_size[1], Cout)."""
    N, H, W, Cin = z.shape
    zs = z_text.shape[-1]
    Ho, Wo = out_size
    mid = p['u0c1_w'].shape[3]
    cout = p['u1c2_w'].shape[3]
    H1, W1, H2, W2 = 2 * H, 2 * W, 4 * H, 4 * W
    # in-kernel row masks / coset reductions use power-of-two bit tricks
    assert H & (H - 1) == 0 and W & (W - 1) == 0, "H, W must be powers of two"

    TOP = 8                                              # sublane-aligned top halo of the canvas
    z_flat = z.astype(jnp.float32).reshape(N * H, W * Cin)
    zt_rows = jnp.tile(z_text.astype(jnp.float32), (1, W))            # (N, W*zs)

    m_b1, p_b1 = _conv_operands(p, 'b1', W)
    m_b2, p_b2 = _conv_operands(p, 'b2', W)
    m_u01, p_u01 = _conv_operands(p, 'u0c1', W1)
    m_u02, p_u02 = _conv_operands(p, 'u0c2', W1)
    m_u11, p_u11 = _conv_operands(p, 'u1c1', W2)
    m_u12, p_u12 = _conv_operands(p, 'u1c2', W2)

    # attention group-sum matrix: per-(w) blocks of ones over the zs channel lanes
    G = jnp.asarray(np.kron(np.eye(W), np.ones((zs, zs))), jnp.float32)
    bh0, bw0 = _resize_operands(N, H, W, H1, W1, zs, align_corners=False)    # up0 Upsample
    bh1, bw1 = _resize_operands(N, H1, W1, H2, W2, mid, align_corners=False)  # up1 Upsample
    bh2, bw2 = _resize_operands(N, H2, W2, Ho, Wo, cout, align_corners=True)  # final interpolate

    lane_max = max(W * Cin, W * zs, W1 * zs, W1 * mid, W2 * mid, W2 * cout)
    canvas_rows = TOP + N * H2 + 8                        # live rows + 1-row halos (rounded)

    kernel = functools.partial(_mmdecoder_kernel, N=N, H0=H, W0=W, CIN=Cin,
                               CZ=zs, CMID=mid, COUT=cout, TOP=TOP)
    vmem = pl.BlockSpec(memory_space=pltpu.MemorySpace.VMEM)
    out = pl.pallas_call(
        kernel,
        out_shape=jax.ShapeDtypeStruct((N * Ho, Wo * cout), jnp.float32),
        in_specs=[vmem] * 21,
        out_specs=vmem,
        scratch_shapes=[pltpu.VMEM((canvas_rows, lane_max), jnp.float32)],
        compiler_params=pltpu.CompilerParams(vmem_limit_bytes=32 * 1024 * 1024),
    )(z_flat, zt_rows,
      m_b1, p_b1, m_b2, p_b2, m_u01, p_u01, m_u02, p_u02, m_u11, p_u11, m_u12, p_u12,
      G, bh0, bw0, bh1, bw1, bh2, bw2)
    # lane-dense kernel output (N*Ho, Wo*cout) -> NHWC; pure layout plumbing in XLA.
    return out.reshape(N, Ho, Wo, cout)


# ----------------------------------------------------------------------------
# Parameter init (deterministic, PyTorch-like: kaiming-uniform conv, BN gamma=1 beta=0)
# ----------------------------------------------------------------------------
def init_params(key, in_ch, z_size, mid_ch, out_ch):
    def conv_init(k, cin, cout):
        k1, k2 = jax.random.split(k)
        bound = 1.0 / math.sqrt(cin * 9)
        w = jax.random.uniform(k1, (3, 3, cin, cout), jnp.float32, -bound, bound)
        b = jax.random.uniform(k2, (cout,), jnp.float32, -bound, bound)
        return w, b

    keys = jax.random.split(key, 6)
    p = {}
    p['b1_w'], p['b1_b'] = conv_init(keys[0], in_ch, z_size)       # bottleneck.conv1
    p['b2_w'], p['b2_b'] = conv_init(keys[1], z_size, z_size)      # bottleneck.conv2
    p['u0c1_w'], p['u0c1_b'] = conv_init(keys[2], z_size, mid_ch)  # up0.conv1
    p['u0c2_w'], p['u0c2_b'] = conv_init(keys[3], mid_ch, mid_ch)  # up0.conv2
    p['u1c1_w'], p['u1c1_b'] = conv_init(keys[4], mid_ch, out_ch)  # up1.conv1
    p['u1c2_w'], p['u1c2_b'] = conv_init(keys[5], out_ch, out_ch)  # up1.conv2 (no BN/act)
    for name, c in [('b1', z_size), ('b2', z_size), ('u0c1', mid_ch),
                    ('u0c2', mid_ch), ('u1c1', out_ch), ('u1c2', out_ch)]:
        p[name + '_g'] = jnp.ones((c,), jnp.float32)
        p[name + '_beta'] = jnp.zeros((c,), jnp.float32)
    return p


if __name__ == "__main__":
    key = jax.random.PRNGKey(0)
    full_features = [4, 8, 8, 8, 8]          # only indices [3] and [4] are used
    z_size, out_channel, out_size = 16, 4, (24, 24)
    N, H, W = 2, 8, 8

    k1, k2, k3 = jax.random.split(key, 3)
    z = jax.random.normal(k1, (N, H, W, full_features[4]), jnp.float32)   # NHWC
    z_text = jax.random.normal(k2, (N, z_size), jnp.float32)
    params = init_params(k3, full_features[4], z_size, full_features[3], out_channel)

    fwd = jax.jit(functools.partial(mmdecoder_forward, out_size=out_size))
    out = jax.block_until_ready(fwd(z, z_text, params))
    assert out.shape == (N, out_size[0], out_size[1], out_channel), out.shape
    print("KERNEL_OK")
</pallas_src>

<mosaic_0001>
module attributes {stable_mosaic.version = 11 : i64} {
  func.func @_mmdecoder_kernel(%arg0: memref<16x64xf32, #tpu.memory_space<vmem>>, %arg1: memref<2x128xf32, #tpu.memory_space<vmem>>, %arg2: memref<3x64x128xbf16, #tpu.memory_space<vmem>>, %arg3: memref<3x128xf32, #tpu.memory_space<vmem>>, %arg4: memref<3x128x128xbf16, #tpu.memory_space<vmem>>, %arg5: memref<3x128xf32, #tpu.memory_space<vmem>>, %arg6: memref<3x256x128xbf16, #tpu.memory_space<vmem>>, %arg7: memref<3x128xf32, #tpu.memory_space<vmem>>, %arg8: memref<3x128x128xbf16, #tpu.memory_space<vmem>>, %arg9: memref<3x128xf32, #tpu.memory_space<vmem>>, %arg10: memref<3x256x128xbf16, #tpu.memory_space<vmem>>, %arg11: memref<3x128xf32, #tpu.memory_space<vmem>>, %arg12: memref<3x128x128xbf16, #tpu.memory_space<vmem>>, %arg13: memref<3x128xf32, #tpu.memory_space<vmem>>, %arg14: memref<128x128xf32, #tpu.memory_space<vmem>>, %arg15: memref<32x16xf32, #tpu.memory_space<vmem>>, %arg16: memref<128x256xf32, #tpu.memory_space<vmem>>, %arg17: memref<64x32xf32, #tpu.memory_space<vmem>>, %arg18: memref<128x256xf32, #tpu.memory_space<vmem>>, %arg19: memref<48x64xf32, #tpu.memory_space<vmem>>, %arg20: memref<128x96xf32, #tpu.memory_space<vmem>>, %arg21: memref<48x96xf32, #tpu.memory_space<vmem>>, %arg22: memref<80x256xf32, #tpu.memory_space<vmem>>) attributes {dimension_semantics = [], scalar_prefetch = 0 : i64, scratch_operands = 1 : i64, tpu.core_type = #tpu.core_type<tc>} {
    %cst = arith.constant 0.000000e+00 : f32
    %0 = vector.broadcast %cst : f32 to vector<80x256xf32>
    %c0 = arith.constant 0 : index
    %c0_0 = arith.constant 0 : index
    %1 = vector.load %arg22[%c0, %c0_0] : memref<80x256xf32, #tpu.memory_space<vmem>>, vector<80x256xf32>
    tpu.vector_store %arg22[%c0, %c0_0], %0 {strides = array<i32>} : memref<80x256xf32, #tpu.memory_space<vmem>>, vector<80x256xf32>,
    %c0_1 = arith.constant 0 : index
    %c0_2 = arith.constant 0 : index
    %2 = vector.load %arg0[%c0_1, %c0_2] : memref<16x64xf32, #tpu.memory_space<vmem>>, vector<16x64xf32>
    %c8 = arith.constant 8 : index
    %c0_3 = arith.constant 0 : index
    %3 = vector.load %arg22[%c8, %c0_3] : memref<80x256xf32, #tpu.memory_space<vmem>>, vector<16x64xf32>
    tpu.vector_store %arg22[%c8, %c0_3], %2 {strides = array<i32>} : memref<80x256xf32, #tpu.memory_space<vmem>>, vector<16x64xf32>,
    %4 = tpu.iota {dimensions = array<i32: 0>} : vector<16x1xi32>
    %c7_i32 = arith.constant 7 : i32
    %5 = vector.broadcast %c7_i32 : i32 to vector<16x1xi32>
    %6 = arith.andi %4, %5 : vector<16x1xi32>
    %c8_4 = arith.constant 8 : index
    %c0_5 = arith.constant 0 : index
    %7 = vector.load %arg22[%c8_4, %c0_5] : memref<80x256xf32, #tpu.memory_space<vmem>>, vector<16x64xf32>
    %c1_i32 = arith.constant 1 : i32
    %8 = vector.broadcast %c1_i32 : i32 to vector<16x1xi32>
    %9 = arith.cmpi sge, %6, %8 : vector<16x1xi32>
    %c7 = arith.constant 7 : index
    %c0_6 = arith.constant 0 : index
    %10 = vector.load %arg22[%c7, %c0_6] : memref<80x256xf32, #tpu.memory_space<vmem>>, vector<16x64xf32>
    %cst_7 = arith.constant 0.000000e+00 : f32
    %11 = vector.shape_cast %9 : vector<16x1xi1> to vector<16x1xi1>
    %12 = vector.broadcast %11 : vector<16x1xi1> to vector<16x64xi1>
    %13 = vector.broadcast %cst_7 : f32 to vector<16x64xf32>
    %14 = arith.select %12, %10, %13 : vector<16x64xi1>, vector<16x64xf32>
    %c7_i32_8 = arith.constant 7 : i32
    %15 = vector.broadcast %c7_i32_8 : i32 to vector<16x1xi32>
    %16 = arith.cmpi slt, %6, %15 : vector<16x1xi32>
    %c9 = arith.constant 9 : index
    %c0_9 = arith.constant 0 : index
    %17 = vector.load %arg22[%c9, %c0_9] : memref<80x256xf32, #tpu.memory_space<vmem>>, vector<16x64xf32>
    %cst_10 = arith.constant 0.000000e+00 : f32
    %18 = vector.shape_cast %16 : vector<16x1xi1> to vector<16x1xi1>
    %19 = vector.broadcast %18 : vector<16x1xi1> to vector<16x64xi1>
    %20 = vector.broadcast %cst_10 : f32 to vector<16x64xf32>
    %21 = arith.select %19, %17, %20 : vector<16x64xi1>, vector<16x64xf32>
    %22 = arith.truncf %14 : vector<16x64xf32> to vector<16x64xbf16>
    %c0_11 = arith.constant 0 : index
    %c0_12 = arith.constant 0 : index
    %c0_13 = arith.constant 0 : index
    %23 = vector.load %arg2[%c0_11, %c0_12, %c0_13] : memref<3x64x128xbf16, #tpu.memory_space<vmem>>, vector<1x64x128xbf16>
    %24 = vector.shape_cast %23 : vector<1x64x128xbf16> to vector<64x128xbf16>
    %cst_14 = arith.constant dense<0.000000e+00> : vector<16x128xf32>
    %25 = tpu.matmul %22, %24, %cst_14 {dimension_numbers = #tpu.dot_dimension_numbers<[1], [0], [0], [1], [0, 0, 1, 1], [], []>} : vector<16x64xbf16>, vector<64x128xbf16>, vector<16x128xf32> -> vector<16x128xf32>
    %26 = arith.truncf %7 : vector<16x64xf32> to vector<16x64xbf16>
    %c1 = arith.constant 1 : index
    %c0_15 = arith.constant 0 : index
    %c0_16 = arith.constant 0 : index
    %27 = vector.load %arg2[%c1, %c0_15, %c0_16] : memref<3x64x128xbf16, #tpu.memory_space<vmem>>, vector<1x64x128xbf16>
    %28 = vector.shape_cast %27 : vector<1x64x128xbf16> to vector<64x128xbf16>
    %cst_17 = arith.constant dense<0.000000e+00> : vector<16x128xf32>
    %29 = tpu.matmul %26, %28, %cst_17 {dimension_numbers = #tpu.dot_dimension_numbers<[1], [0], [0], [1], [0, 0, 1, 1], [], []>} : vector<16x64xbf16>, vector<64x128xbf16>, vector<16x128xf32> -> vector<16x128xf32>
    %30 = arith.addf %25, %29 : vector<16x128xf32>
    %31 = arith.truncf %21 : vector<16x64xf32> to vector<16x64xbf16>
    %c2 = arith.constant 2 : index
    %c0_18 = arith.constant 0 : index
    %c0_19 = arith.constant 0 : index
    %32 = vector.load %arg2[%c2, %c0_18, %c0_19] : memref<3x64x128xbf16, #tpu.memory_space<vmem>>, vector<1x64x128xbf16>
    %33 = vector.shape_cast %32 : vector<1x64x128xbf16> to vector<64x128xbf16>
    %cst_20 = arith.constant dense<0.000000e+00> : vector<16x128xf32>
    %34 = tpu.matmul %31, %33, %cst_20 {dimension_numbers = #tpu.dot_dimension_numbers<[1], [0], [0], [1], [0, 0, 1, 1], [], []>} : vector<16x64xbf16>, vector<64x128xbf16>, vector<16x128xf32> -> vector<16x128xf32>
    %35 = arith.addf %30, %34 : vector<16x128xf32>
    %c0_21 = arith.constant 0 : index
    %c0_22 = arith.constant 0 : index
    %36 = vector.load %arg3[%c0_21, %c0_22] : memref<3x128xf32, #tpu.memory_space<vmem>>, vector<3x128xf32>
    %37 = vector.extract_strided_slice %36 {offsets = [0, 0], sizes = [1, 128], strides = [1, 1]} : vector<3x128xf32> to vector<1x128xf32>
    %38 = vector.broadcast %37 : vector<1x128xf32> to vector<16x128xf32>
    %39 = arith.addf %35, %38 : vector<16x128xf32>
    %cst_23 = arith.constant dense<0.000000e+00> : vector<128xf32>
    %40 = vector.multi_reduction <add>, %39, %cst_23 [0] : vector<16x128xf32> to vector<128xf32>
    %41 = vector.shape_cast %40 : vector<128xf32> to vector<1x128xf32>
    %c16_i32 = arith.constant 16 : i32
    %42 = tpu.dynamic_rotate %41 by %c16_i32 dim 1 : vector<1x128xf32>, i32 -> vector<1x128xf32>
    %43 = arith.addf %41, %42 : vector<1x128xf32>
    %c32_i32 = arith.constant 32 : i32
    %44 = tpu.dynamic_rotate %43 by %c32_i32 dim 1 : vector<1x128xf32>, i32 -> vector<1x128xf32>
    %45 = arith.addf %43, %44 : vector<1x128xf32>
    %c64_i32 = arith.constant 64 : i32
    %46 = tpu.dynamic_rotate %45 by %c64_i32 dim 1 : vector<1x128xf32>, i32 -> vector<1x128xf32>
    %47 = arith.addf %45, %46 : vector<1x128xf32>
    %cst_24 = arith.constant 1.280000e+02 : f32
    %48 = vector.broadcast %cst_24 : f32 to vector<1x128xf32>
    %49 = arith.divf %47, %48 : vector<1x128xf32>
    %50 = arith.mulf %39, %39 : vector<16x128xf32>
    %cst_25 = arith.constant dense<0.000000e+00> : vector<128xf32>
    %51 = vector.multi_reduction <add>, %50, %cst_25 [0] : vector<16x128xf32> to vector<128xf32>
    %52 = vector.shape_cast %51 : vector<128xf32> to vector<1x128xf32>
    %c16_i32_26 = arith.constant 16 : i32
    %53 = tpu.dynamic_rotate %52 by %c16_i32_26 dim 1 : vector<1x128xf32>, i32 -> vector<1x128xf32>
    %54 = arith.addf %52, %53 : vector<1x128xf32>
    %c32_i32_27 = arith.constant 32 : i32
    %55 = tpu.dynamic_rotate %54 by %c32_i32_27 dim 1 : vector<1x128xf32>, i32 -> vector<1x128xf32>
    %56 = arith.addf %54, %55 : vector<1x128xf32>
    %c64_i32_28 = arith.constant 64 : i32
    %57 = tpu.dynamic_rotate %56 by %c64_i32_28 dim 1 : vector<1x128xf32>, i32 -> vector<1x128xf32>
    %58 = arith.addf %56, %57 : vector<1x128xf32>
    %cst_29 = arith.constant 1.280000e+02 : f32
    %59 = vector.broadcast %cst_29 : f32 to vector<1x128xf32>
    %60 = arith.divf %58, %59 : vector<1x128xf32>
    %61 = arith.mulf %49, %49 : vector<1x128xf32>
    %62 = arith.subf %60, %61 : vector<1x128xf32>
    %cst_30 = arith.constant 0.000000e+00 : f32
    %63 = vector.broadcast %cst_30 : f32 to vector<1x128xf32>
    %64 = arith.maximumf %62, %63 : vector<1x128xf32>
    %65 = vector.broadcast %49 : vector<1x128xf32> to vector<16x128xf32>
    %66 = arith.subf %39, %65 : vector<16x128xf32>
    %cst_31 = arith.constant 9.99999974E-6 : f32
    %67 = vector.broadcast %cst_31 : f32 to vector<1x128xf32>
    %68 = arith.addf %64, %67 : vector<1x128xf32>
    %69 = math.rsqrt %68 : vector<1x128xf32>
    %70 = vector.extract_strided_slice %36 {offsets = [1, 0], sizes = [1, 128], strides = [1, 1]} : vector<3x128xf32> to vector<1x128xf32>
    %71 = arith.mulf %69, %70 : vector<1x128xf32>
    %72 = vector.broadcast %71 : vector<1x128xf32> to vector<16x128xf32>
    %73 = arith.mulf %66, %72 : vector<16x128xf32>
    %74 = vector.extract_strided_slice %36 {offsets = [2, 0], sizes = [1, 128], strides = [1, 1]} : vector<3x128xf32> to vector<1x128xf32>
    %75 = vector.broadcast %74 : vector<1x128xf32> to vector<16x128xf32>
    %76 = arith.addf %73, %75 : vector<16x128xf32>
    %cst_32 = arith.constant 0.000000e+00 : f32
    %77 = vector.broadcast %cst_32 : f32 to vector<16x128xf32>
    %78 = arith.maximumf %76, %77 : vector<16x128xf32>
    %c8_33 = arith.constant 8 : index
    %c0_34 = arith.constant 0 : index
    %79 = vector.load %arg22[%c8_33, %c0_34] : memref<80x256xf32, #tpu.memory_space<vmem>>, vector<16x128xf32>
    tpu.vector_store %arg22[%c8_33, %c0_34], %78 {strides = array<i32>} : memref<80x256xf32, #tpu.memory_space<vmem>>, vector<16x128xf32>,
    %80 = tpu.iota {dimensions = array<i32: 0>} : vector<16x1xi32>
    %c7_i32_35 = arith.constant 7 : i32
    %81 = vector.broadcast %c7_i32_35 : i32 to vector<16x1xi32>
    %82 = arith.andi %80, %81 : vector<16x1xi32>
    %c8_36 = arith.constant 8 : index
    %c0_37 = arith.constant 0 : index
    %83 = vector.load %arg22[%c8_36, %c0_37] : memref<80x256xf32, #tpu.memory_space<vmem>>, vector<16x128xf32>
    %c1_i32_38 = arith.constant 1 : i32
    %84 = vector.broadcast %c1_i32_38 : i32 to vector<16x1xi32>
    %85 = arith.cmpi sge, %82, %84 : vector<16x1xi32>
    %c7_39 = arith.constant 7 : index
    %c0_40 = arith.constant 0 : index
    %86 = vector.load %arg22[%c7_39, %c0_40] : memref<80x256xf32, #tpu.memory_space<vmem>>, vector<16x128xf32>
    %cst_41 = arith.constant 0.000000e+00 : f32
    %87 = vector.shape_cast %85 : vector<16x1xi1> to vector<16x1xi1>
    %88 = vector.broadcast %87 : vector<16x1xi1> to vector<16x128xi1>
    %89 = vector.broadcast %cst_41 : f32 to vector<16x128xf32>
    %90 = arith.select %88, %86, %89 : vector<16x128xi1>, vector<16x128xf32>
    %c7_i32_42 = arith.constant 7 : i32
    %91 = vector.broadcast %c7_i32_42 : i32 to vector<16x1xi32>
    %92 = arith.cmpi slt, %82, %91 : vector<16x1xi32>
    %c9_43 = arith.constant 9 : index
    %c0_44 = arith.constant 0 : index
    %93 = vector.load %arg22[%c9_43, %c0_44] : memref<80x256xf32, #tpu.memory_space<vmem>>, vector<16x128xf32>
    %cst_45 = arith.constant 0.000000e+00 : f32
    %94 = vector.shape_cast %92 : vector<16x1xi1> to vector<16x1xi1>
    %95 = vector.broadcast %94 : vector<16x1xi1> to vector<16x128xi1>
    %96 = vector.broadcast %cst_45 : f32 to vector<16x128xf32>
    %97 = arith.select %95, %93, %96 : vector<16x128xi1>, vector<16x128xf32>
    %98 = arith.truncf %90 : vector<16x128xf32> to vector<16x128xbf16>
    %c0_46 = arith.constant 0 : index
    %c0_47 = arith.constant 0 : index
    %c0_48 = arith.constant 0 : index
    %99 = vector.load %arg4[%c0_46, %c0_47, %c0_48] : memref<3x128x128xbf16, #tpu.memory_space<vmem>>, vector<1x128x128xbf16>
    %100 = vector.shape_cast %99 : vector<1x128x128xbf16> to vector<128x128xbf16>
    %cst_49 = arith.constant dense<0.000000e+00> : vector<16x128xf32>
    %101 = tpu.matmul %98, %100, %cst_49 {dimension_numbers = #tpu.dot_dimension_numbers<[1], [0], [0], [1], [0, 0, 1, 1], [], []>} : vector<16x128xbf16>, vector<128x128xbf16>, vector<16x128xf32> -> vector<16x128xf32>
    %102 = arith.truncf %83 : vector<16x128xf32> to vector<16x128xbf16>
    %c1_50 = arith.constant 1 : index
    %c0_51 = arith.constant 0 : index
    %c0_52 = arith.constant 0 : index
    %103 = vector.load %arg4[%c1_50, %c0_51, %c0_52] : memref<3x128x128xbf16, #tpu.memory_space<vmem>>, vector<1x128x128xbf16>
    %104 = vector.shape_cast %103 : vector<1x128x128xbf16> to vector<128x128xbf16>
    %cst_53 = arith.constant dense<0.000000e+00> : vector<16x128xf32>
    %105 = tpu.matmul %102, %104, %cst_53 {dimension_numbers = #tpu.dot_dimension_numbers<[1], [0], [0], [1], [0, 0, 1, 1], [], []>} : vector<16x128xbf16>, vector<128x128xbf16>, vector<16x128xf32> -> vector<16x128xf32>
    %106 = arith.addf %101, %105 : vector<16x128xf32>
    %107 = arith.truncf %97 : vector<16x128xf32> to vector<16x128xbf16>
    %c2_54 = arith.constant 2 : index
    %c0_55 = arith.constant 0 : index
    %c0_56 = arith.constant 0 : index
    %108 = vector.load %arg4[%c2_54, %c0_55, %c0_56] : memref<3x128x128xbf16, #tpu.memory_space<vmem>>, vector<1x128x128xbf16>
    %109 = vector.shape_cast %108 : vector<1x128x128xbf16> to vector<128x128xbf16>
    %cst_57 = arith.constant dense<0.000000e+00> : vector<16x128xf32>
    %110 = tpu.matmul %107, %109, %cst_57 {dimension_numbers = #tpu.dot_dimension_numbers<[1], [0], [0], [1], [0, 0, 1, 1], [], []>} : vector<16x128xbf16>, vector<128x128xbf16>, vector<16x128xf32> -> vector<16x128xf32>
    %111 = arith.addf %106, %110 : vector<16x128xf32>
    %c0_58 = arith.constant 0 : index
    %c0_59 = arith.constant 0 : index
    %112 = vector.load %arg5[%c0_58, %c0_59] : memref<3x128xf32, #tpu.memory_space<vmem>>, vector<3x128xf32>
    %113 = vector.extract_strided_slice %112 {offsets = [0, 0], sizes = [1, 128], strides = [1, 1]} : vector<3x128xf32> to vector<1x128xf32>
    %114 = vector.broadcast %113 : vector<1x128xf32> to vector<16x128xf32>
    %115 = arith.addf %111, %114 : vector<16x128xf32>
    %cst_60 = arith.constant dense<0.000000e+00> : vector<128xf32>
    %116 = vector.multi_reduction <add>, %115, %cst_60 [0] : vector<16x128xf32> to vector<128xf32>
    %117 = vector.shape_cast %116 : vector<128xf32> to vector<1x128xf32>
    %c16_i32_61 = arith.constant 16 : i32
    %118 = tpu.dynamic_rotate %117 by %c16_i32_61 dim 1 : vector<1x128xf32>, i32 -> vector<1x128xf32>
    %119 = arith.addf %117, %118 : vector<1x128xf32>
    %c32_i32_62 = arith.constant 32 : i32
    %120 = tpu.dynamic_rotate %119 by %c32_i32_62 dim 1 : vector<1x128xf32>, i32 -> vector<1x128xf32>
    %121 = arith.addf %119, %120 : vector<1x128xf32>
    %c64_i32_63 = arith.constant 64 : i32
    %122 = tpu.dynamic_rotate %121 by %c64_i32_63 dim 1 : vector<1x128xf32>, i32 -> vector<1x128xf32>
    %123 = arith.addf %121, %122 : vector<1x128xf32>
    %cst_64 = arith.constant 1.280000e+02 : f32
    %124 = vector.broadcast %cst_64 : f32 to vector<1x128xf32>
    %125 = arith.divf %123, %124 : vector<1x128xf32>
    %126 = arith.mulf %115, %115 : vector<16x128xf32>
    %cst_65 = arith.constant dense<0.000000e+00> : vector<128xf32>
    %127 = vector.multi_reduction <add>, %126, %cst_65 [0] : vector<16x128xf32> to vector<128xf32>
    %128 = vector.shape_cast %127 : vector<128xf32> to vector<1x128xf32>
    %c16_i32_66 = arith.constant 16 : i32
    %129 = tpu.dynamic_rotate %128 by %c16_i32_66 dim 1 : vector<1x128xf32>, i32 -> vector<1x128xf32>
    %130 = arith.addf %128, %129 : vector<1x128xf32>
    %c32_i32_67 = arith.constant 32 : i32
    %131 = tpu.dynamic_rotate %130 by %c32_i32_67 dim 1 : vector<1x128xf32>, i32 -> vector<1x128xf32>
    %132 = arith.addf %130, %131 : vector<1x128xf32>
    %c64_i32_68 = arith.constant 64 : i32
    %133 = tpu.dynamic_rotate %132 by %c64_i32_68 dim 1 : vector<1x128xf32>, i32 -> vector<1x128xf32>
    %134 = arith.addf %132, %133 : vector<1x128xf32>
    %cst_69 = arith.constant 1.280000e+02 : f32
    %135 = vector.broadcast %cst_69 : f32 to vector<1x128xf32>
    %136 = arith.divf %134, %135 : vector<1x128xf32>
    %137 = arith.mulf %125, %125 : vector<1x128xf32>
    %138 = arith.subf %136, %137 : vector<1x128xf32>
    %cst_70 = arith.constant 0.000000e+00 : f32
    %139 = vector.broadcast %cst_70 : f32 to vector<1x128xf32>
    %140 = arith.maximumf %138, %139 : vector<1x128xf32>
    %141 = vector.broadcast %125 : vector<1x128xf32> to vector<16x128xf32>
    %142 = arith.subf %115, %141 : vector<16x128xf32>
    %cst_71 = arith.constant 9.99999974E-6 : f32
    %143 = vector.broadcast %cst_71 : f32 to vector<1x128xf32>
    %144 = arith.addf %140, %143 : vector<1x128xf32>
    %145 = math.rsqrt %144 : vector<1x128xf32>
    %146 = vector.extract_strided_slice %112 {offsets = [1, 0], sizes = [1, 128], strides = [1, 1]} : vector<3x128xf32> to vector<1x128xf32>
    %147 = arith.mulf %145, %146 : vector<1x128xf32>
    %148 = vector.broadcast %147 : vector<1x128xf32> to vector<16x128xf32>
    %149 = arith.mulf %142, %148 : vector<16x128xf32>
    %150 = vector.extract_strided_slice %112 {offsets = [2, 0], sizes = [1, 128], strides = [1, 1]} : vector<3x128xf32> to vector<1x128xf32>
    %151 = vector.broadcast %150 : vector<1x128xf32> to vector<16x128xf32>
    %152 = arith.addf %149, %151 : vector<16x128xf32>
    %cst_72 = arith.constant 0.000000e+00 : f32
    %153 = vector.broadcast %cst_72 : f32 to vector<16x128xf32>
    %154 = arith.maximumf %152, %153 : vector<16x128xf32>
    %c0_73 = arith.constant 0 : index
    %c0_74 = arith.constant 0 : index
    %155 = vector.load %arg1[%c0_73, %c0_74] : memref<2x128xf32, #tpu.memory_space<vmem>>, vector<2x128xf32>
    %156 = vector.extract_strided_slice %155 {offsets = [0, 0], sizes = [1, 128], strides = [1, 1]} : vector<2x128xf32> to vector<1x128xf32>
    %157 = vector.shape_cast %156 : vector<1x128xf32> to vector<1x128xf32>
    %158 = vector.broadcast %157 : vector<1x128xf32> to vector<8x128xf32>
    %159 = vector.extract_strided_slice %155 {offsets = [1, 0], sizes = [1, 128], strides = [1, 1]} : vector<2x128xf32> to vector<1x128xf32>
    %160 = vector.shape_cast %159 : vector<1x128xf32> to vector<1x128xf32>
    %161 = vector.broadcast %160 : vector<1x128xf32> to vector<8x128xf32>
    %162 = tpu.concatenate %158, %161 in 0 : vector<8x128xf32>, vector<8x128xf32> -> vector<16x128xf32>
    %163 = arith.mulf %154, %154 : vector<16x128xf32>
    %164 = arith.mulf %154, %162 : vector<16x128xf32>
    %165 = tpu.concatenate %163, %164 in 0 : vector<16x128xf32>, vector<16x128xf32> -> vector<32x128xf32>
    %c0_75 = arith.constant 0 : index
    %c0_76 = arith.constant 0 : index
    %166 = vector.load %arg14[%c0_75, %c0_76] : memref<128x128xf32, #tpu.memory_space<vmem>>, vector<128x128xf32>
    %cst_77 = arith.constant dense<0.000000e+00> : vector<32x128xf32>
    %167 = tpu.matmul %165, %166, %cst_77 {dimension_numbers = #tpu.dot_dimension_numbers<[1], [0], [0], [1], [0, 0, 1, 1], [], []>} : vector<32x128xf32>, vector<128x128xf32>, vector<32x128xf32> -> vector<32x128xf32>
    %168 = vector.extract_strided_slice %167 {offsets = [16, 0], sizes = [16, 128], strides = [1, 1]} : vector<32x128xf32> to vector<16x128xf32>
    %169 = vector.extract_strided_slice %167 {offsets = [0, 0], sizes = [16, 128], strides = [1, 1]} : vector<32x128xf32> to vector<16x128xf32>
    %170 = math.rsqrt %169 : vector<16x128xf32>
    %171 = arith.mulf %168, %170 : vector<16x128xf32>
    %172 = arith.mulf %154, %171 : vector<16x128xf32>
    %c0_78 = arith.constant 0 : index
    %c0_79 = arith.constant 0 : index
    %173 = vector.load %arg15[%c0_78, %c0_79] : memref<32x16xf32, #tpu.memory_space<vmem>>, vector<32x16xf32>
    %cst_80 = arith.constant dense<0.000000e+00> : vector<32x128xf32>
    %174 = tpu.matmul %173, %172, %cst_80 {dimension_numbers = #tpu.dot_dimension_numbers<[1], [0], [0], [1], [0, 0, 1, 1], [], []>} : vector<32x16xf32>, vector<16x128xf32>, vector<32x128xf32> -> vector<32x128xf32>
    %c0_81 = arith.constant 0 : index
    %c0_82 = arith.constant 0 : index
    %175 = vector.load %arg16[%c0_81, %c0_82] : memref<128x256xf32, #tpu.memory_space<vmem>>, vector<128x256xf32>
    %cst_83 = arith.constant dense<0.000000e+00> : vector<32x256xf32>
    %176 = tpu.matmul %174, %175, %cst_83 {dimension_numbers = #tpu.dot_dimension_numbers<[1], [0], [0], [1], [0, 0, 1, 1], [], []>} : vector<32x128xf32>, vector<128x256xf32>, vector<32x256xf32> -> vector<32x256xf32>
    %c8_84 = arith.constant 8 : index
    %c0_85 = arith.constant 0 : index
    %177 = vector.load %arg22[%c8_84, %c0_85] : memref<80x256xf32, #tpu.memory_space<vmem>>, vector<32x256xf32>
    tpu.vector_store %arg22[%c8_84, %c0_85], %176 {strides = array<i32>} : memref<80x256xf32, #tpu.memory_space<vmem>>, vector<32x256xf32>,
    %178 = tpu.iota {dimensions = array<i32: 0>} : vector<32x1xi32>
    %c15_i32 = arith.constant 15 : i32
    %179 = vector.broadcast %c15_i32 : i32 to vector<32x1xi32>
    %180 = arith.andi %178, %179 : vector<32x1xi32>
    %c8_86 = arith.constant 8 : index
    %c0_87 = arith.constant 0 : index
    %181 = vector.load %arg22[%c8_86, %c0_87] : memref<80x256xf32, #tpu.memory_space<vmem>>, vector<32x256xf32>
    %c1_i32_88 = arith.constant 1 : i32
    %182 = vector.broadcast %c1_i32_88 : i32 to vector<32x1xi32>
    %183 = arith.cmpi sge, %180, %182 : vector<32x1xi32>
    %c7_89 = arith.constant 7 : index
    %c0_90 = arith.constant 0 : index
    %184 = vector.load %arg22[%c7_89, %c0_90] : memref<80x256xf32, #tpu.memory_space<vmem>>, vector<32x256xf32>
    %cst_91 = arith.constant 0.000000e+00 : f32
    %185 = vector.shape_cast %183 : vector<32x1xi1> to vector<32x1xi1>
    %186 = vector.broadcast %185 : vector<32x1xi1> to vector<32x256xi1>
    %187 = vector.broadcast %cst_91 : f32 to vector<32x256xf32>
    %188 = arith.select %186, %184, %187 : vector<32x256xi1>, vector<32x256xf32>
    %c15_i32_92 = arith.constant 15 : i32
    %189 = vector.broadcast %c15_i32_92 : i32 to vector<32x1xi32>
    %190 = arith.cmpi slt, %180, %189 : vector<32x1xi32>
    %c9_93 = arith.constant 9 : index
    %c0_94 = arith.constant 0 : index
    %191 = vector.load %arg22[%c9_93, %c0_94] : memref<80x256xf32, #tpu.memory_space<vmem>>, vector<32x256xf32>
    %cst_95 = arith.constant 0.000000e+00 : f32
    %192 = vector.shape_cast %190 : vector<32x1xi1> to vector<32x1xi1>
    %193 = vector.broadcast %192 : vector<32x1xi1> to vector<32x256xi1>
    %194 = vector.broadcast %cst_95 : f32 to vector<32x256xf32>
    %195 = arith.select %193, %191, %194 : vector<32x256xi1>, vector<32x256xf32>
    %196 = arith.truncf %188 : vector<32x256xf32> to vector<32x256xbf16>
    %c0_96 = arith.constant 0 : index
    %c0_97 = arith.constant 0 : index
    %c0_98 = arith.constant 0 : index
    %197 = vector.load %arg6[%c0_96, %c0_97, %c0_98] : memref<3x256x128xbf16, #tpu.memory_space<vmem>>, vector<1x256x128xbf16>
    %198 = vector.shape_cast %197 : vector<1x256x128xbf16> to vector<256x128xbf16>
    %cst_99 = arith.constant dense<0.000000e+00> : vector<32x128xf32>
    %199 = tpu.matmul %196, %198, %cst_99 {dimension_numbers = #tpu.dot_dimension_numbers<[1], [0], [0], [1], [0, 0, 1, 1], [], []>} : vector<32x256xbf16>, vector<256x128xbf16>, vector<32x128xf32> -> vector<32x128xf32>
    %200 = arith.truncf %181 : vector<32x256xf32> to vector<32x256xbf16>
    %c1_100 = arith.constant 1 : index
    %c0_101 = arith.constant 0 : index
    %c0_102 = arith.constant 0 : index
    %201 = vector.load %arg6[%c1_100, %c0_101, %c0_102] : memref<3x256x128xbf16, #tpu.memory_space<vmem>>, vector<1x256x128xbf16>
    %202 = vector.shape_cast %201 : vector<1x256x128xbf16> to vector<256x128xbf16>
    %cst_103 = arith.constant dense<0.000000e+00> : vector<32x128xf32>
    %203 = tpu.matmul %200, %202, %cst_103 {dimension_numbers = #tpu.dot_dimension_numbers<[1], [0], [0], [1], [0, 0, 1, 1], [], []>} : vector<32x256xbf16>, vector<256x128xbf16>, vector<32x128xf32> -> vector<32x128xf32>
    %204 = arith.addf %199, %203 : vector<32x128xf32>
    %205 = arith.truncf %195 : vector<32x256xf32> to vector<32x256xbf16>
    %c2_104 = arith.constant 2 : index
    %c0_105 = arith.constant 0 : index
    %c0_106 = arith.constant 0 : index
    %206 = vector.load %arg6[%c2_104, %c0_105, %c0_106] : memref<3x256x128xbf16, #tpu.memory_space<vmem>>, vector<1x256x128xbf16>
    %207 = vector.shape_cast %206 : vector<1x256x128xbf16> to vector<256x128xbf16>
    %cst_107 = arith.constant dense<0.000000e+00> : vector<32x128xf32>
    %208 = tpu.matmul %205, %207, %cst_107 {dimension_numbers = #tpu.dot_dimension_numbers<[1], [0], [0], [1], [0, 0, 1, 1], [], []>} : vector<32x256xbf16>, vector<256x128xbf16>, vector<32x128xf32> -> vector<32x128xf32>
    %209 = arith.addf %204, %208 : vector<32x128xf32>
    %c0_108 = arith.constant 0 : index
    %c0_109 = arith.constant 0 : index
    %210 = vector.load %arg7[%c0_108, %c0_109] : memref<3x128xf32, #tpu.memory_space<vmem>>, vector<3x128xf32>
    %211 = vector.extract_strided_slice %210 {offsets = [0, 0], sizes = [1, 128], strides = [1, 1]} : vector<3x128xf32> to vector<1x128xf32>
    %212 = vector.broadcast %211 : vector<1x128xf32> to vector<32x128xf32>
    %213 = arith.addf %209, %212 : vector<32x128xf32>
    %cst_110 = arith.constant dense<0.000000e+00> : vector<128xf32>
    %214 = vector.multi_reduction <add>, %213, %cst_110 [0] : vector<32x128xf32> to vector<128xf32>
    %215 = vector.shape_cast %214 : vector<128xf32> to vector<1x128xf32>
    %c8_i32 = arith.constant 8 : i32
    %216 = tpu.dynamic_rotate %215 by %c8_i32 dim 1 : vector<1x128xf32>, i32 -> vector<1x128xf32>
    %217 = arith.addf %215, %216 : vector<1x128xf32>
    %c16_i32_111 = arith.constant 16 : i32
    %218 = tpu.dynamic_rotate %217 by %c16_i32_111 dim 1 : vector<1x128xf32>, i32 -> vector<1x128xf32>
    %219 = arith.addf %217, %218 : vector<1x128xf32>
    %c32_i32_112 = arith.constant 32 : i32
    %220 = tpu.dynamic_rotate %219 by %c32_i32_112 dim 1 : vector<1x128xf32>, i32 -> vector<1x128xf32>
    %221 = arith.addf %219, %220 : vector<1x128xf32>
    %c64_i32_113 = arith.constant 64 : i32
    %222 = tpu.dynamic_rotate %221 by %c64_i32_113 dim 1 : vector<1x128xf32>, i32 -> vector<1x128xf32>
    %223 = arith.addf %221, %222 : vector<1x128xf32>
    %cst_114 = arith.constant 5.120000e+02 : f32
    %224 = vector.broadcast %cst_114 : f32 to vector<1x128xf32>
    %225 = arith.divf %223, %224 : vector<1x128xf32>
    %226 = arith.mulf %213, %213 : vector<32x128xf32>
    %cst_115 = arith.constant dense<0.000000e+00> : vector<128xf32>
    %227 = vector.multi_reduction <add>, %226, %cst_115 [0] : vector<32x128xf32> to vector<128xf32>
    %228 = vector.shape_cast %227 : vector<128xf32> to vector<1x128xf32>
    %c8_i32_116 = arith.constant 8 : i32
    %229 = tpu.dynamic_rotate %228 by %c8_i32_116 dim 1 : vector<1x128xf32>, i32 -> vector<1x128xf32>
    %230 = arith.addf %228, %229 : vector<1x128xf32>
    %c16_i32_117 = arith.constant 16 : i32
    %231 = tpu.dynamic_rotate %230 by %c16_i32_117 dim 1 : vector<1x128xf32>, i32 -> vector<1x128xf32>
    %232 = arith.addf %230, %231 : vector<1x128xf32>
    %c32_i32_118 = arith.constant 32 : i32
    %233 = tpu.dynamic_rotate %232 by %c32_i32_118 dim 1 : vector<1x128xf32>, i32 -> vector<1x128xf32>
    %234 = arith.addf %232, %233 : vector<1x128xf32>
    %c64_i32_119 = arith.constant 64 : i32
    %235 = tpu.dynamic_rotate %234 by %c64_i32_119 dim 1 : vector<1x128xf32>, i32 -> vector<1x128xf32>
    %236 = arith.addf %234, %235 : vector<1x128xf32>
    %cst_120 = arith.constant 5.120000e+02 : f32
    %237 = vector.broadcast %cst_120 : f32 to vector<1x128xf32>
    %238 = arith.divf %236, %237 : vector<1x128xf32>
    %239 = arith.mulf %225, %225 : vector<1x128xf32>
    %240 = arith.subf %238, %239 : vector<1x128xf32>
    %cst_121 = arith.constant 0.000000e+00 : f32
    %241 = vector.broadcast %cst_121 : f32 to vector<1x128xf32>
    %242 = arith.maximumf %240, %241 : vector<1x128xf32>
    %243 = vector.broadcast %225 : vector<1x128xf32> to vector<32x128xf32>
    %244 = arith.subf %213, %243 : vector<32x128xf32>
    %cst_122 = arith.constant 9.99999974E-6 : f32
    %245 = vector.broadcast %cst_122 : f32 to vector<1x128xf32>
    %246 = arith.addf %242, %245 : vector<1x128xf32>
    %247 = math.rsqrt %246 : vector<1x128xf32>
    %248 = vector.extract_strided_slice %210 {offsets = [1, 0], sizes = [1, 128], strides = [1, 1]} : vector<3x128xf32> to vector<1x128xf32>
    %249 = arith.mulf %247, %248 : vector<1x128xf32>
    %250 = vector.broadcast %249 : vector<1x128xf32> to vector<32x128xf32>
    %251 = arith.mulf %244, %250 : vector<32x128xf32>
    %252 = vector.extract_strided_slice %210 {offsets = [2, 0], sizes = [1, 128], strides = [1, 1]} : vector<3x128xf32> to vector<1x128xf32>
    %253 = vector.broadcast %252 : vector<1x128xf32> to vector<32x128xf32>
    %254 = arith.addf %251, %253 : vector<32x128xf32>
    %cst_123 = arith.constant 0.000000e+00 : f32
    %255 = vector.broadcast %cst_123 : f32 to vector<32x128xf32>
    %256 = arith.maximumf %254, %255 : vector<32x128xf32>
    %c8_124 = arith.constant 8 : index
    %c0_125 = arith.constant 0 : index
    %257 = vector.load %arg22[%c8_124, %c0_125] : memref<80x256xf32, #tpu.memory_space<vmem>>, vector<32x128xf32>
    tpu.vector_store %arg22[%c8_124, %c0_125], %256 {strides = array<i32>} : memref<80x256xf32, #tpu.memory_space<vmem>>, vector<32x128xf32>,
    %258 = tpu.iota {dimensions = array<i32: 0>} : vector<32x1xi32>
    %c15_i32_126 = arith.constant 15 : i32
    %259 = vector.broadcast %c15_i32_126 : i32 to vector<32x1xi32>
    %260 = arith.andi %258, %259 : vector<32x1xi32>
    %c8_127 = arith.constant 8 : index
    %c0_128 = arith.constant 0 : index
    %261 = vector.load %arg22[%c8_127, %c0_128] : memref<80x256xf32, #tpu.memory_space<vmem>>, vector<32x128xf32>
    %c1_i32_129 = arith.constant 1 : i32
    %262 = vector.broadcast %c1_i32_129 : i32 to vector<32x1xi32>
    %263 = arith.cmpi sge, %260, %262 : vector<32x1xi32>
    %c7_130 = arith.constant 7 : index
    %c0_131 = arith.constant 0 : index
    %264 = vector.load %arg22[%c7_130, %c0_131] : memref<80x256xf32, #tpu.memory_space<vmem>>, vector<32x128xf32>
    %cst_132 = arith.constant 0.000000e+00 : f32
    %265 = vector.shape_cast %263 : vector<32x1xi1> to vector<32x1xi1>
    %266 = vector.broadcast %265 : vector<32x1xi1> to vector<32x128xi1>
    %267 = vector.broadcast %cst_132 : f32 to vector<32x128xf32>
    %268 = arith.select %266, %264, %267 : vector<32x128xi1>, vector<32x128xf32>
    %c15_i32_133 = arith.constant 15 : i32
    %269 = vector.broadcast %c15_i32_133 : i32 to vector<32x1xi32>
    %270 = arith.cmpi slt, %260, %269 : vector<32x1xi32>
    %c9_134 = arith.constant 9 : index
    %c0_135 = arith.constant 0 : index
    %271 = vector.load %arg22[%c9_134, %c0_135] : memref<80x256xf32, #tpu.memory_space<vmem>>, vector<32x128xf32>
    %cst_136 = arith.constant 0.000000e+00 : f32
    %272 = vector.shape_cast %270 : vector<32x1xi1> to vector<32x1xi1>
    %273 = vector.broadcast %272 : vector<32x1xi1> to vector<32x128xi1>
    %274 = vector.broadcast %cst_136 : f32 to vector<32x128xf32>
    %275 = arith.select %273, %271, %274 : vector<32x128xi1>, vector<32x128xf32>
    %276 = arith.truncf %268 : vector<32x128xf32> to vector<32x128xbf16>
    %c0_137 = arith.constant 0 : index
    %c0_138 = arith.constant 0 : index
    %c0_139 = arith.constant 0 : index
    %277 = vector.load %arg8[%c0_137, %c0_138, %c0_139] : memref<3x128x128xbf16, #tpu.memory_space<vmem>>, vector<1x128x128xbf16>
    %278 = vector.shape_cast %277 : vector<1x128x128xbf16> to vector<128x128xbf16>
    %cst_140 = arith.constant dense<0.000000e+00> : vector<32x128xf32>
    %279 = tpu.matmul %276, %278, %cst_140 {dimension_numbers = #tpu.dot_dimension_numbers<[1], [0], [0], [1], [0, 0, 1, 1], [], []>} : vector<32x128xbf16>, vector<128x128xbf16>, vector<32x128xf32> -> vector<32x128xf32>
    %280 = arith.truncf %261 : vector<32x128xf32> to vector<32x128xbf16>
    %c1_141 = arith.constant 1 : index
    %c0_142 = arith.constant 0 : index
    %c0_143 = arith.constant 0 : index
    %281 = vector.load %arg8[%c1_141, %c0_142, %c0_143] : memref<3x128x128xbf16, #tpu.memory_space<vmem>>, vector<1x128x128xbf16>
    %282 = vector.shape_cast %281 : vector<1x128x128xbf16> to vector<128x128xbf16>
    %cst_144 = arith.constant dense<0.000000e+00> : vector<32x128xf32>
    %283 = tpu.matmul %280, %282, %cst_144 {dimension_numbers = #tpu.dot_dimension_numbers<[1], [0], [0], [1], [0, 0, 1, 1], [], []>} : vector<32x128xbf16>, vector<128x128xbf16>, vector<32x128xf32> -> vector<32x128xf32>
    %284 = arith.addf %279, %283 : vector<32x128xf32>
    %285 = arith.truncf %275 : vector<32x128xf32> to vector<32x128xbf16>
    %c2_145 = arith.constant 2 : index
    %c0_146 = arith.constant 0 : index
    %c0_147 = arith.constant 0 : index
    %286 = vector.load %arg8[%c2_145, %c0_146, %c0_147] : memref<3x128x128xbf16, #tpu.memory_space<vmem>>, vector<1x128x128xbf16>
    %287 = vector.shape_cast %286 : vector<1x128x128xbf16> to vector<128x128xbf16>
    %cst_148 = arith.constant dense<0.000000e+00> : vector<32x128xf32>
    %288 = tpu.matmul %285, %287, %cst_148 {dimension_numbers = #tpu.dot_dimension_numbers<[1], [0], [0], [1], [0, 0, 1, 1], [], []>} : vector<32x128xbf16>, vector<128x128xbf16>, vector<32x128xf32> -> vector<32x128xf32>
    %289 = arith.addf %284, %288 : vector<32x128xf32>
    %c0_149 = arith.constant 0 : index
    %c0_150 = arith.constant 0 : index
    %290 = vector.load %arg9[%c0_149, %c0_150] : memref<3x128xf32, #tpu.memory_space<vmem>>, vector<3x128xf32>
    %291 = vector.extract_strided_slice %290 {offsets = [0, 0], sizes = [1, 128], strides = [1, 1]} : vector<3x128xf32> to vector<1x128xf32>
    %292 = vector.broadcast %291 : vector<1x128xf32> to vector<32x128xf32>
    %293 = arith.addf %289, %292 : vector<32x128xf32>
    %cst_151 = arith.constant dense<0.000000e+00> : vector<128xf32>
    %294 = vector.multi_reduction <add>, %293, %cst_151 [0] : vector<32x128xf32> to vector<128xf32>
    %295 = vector.shape_cast %294 : vector<128xf32> to vector<1x128xf32>
    %c8_i32_152 = arith.constant 8 : i32
    %296 = tpu.dynamic_rotate %295 by %c8_i32_152 dim 1 : vector<1x128xf32>, i32 -> vector<1x128xf32>
    %297 = arith.addf %295, %296 : vector<1x128xf32>
    %c16_i32_153 = arith.constant 16 : i32
    %298 = tpu.dynamic_rotate %297 by %c16_i32_153 dim 1 : vector<1x128xf32>, i32 -> vector<1x128xf32>
    %299 = arith.addf %297, %298 : vector<1x128xf32>
    %c32_i32_154 = arith.constant 32 : i32
    %300 = tpu.dynamic_rotate %299 by %c32_i32_154 dim 1 : vector<1x128xf32>, i32 -> vector<1x128xf32>
    %301 = arith.addf %299, %300 : vector<1x128xf32>
    %c64_i32_155 = arith.constant 64 : i32
    %302 = tpu.dynamic_rotate %301 by %c64_i32_155 dim 1 : vector<1x128xf32>, i32 -> vector<1x128xf32>
    %303 = arith.addf %301, %302 : vector<1x128xf32>
    %cst_156 = arith.constant 5.120000e+02 : f32
    %304 = vector.broadcast %cst_156 : f32 to vector<1x128xf32>
    %305 = arith.divf %303, %304 : vector<1x128xf32>
    %306 = arith.mulf %293, %293 : vector<32x128xf32>
    %cst_157 = arith.constant dense<0.000000e+00> : vector<128xf32>
    %307 = vector.multi_reduction <add>, %306, %cst_157 [0] : vector<32x128xf32> to vector<128xf32>
    %308 = vector.shape_cast %307 : vector<128xf32> to vector<1x128xf32>
    %c8_i32_158 = arith.constant 8 : i32
    %309 = tpu.dynamic_rotate %308 by %c8_i32_158 dim 1 : vector<1x128xf32>, i32 -> vector<1x128xf32>
    %310 = arith.addf %308, %309 : vector<1x128xf32>
    %c16_i32_159 = arith.constant 16 : i32
    %311 = tpu.dynamic_rotate %310 by %c16_i32_159 dim 1 : vector<1x128xf32>, i32 -> vector<1x128xf32>
    %312 = arith.addf %310, %311 : vector<1x128xf32>
    %c32_i32_160 = arith.constant 32 : i32
    %313 = tpu.dynamic_rotate %312 by %c32_i32_160 dim 1 : vector<1x128xf32>, i32 -> vector<1x128xf32>
    %314 = arith.addf %312, %313 : vector<1x128xf32>
    %c64_i32_161 = arith.constant 64 : i32
    %315 = tpu.dynamic_rotate %314 by %c64_i32_161 dim 1 : vector<1x128xf32>, i32 -> vector<1x128xf32>
    %316 = arith.addf %314, %315 : vector<1x128xf32>
    %cst_162 = arith.constant 5.120000e+02 : f32
    %317 = vector.broadcast %cst_162 : f32 to vector<1x128xf32>
    %318 = arith.divf %316, %317 : vector<1x128xf32>
    %319 = arith.mulf %305, %305 : vector<1x128xf32>
    %320 = arith.subf %318, %319 : vector<1x128xf32>
    %cst_163 = arith.constant 0.000000e+00 : f32
    %321 = vector.broadcast %cst_163 : f32 to vector<1x128xf32>
    %322 = arith.maximumf %320, %321 : vector<1x128xf32>
    %323 = vector.broadcast %305 : vector<1x128xf32> to vector<32x128xf32>
    %324 = arith.subf %293, %323 : vector<32x128xf32>
    %cst_164 = arith.constant 9.99999974E-6 : f32
    %325 = vector.broadcast %cst_164 : f32 to vector<1x128xf32>
    %326 = arith.addf %322, %325 : vector<1x128xf32>
    %327 = math.rsqrt %326 : vector<1x128xf32>
    %328 = vector.extract_strided_slice %290 {offsets = [1, 0], sizes = [1, 128], strides = [1, 1]} : vector<3x128xf32> to vector<1x128xf32>
    %329 = arith.mulf %327, %328 : vector<1x128xf32>
    %330 = vector.broadcast %329 : vector<1x128xf32> to vector<32x128xf32>
    %331 = arith.mulf %324, %330 : vector<32x128xf32>
    %332 = vector.extract_strided_slice %290 {offsets = [2, 0], sizes = [1, 128], strides = [1, 1]} : vector<3x128xf32> to vector<1x128xf32>
    %333 = vector.broadcast %332 : vector<1x128xf32> to vector<32x128xf32>
    %334 = arith.addf %331, %333 : vector<32x128xf32>
    %cst_165 = arith.constant 0.000000e+00 : f32
    %335 = vector.broadcast %cst_165 : f32 to vector<32x128xf32>
    %336 = arith.maximumf %334, %335 : vector<32x128xf32>
    %c0_166 = arith.constant 0 : index
    %c0_167 = arith.constant 0 : index
    %337 = vector.load %arg17[%c0_166, %c0_167] : memref<64x32xf32, #tpu.memory_space<vmem>>, vector<64x32xf32>
    %cst_168 = arith.constant dense<0.000000e+00> : vector<64x128xf32>
    %338 = tpu.matmul %337, %336, %cst_168 {dimension_numbers = #tpu.dot_dimension_numbers<[1], [0], [0], [1], [0, 0, 1, 1], [], []>} : vector<64x32xf32>, vector<32x128xf32>, vector<64x128xf32> -> vector<64x128xf32>
    %c0_169 = arith.constant 0 : index
    %c0_170 = arith.constant 0 : index
    %339 = vector.load %arg18[%c0_169, %c0_170] : memref<128x256xf32, #tpu.memory_space<vmem>>, vector<128x256xf32>
    %cst_171 = arith.constant dense<0.000000e+00> : vector<64x256xf32>
    %340 = tpu.matmul %338, %339, %cst_171 {dimension_numbers = #tpu.dot_dimension_numbers<[1], [0], [0], [1], [0, 0, 1, 1], [], []>} : vector<64x128xf32>, vector<128x256xf32>, vector<64x256xf32> -> vector<64x256xf32>
    %c8_172 = arith.constant 8 : index
    %c0_173 = arith.constant 0 : index
    %341 = vector.load %arg22[%c8_172, %c0_173] : memref<80x256xf32, #tpu.memory_space<vmem>>, vector<64x256xf32>
    tpu.vector_store %arg22[%c8_172, %c0_173], %340 {strides = array<i32>} : memref<80x256xf32, #tpu.memory_space<vmem>>, vector<64x256xf32>,
    %342 = tpu.iota {dimensions = array<i32: 0>} : vector<64x1xi32>
    %c31_i32 = arith.constant 31 : i32
    %343 = vector.broadcast %c31_i32 : i32 to vector<64x1xi32>
    %344 = arith.andi %342, %343 : vector<64x1xi32>
    %c8_174 = arith.constant 8 : index
    %c0_175 = arith.constant 0 : index
    %345 = vector.load %arg22[%c8_174, %c0_175] : memref<80x256xf32, #tpu.memory_space<vmem>>, vector<64x256xf32>
    %c1_i32_176 = arith.constant 1 : i32
    %346 = vector.broadcast %c1_i32_176 : i32 to vector<64x1xi32>
    %347 = arith.cmpi sge, %344, %346 : vector<64x1xi32>
    %c7_177 = arith.constant 7 : index
    %c0_178 = arith.constant 0 : index
    %348 = vector.load %arg22[%c7_177, %c0_178] : memref<80x256xf32, #tpu.memory_space<vmem>>, vector<64x256xf32>
    %cst_179 = arith.constant 0.000000e+00 : f32
    %349 = vector.shape_cast %347 : vector<64x1xi1> to vector<64x1xi1>
    %350 = vector.broadcast %349 : vector<64x1xi1> to vector<64x256xi1>
    %351 = vector.broadcast %cst_179 : f32 to vector<64x256xf32>
    %352 = arith.select %350, %348, %351 : vector<64x256xi1>, vector<64x256xf32>
    %c31_i32_180 = arith.constant 31 : i32
    %353 = vector.broadcast %c31_i32_180 : i32 to vector<64x1xi32>
    %354 = arith.cmpi slt, %344, %353 : vector<64x1xi32>
    %c9_181 = arith.constant 9 : index
    %c0_182 = arith.constant 0 : index
    %355 = vector.load %arg22[%c9_181, %c0_182] : memref<80x256xf32, #tpu.memory_space<vmem>>, vector<64x256xf32>
    %cst_183 = arith.constant 0.000000e+00 : f32
    %356 = vector.shape_cast %354 : vector<64x1xi1> to vector<64x1xi1>
    %357 = vector.broadcast %356 : vector<64x1xi1> to vector<64x256xi1>
    %358 = vector.broadcast %cst_183 : f32 to vector<64x256xf32>
    %359 = arith.select %357, %355, %358 : vector<64x256xi1>, vector<64x256xf32>
    %360 = arith.truncf %352 : vector<64x256xf32> to vector<64x256xbf16>
    %c0_184 = arith.constant 0 : index
    %c0_185 = arith.constant 0 : index
    %c0_186 = arith.constant 0 : index
    %361 = vector.load %arg10[%c0_184, %c0_185, %c0_186] : memref<3x256x128xbf16, #tpu.memory_space<vmem>>, vector<1x256x128xbf16>
    %362 = vector.shape_cast %361 : vector<1x256x128xbf16> to vector<256x128xbf16>
    %cst_187 = arith.constant dense<0.000000e+00> : vector<64x128xf32>
    %363 = tpu.matmul %360, %362, %cst_187 {dimension_numbers = #tpu.dot_dimension_numbers<[1], [0], [0], [1], [0, 0, 1, 1], [], []>} : vector<64x256xbf16>, vector<256x128xbf16>, vector<64x128xf32> -> vector<64x128xf32>
    %364 = arith.truncf %345 : vector<64x256xf32> to vector<64x256xbf16>
    %c1_188 = arith.constant 1 : index
    %c0_189 = arith.constant 0 : index
    %c0_190 = arith.constant 0 : index
    %365 = vector.load %arg10[%c1_188, %c0_189, %c0_190] : memref<3x256x128xbf16, #tpu.memory_space<vmem>>, vector<1x256x128xbf16>
    %366 = vector.shape_cast %365 : vector<1x256x128xbf16> to vector<256x128xbf16>
    %cst_191 = arith.constant dense<0.000000e+00> : vector<64x128xf32>
    %367 = tpu.matmul %364, %366, %cst_191 {dimension_numbers = #tpu.dot_dimension_numbers<[1], [0], [0], [1], [0, 0, 1, 1], [], []>} : vector<64x256xbf16>, vector<256x128xbf16>, vector<64x128xf32> -> vector<64x128xf32>
    %368 = arith.addf %363, %367 : vector<64x128xf32>
    %369 = arith.truncf %359 : vector<64x256xf32> to vector<64x256xbf16>
    %c2_192 = arith.constant 2 : index
    %c0_193 = arith.constant 0 : index
    %c0_194 = arith.constant 0 : index
    %370 = vector.load %arg10[%c2_192, %c0_193, %c0_194] : memref<3x256x128xbf16, #tpu.memory_space<vmem>>, vector<1x256x128xbf16>
    %371 = vector.shape_cast %370 : vector<1x256x128xbf16> to vector<256x128xbf16>
    %cst_195 = arith.constant dense<0.000000e+00> : vector<64x128xf32>
    %372 = tpu.matmul %369, %371, %cst_195 {dimension_numbers = #tpu.dot_dimension_numbers<[1], [0], [0], [1], [0, 0, 1, 1], [], []>} : vector<64x256xbf16>, vector<256x128xbf16>, vector<64x128xf32> -> vector<64x128xf32>
    %373 = arith.addf %368, %372 : vector<64x128xf32>
    %c0_196 = arith.constant 0 : index
    %c0_197 = arith.constant 0 : index
    %374 = vector.load %arg11[%c0_196, %c0_197] : memref<3x128xf32, #tpu.memory_space<vmem>>, vector<3x128xf32>
    %375 = vector.extract_strided_slice %374 {offsets = [0, 0], sizes = [1, 128], strides = [1, 1]} : vector<3x128xf32> to vector<1x128xf32>
    %376 = vector.broadcast %375 : vector<1x128xf32> to vector<64x128xf32>
    %377 = arith.addf %373, %376 : vector<64x128xf32>
    %cst_198 = arith.constant dense<0.000000e+00> : vector<128xf32>
    %378 = vector.multi_reduction <add>, %377, %cst_198 [0] : vector<64x128xf32> to vector<128xf32>
    %379 = vector.shape_cast %378 : vector<128xf32> to vector<1x128xf32>
    %c4_i32 = arith.constant 4 : i32
    %380 = tpu.dynamic_rotate %379 by %c4_i32 dim 1 : vector<1x128xf32>, i32 -> vector<1x128xf32>
    %381 = arith.addf %379, %380 : vector<1x128xf32>
    %c8_i32_199 = arith.constant 8 : i32
    %382 = tpu.dynamic_rotate %381 by %c8_i32_199 dim 1 : vector<1x128xf32>, i32 -> vector<1x128xf32>
    %383 = arith.addf %381, %382 : vector<1x128xf32>
    %c16_i32_200 = arith.constant 16 : i32
    %384 = tpu.dynamic_rotate %383 by %c16_i32_200 dim 1 : vector<1x128xf32>, i32 -> vector<1x128xf32>
    %385 = arith.addf %383, %384 : vector<1x128xf32>
    %c32_i32_201 = arith.constant 32 : i32
    %386 = tpu.dynamic_rotate %385 by %c32_i32_201 dim 1 : vector<1x128xf32>, i32 -> vector<1x128xf32>
    %387 = arith.addf %385, %386 : vector<1x128xf32>
    %c64_i32_202 = arith.constant 64 : i32
    %388 = tpu.dynamic_rotate %387 by %c64_i32_202 dim 1 : vector<1x128xf32>, i32 -> vector<1x128xf32>
    %389 = arith.addf %387, %388 : vector<1x128xf32>
    %cst_203 = arith.constant 2.048000e+03 : f32
    %390 = vector.broadcast %cst_203 : f32 to vector<1x128xf32>
    %391 = arith.divf %389, %390 : vector<1x128xf32>
    %392 = arith.mulf %377, %377 : vector<64x128xf32>
    %cst_204 = arith.constant dense<0.000000e+00> : vector<128xf32>
    %393 = vector.multi_reduction <add>, %392, %cst_204 [0] : vector<64x128xf32> to vector<128xf32>
    %394 = vector.shape_cast %393 : vector<128xf32> to vector<1x128xf32>
    %c4_i32_205 = arith.constant 4 : i32
    %395 = tpu.dynamic_rotate %394 by %c4_i32_205 dim 1 : vector<1x128xf32>, i32 -> vector<1x128xf32>
    %396 = arith.addf %394, %395 : vector<1x128xf32>
    %c8_i32_206 = arith.constant 8 : i32
    %397 = tpu.dynamic_rotate %396 by %c8_i32_206 dim 1 : vector<1x128xf32>, i32 -> vector<1x128xf32>
    %398 = arith.addf %396, %397 : vector<1x128xf32>
    %c16_i32_207 = arith.constant 16 : i32
    %399 = tpu.dynamic_rotate %398 by %c16_i32_207 dim 1 : vector<1x128xf32>, i32 -> vector<1x128xf32>
    %400 = arith.addf %398, %399 : vector<1x128xf32>
    %c32_i32_208 = arith.constant 32 : i32
    %401 = tpu.dynamic_rotate %400 by %c32_i32_208 dim 1 : vector<1x128xf32>, i32 -> vector<1x128xf32>
    %402 = arith.addf %400, %401 : vector<1x128xf32>
    %c64_i32_209 = arith.constant 64 : i32
    %403 = tpu.dynamic_rotate %402 by %c64_i32_209 dim 1 : vector<1x128xf32>, i32 -> vector<1x128xf32>
    %404 = arith.addf %402, %403 : vector<1x128xf32>
    %cst_210 = arith.constant 2.048000e+03 : f32
    %405 = vector.broadcast %cst_210 : f32 to vector<1x128xf32>
    %406 = arith.divf %404, %405 : vector<1x128xf32>
    %407 = arith.mulf %391, %391 : vector<1x128xf32>
    %408 = arith.subf %406, %407 : vector<1x128xf32>
    %cst_211 = arith.constant 0.000000e+00 : f32
    %409 = vector.broadcast %cst_211 : f32 to vector<1x128xf32>
    %410 = arith.maximumf %408, %409 : vector<1x128xf32>
    %411 = vector.broadcast %391 : vector<1x128xf32> to vector<64x128xf32>
    %412 = arith.subf %377, %411 : vector<64x128xf32>
    %cst_212 = arith.constant 9.99999974E-6 : f32
    %413 = vector.broadcast %cst_212 : f32 to vector<1x128xf32>
    %414 = arith.addf %410, %413 : vector<1x128xf32>
    %415 = math.rsqrt %414 : vector<1x128xf32>
    %416 = vector.extract_strided_slice %374 {offsets = [1, 0], sizes = [1, 128], strides = [1, 1]} : vector<3x128xf32> to vector<1x128xf32>
    %417 = arith.mulf %415, %416 : vector<1x128xf32>
    %418 = vector.broadcast %417 : vector<1x128xf32> to vector<64x128xf32>
    %419 = arith.mulf %412, %418 : vector<64x128xf32>
    %420 = vector.extract_strided_slice %374 {offsets = [2, 0], sizes = [1, 128], strides = [1, 1]} : vector<3x128xf32> to vector<1x128xf32>
    %421 = vector.broadcast %420 : vector<1x128xf32> to vector<64x128xf32>
    %422 = arith.addf %419, %421 : vector<64x128xf32>
    %cst_213 = arith.constant 0.000000e+00 : f32
    %423 = vector.broadcast %cst_213 : f32 to vector<64x128xf32>
    %424 = arith.maximumf %422, %423 : vector<64x128xf32>
    %c8_214 = arith.constant 8 : index
    %c0_215 = arith.constant 0 : index
    %425 = vector.load %arg22[%c8_214, %c0_215] : memref<80x256xf32, #tpu.memory_space<vmem>>, vector<64x128xf32>
    tpu.vector_store %arg22[%c8_214, %c0_215], %424 {strides = array<i32>} : memref<80x256xf32, #tpu.memory_space<vmem>>, vector<64x128xf32>,
    %426 = tpu.iota {dimensions = array<i32: 0>} : vector<64x1xi32>
    %c31_i32_216 = arith.constant 31 : i32
    %427 = vector.broadcast %c31_i32_216 : i32 to vector<64x1xi32>
    %428 = arith.andi %426, %427 : vector<64x1xi32>
    %c8_217 = arith.constant 8 : index
    %c0_218 = arith.constant 0 : index
    %429 = vector.load %arg22[%c8_217, %c0_218] : memref<80x256xf32, #tpu.memory_space<vmem>>, vector<64x128xf32>
    %c1_i32_219 = arith.constant 1 : i32
    %430 = vector.broadcast %c1_i32_219 : i32 to vector<64x1xi32>
    %431 = arith.cmpi sge, %428, %430 : vector<64x1xi32>
    %c7_220 = arith.constant 7 : index
    %c0_221 = arith.constant 0 : index
    %432 = vector.load %arg22[%c7_220, %c0_221] : memref<80x256xf32, #tpu.memory_space<vmem>>, vector<64x128xf32>
    %cst_222 = arith.constant 0.000000e+00 : f32
    %433 = vector.shape_cast %431 : vector<64x1xi1> to vector<64x1xi1>
    %434 = vector.broadcast %433 : vector<64x1xi1> to vector<64x128xi1>
    %435 = vector.broadcast %cst_222 : f32 to vector<64x128xf32>
    %436 = arith.select %434, %432, %435 : vector<64x128xi1>, vector<64x128xf32>
    %c31_i32_223 = arith.constant 31 : i32
    %437 = vector.broadcast %c31_i32_223 : i32 to vector<64x1xi32>
    %438 = arith.cmpi slt, %428, %437 : vector<64x1xi32>
    %c9_224 = arith.constant 9 : index
    %c0_225 = arith.constant 0 : index
    %439 = vector.load %arg22[%c9_224, %c0_225] : memref<80x256xf32, #tpu.memory_space<vmem>>, vector<64x128xf32>
    %cst_226 = arith.constant 0.000000e+00 : f32
    %440 = vector.shape_cast %438 : vector<64x1xi1> to vector<64x1xi1>
    %441 = vector.broadcast %440 : vector<64x1xi1> to vector<64x128xi1>
    %442 = vector.broadcast %cst_226 : f32 to vector<64x128xf32>
    %443 = arith.select %441, %439, %442 : vector<64x128xi1>, vector<64x128xf32>
    %444 = arith.truncf %436 : vector<64x128xf32> to vector<64x128xbf16>
    %c0_227 = arith.constant 0 : index
    %c0_228 = arith.constant 0 : index
    %c0_229 = arith.constant 0 : index
    %445 = vector.load %arg12[%c0_227, %c0_228, %c0_229] : memref<3x128x128xbf16, #tpu.memory_space<vmem>>, vector<1x128x128xbf16>
    %446 = vector.shape_cast %445 : vector<1x128x128xbf16> to vector<128x128xbf16>
    %cst_230 = arith.constant dense<0.000000e+00> : vector<64x128xf32>
    %447 = tpu.matmul %444, %446, %cst_230 {dimension_numbers = #tpu.dot_dimension_numbers<[1], [0], [0], [1], [0, 0, 1, 1], [], []>} : vector<64x128xbf16>, vector<128x128xbf16>, vector<64x128xf32> -> vector<64x128xf32>
    %448 = arith.truncf %429 : vector<64x128xf32> to vector<64x128xbf16>
    %c1_231 = arith.constant 1 : index
    %c0_232 = arith.constant 0 : index
    %c0_233 = arith.constant 0 : index
    %449 = vector.load %arg12[%c1_231, %c0_232, %c0_233] : memref<3x128x128xbf16, #tpu.memory_space<vmem>>, vector<1x128x128xbf16>
    %450 = vector.shape_cast %449 : vector<1x128x128xbf16> to vector<128x128xbf16>
    %cst_234 = arith.constant dense<0.000000e+00> : vector<64x128xf32>
    %451 = tpu.matmul %448, %450, %cst_234 {dimension_numbers = #tpu.dot_dimension_numbers<[1], [0], [0], [1], [0, 0, 1, 1], [], []>} : vector<64x128xbf16>, vector<128x128xbf16>, vector<64x128xf32> -> vector<64x128xf32>
    %452 = arith.addf %447, %451 : vector<64x128xf32>
    %453 = arith.truncf %443 : vector<64x128xf32> to vector<64x128xbf16>
    %c2_235 = arith.constant 2 : index
    %c0_236 = arith.constant 0 : index
    %c0_237 = arith.constant 0 : index
    %454 = vector.load %arg12[%c2_235, %c0_236, %c0_237] : memref<3x128x128xbf16, #tpu.memory_space<vmem>>, vector<1x128x128xbf16>
    %455 = vector.shape_cast %454 : vector<1x128x128xbf16> to vector<128x128xbf16>
    %cst_238 = arith.constant dense<0.000000e+00> : vector<64x128xf32>
    %456 = tpu.matmul %453, %455, %cst_238 {dimension_numbers = #tpu.dot_dimension_numbers<[1], [0], [0], [1], [0, 0, 1, 1], [], []>} : vector<64x128xbf16>, vector<128x128xbf16>, vector<64x128xf32> -> vector<64x128xf32>
    %457 = arith.addf %452, %456 : vector<64x128xf32>
    %c0_239 = arith.constant 0 : index
    %c0_240 = arith.constant 0 : index
    %458 = vector.load %arg13[%c0_239, %c0_240] : memref<3x128xf32, #tpu.memory_space<vmem>>, vector<3x128xf32>
    %459 = vector.extract_strided_slice %458 {offsets = [0, 0], sizes = [1, 128], strides = [1, 1]} : vector<3x128xf32> to vector<1x128xf32>
    %460 = vector.broadcast %459 : vector<1x128xf32> to vector<64x128xf32>
    %461 = arith.addf %457, %460 : vector<64x128xf32>
    %c0_241 = arith.constant 0 : index
    %c0_242 = arith.constant 0 : index
    %462 = vector.load %arg19[%c0_241, %c0_242] : memref<48x64xf32, #tpu.memory_space<vmem>>, vector<48x64xf32>
    %cst_243 = arith.constant dense<0.000000e+00> : vector<48x128xf32>
    %463 = tpu.matmul %462, %461, %cst_243 {dimension_numbers = #tpu.dot_dimension_numbers<[1], [0], [0], [1], [0, 0, 1, 1], [], []>} : vector<48x64xf32>, vector<64x128xf32>, vector<48x128xf32> -> vector<48x128xf32>
    %c0_244 = arith.constant 0 : index
    %c0_245 = arith.constant 0 : index
    %464 = vector.load %arg20[%c0_244, %c0_245] : memref<128x96xf32, #tpu.memory_space<vmem>>, vector<128x96xf32>
    %cst_246 = arith.constant dense<0.000000e+00> : vector<48x96xf32>
    %465 = tpu.matmul %463, %464, %cst_246 {dimension_numbers = #tpu.dot_dimension_numbers<[1], [0], [0], [1], [0, 0, 1, 1], [], []>} : vector<48x128xf32>, vector<128x96xf32>, vector<48x96xf32> -> vector<48x96xf32>
    %466 = arith.negf %465 : vector<48x96xf32>
    %467 = math.exp %466 : vector<48x96xf32>
    %cst_247 = arith.constant 1.000000e+00 : f32
    %468 = vector.broadcast %cst_247 : f32 to vector<48x96xf32>
    %469 = arith.addf %468, %467 : vector<48x96xf32>
    %470 = arith.divf %468, %469 : vector<48x96xf32>
    %c0_248 = arith.constant 0 : index
    %c0_249 = arith.constant 0 : index
    %471 = vector.load %arg21[%c0_248, %c0_249] : memref<48x96xf32, #tpu.memory_space<vmem>>, vector<48x96xf32>
    tpu.vector_store %arg21[%c0_248, %c0_249], %470 {strides = array<i32>} : memref<48x96xf32, #tpu.memory_space<vmem>>, vector<48x96xf32>,
    return
  }
}

</mosaic_0001>

<bundles_post_ra>
// kernel: tile.163
= control target key start
LH: loop header
LB: loop body
LE: loop exit
PB: predicated region body
PF: predicated region fallthrough
CT: control target
= control target key end

     0   :  { %s40_s0 = inlined_call_operand.vmem [shape: f32[4], index: 0, kind: input, shape index: {}]   ;;  %s41_s1 = inlined_call_operand.vmem [shape: f32[32,4], index: 1, kind: output, shape index: {}]  }
   0x1   :  { %v4_v0 = vld [vmem:[%s40_s0] ss:$0 sm:$0xff] }
   0x2   :  { %5 = vst [vmem:[%s41_s1] sm:$0xff] %v4_v0  ;;  %12 = vst [vmem:[%s41_s1 + $0x8] sm:$0xff] %v4_v0 }
   0x3   :  { %13 = vst [vmem:[%s41_s1 + $0x10] sm:$0xff] %v4_v0  ;;  %14 = vst [vmem:[%s41_s1 + $0x18] sm:$0xff] %v4_v0 }

// kernel: tile.172
= control target key start
LH: loop header
LB: loop body
LE: loop exit
PB: predicated region body
PF: predicated region fallthrough
CT: control target
= control target key end

     0   :  { %s261_s10 = smov 124   ;;  %s262_s11 = smov 116   ;;  %vm3_vm0 = vcmask 31744   ;;  %vm9_vm1 = vcmask 1048544   ;;  %vm15_vm2 = vcmask 1015744   ;;  %vm21_vm3 = vcmask 982944   ;;  %s401_s0 = inlined_call_operand.vmem [shape: f32[32,4], index: 0, kind: input, shape index: {}]   ;;  %s402_s1 = inlined_call_operand.vmem [shape: f32[1,128], index: 1, kind: output, shape index: {}]  }
   0x1   :  { %v199_v0 = vld [vmem:[%s401_s0 + $0x1f] sm:$0x1]   ;;  %v201_v1 = vld [vmem:[%s401_s0 + $0x1d] sm:$0x1]   ;;  %v200_v2 = vld [vmem:[%s401_s0 + $0x1e] sm:$0x1]  }
   0x2   :  { %7 = vrot.lane.b32.xlu0 %v199_v0, %s261_s10  ;;  %19 = vrot.lane.b32.xlu1 %v201_v1, %s262_s11  ;;  %v202_v3 = vld [vmem:[%s401_s0 + $0x1c] sm:$0x1]   ;;  %s263_s16 = smov 120   ;;  %s264_s17 = smov 112   ;;  %v203_v4 = vld [vmem:[%s401_s0 + $0x1b] sm:$0x1]  }
   0x3   :  { %v204_v5 = vld [vmem:[%s401_s0 + $0x1a] sm:$0x1]   ;;  %s265_s22 = smov 108   ;;  %s266_s23 = smov 104   ;;  %v205_v6 = vld [vmem:[%s401_s0 + $0x19] sm:$0x1]  }
   0x4   :  { %v206_v7 = vld [vmem:[%s401_s0 + $0x18] sm:$0x1]   ;;  %s267_s28 = smov 100   ;;  %s268_s29 = smov 96   ;;  %v207_v8 = vld [vmem:[%s401_s0 + $0x17] sm:$0x1]  }
   0x5   :  { %v208_v9 = vld [vmem:[%s401_s0 + $0x16] sm:$0x1]   ;;  %v2_v10 = vld [vmem:[%s401_s0] sm:$0x1]   ;;  %s269_s7 = smov 92   ;;  %s270_s8 = smov 88  }
   0x6   :  { %13 = vrot.lane.b32.xlu0 %v200_v2, %s263_s16  ;;  %25 = vrot.lane.b32.xlu1 %v202_v3, %s264_s17  ;;  %4 = vst.msk [vmem:[#allocation0] sm:$0x1] %vm3_vm0, %v2_v10   ;;  %v209_v11 = vld [vmem:[%s401_s0 + $0x15] sm:$0x1]   ;;  %v210_v12 = vld [vmem:[%s401_s0 + $0x14] sm:$0x1]  }
   0x7   :  { %s271_s13 = smov 84   ;;  %s272_s14 = smov 80   ;;  %v211_v13 = vld [vmem:[%s401_s0 + $0x13] sm:$0x1]   ;;  %v212_v14 = vld [vmem:[%s401_s0 + $0x12] sm:$0x1]  }
   0x8   :  { %s273_s19 = smov 76   ;;  %s274_s20 = smov 72   ;;  %v213_v15 = vld [vmem:[%s401_s0 + $0x11] sm:$0x1]   ;;  %v214_v16 = vld [vmem:[%s401_s0 + $0x10] sm:$0x1]  }
   0x9   :  { %s275_s25 = smov 68   ;;  %s276_s26 = smov 64   ;;  %v215_v17 = vld [vmem:[%s401_s0 + $0xf] sm:$0x1]   ;;  %v216_v18 = vld [vmem:[%s401_s0 + $0xe] sm:$0x1]  }
   0xa   :  { %31 = vrot.lane.b32.xlu0 %v203_v4, %s265_s22  ;;  %37 = vrot.lane.b32.xlu1 %v204_v5, %s266_s23  ;;  %s277_s2 = smov 60   ;;  %s278_s3 = smov 56   ;;  %v217_v19 = vld [vmem:[%s401_s0 + $0xd] sm:$0x1]   ;;  %v218_v20 = vld [vmem:[%s401_s0 + $0xc] sm:$0x1]  }
   0xb   :  { %s280_s9 = smov 48   ;;  %v219_v21 = vld [vmem:[%s401_s0 + $0xb] sm:$0x1]   ;;  %v220_v22 = vld [vmem:[%s401_s0 + $0xa] sm:$0x1]   ;;  %s282_s15 = smov 40  }
   0xc   :  { %v221_v23 = vld [vmem:[%s401_s0 + $0x9] sm:$0x1]   ;;  %v222_v24 = vld [vmem:[%s401_s0 + $0x8] sm:$0x1]   ;;  %s284_s21 = smov 32   ;;  %s286_s27 = smov 24  }
   0xd   :  { %v223_v25 = vld [vmem:[%s401_s0 + $0x7] sm:$0x1]   ;;  %v224_v26 = vld [vmem:[%s401_s0 + $0x6] sm:$0x1]   ;;  %v225_v27 = vld [vmem:[%s401_s0 + $0x5] sm:$0x1]  }
   0xe   :  { %43 = vrot.lane.b32.xlu0 %v205_v6, %s267_s28  ;;  %49 = vrot.lane.b32.xlu1 %v206_v7, %s268_s29  ;;  %v226_v28 = vld [vmem:[%s401_s0 + $0x4] sm:$0x1]   ;;  %s288_s4 = smov 16   ;;  %v227_v29 = vld [vmem:[%s401_s0 + $0x3] sm:$0x1]   ;;  %s290_s10 = smov 8  }
   0xf   :  { %v228_v30 = vld [vmem:[%s401_s0 + $0x2] sm:$0x1]   ;;  %v229_v31 = vld [vmem:[%s401_s0 + $0x1] sm:$0x1]   ;;  %s291_s0 = smov 4   ;;  %vm27_vm4 = vcmask 950144  }
  0x10   :  { %vm33_vm5 = vcmask 917344   ;;  %vm39_vm6 = vcmask 884544   ;;  %vm45_vm7 = vcmask 851744   ;;  %vm51_vm8 = vcmask 818944  }
  0x11   :  { %vm57_vm9 = vcmask 786144   ;;  %vm63_vm10 = vcmask 753344   ;;  %vm69_vm11 = vcmask 720544   ;;  %vm75_vm12 = vcmask 687744  }
  0x12   :  { %55 = vrot.lane.b32.xlu0 %v207_v8, %s269_s7  ;;  %61 = vrot.lane.b32.xlu1 %v208_v9, %s270_s8  ;;  %s279_s8 = smov 52   ;;  %vm81_vm13 = vcmask 654944   ;;  %vm87_vm14 = vcmask 622144   ;;  %vm93_vm15 = vcmask 589344   ;;  %vm99_vm0 = vcmask 556544  }
  0x16   :  { %67 = vrot.lane.b32.xlu0 %v209_v11, %s271_s13  ;;  %73 = vrot.lane.b32.xlu1 %v210_v12, %s272_s14  ;;  %s281_s14 = smov 44  }
  0x1a   :  { %79 = vrot.lane.b32.xlu0 %v211_v13, %s273_s19  ;;  %85 = vrot.lane.b32.xlu1 %v212_v14, %s274_s20  ;;  %s283_s20 = smov 36  }
  0x1e   :  { %91 = vrot.lane.b32.xlu0 %v213_v15, %s275_s25  ;;  %97 = vrot.lane.b32.xlu1 %v214_v16, %s276_s26  ;;  %s285_s26 = smov 28  }
  0x22   :  { %103 = vrot.lane.b32.xlu0 %v215_v17, %s277_s2  ;;  %109 = vrot.lane.b32.xlu1 %v216_v18, %s278_s3  ;;  %s287_s3 = smov 20  }
  0x26   :  { %115 = vrot.lane.b32.xlu0 %v217_v19, %s279_s8  ;;  %121 = vrot.lane.b32.xlu1 %v218_v20, %s280_s9  ;;  %s289_s9 = smov 12  }
  0x2a   :  { %127 = vrot.lane.b32.xlu0 %v219_v21, %s281_s14  ;;  %133 = vrot.lane.b32.xlu1 %v220_v22, %s282_s15 }
  0x2e   :  { %139 = vrot.lane.b32.xlu0 %v221_v23, %s283_s20  ;;  %145 = vrot.lane.b32.xlu1 %v222_v24, %s284_s21 }
  0x32   :  { %151 = vrot.lane.b32.xlu0 %v223_v25, %s285_s26  ;;  %157 = vrot.lane.b32.xlu1 %v224_v26, %s286_s27 }
  0x36   :  { %163 = vrot.lane.b32.xlu0 %v225_v27, %s287_s3  ;;  %169 = vrot.lane.b32.xlu1 %v226_v28, %s288_s4 }
  0x3a   :  { %175 = vrot.lane.b32.xlu0 %v227_v29, %s289_s9  ;;  %181 = vrot.lane.b32.xlu1 %v228_v30, %s290_s10 }
  0x3e   :  { %187 = vrot.lane.b32.xlu0 %v229_v31, %s291_s0 }
  0x74   :  { %v8_v32 = vpop.permute.xlu0 %7   ;;  %v20_v33 = vpop.permute.xlu1 %19  }
  0x75   :  { %10 = vst.msk [vmem:[#allocation0] sm:$0x1] %vm9_vm1, %v8_v32   ;;  %vm105_vm1 = vcmask 523744  }
  0x78   :  { %v14_v34 = vpop.permute.xlu0 %13   ;;  %v26_v35 = vpop.permute.xlu1 %25  }
  0x79   :  { %16 = vst.msk [vmem:[#allocation0] sm:$0x1] %vm15_vm2, %v14_v34   ;;  %vm111_vm2 = vcmask 490944  }
  0x7a   :  { %22 = vst.msk [vmem:[#allocation0] sm:$0x1] %vm21_vm3, %v20_v33   ;;  %vm117_vm3 = vcmask 458144  }
  0x7b   :  { %28 = vst.msk [vmem:[#allocation0] sm:$0x1] %vm27_vm4, %v26_v35   ;;  %vm123_vm4 = vcmask 425344  }
  0x7c   :  { %v32_v36 = vpop.permute.xlu0 %31   ;;  %v38_v37 = vpop.permute.xlu1 %37  }
  0x7d   :  { %34 = vst.msk [vmem:[#allocation0] sm:$0x1] %vm33_vm5, %v32_v36   ;;  %vm129_vm5 = vcmask 392544  }
  0x7e   :  { %40 = vst.msk [vmem:[#allocation0] sm:$0x1] %vm39_vm6, %v38_v37   ;;  %vm135_vm6 = vcmask 359744  }
  0x80   :  { %v44_v38 = vpop.permute.xlu0 %43   ;;  %v50_v39 = vpop.permute.xlu1 %49  }
  0x81   :  { %46 = vst.msk [vmem:[#allocation0] sm:$0x1] %vm45_vm7, %v44_v38   ;;  %vm141_vm7 = vcmask 326944  }
  0x82   :  { %52 = vst.msk [vmem:[#allocation0] sm:$0x1] %vm51_vm8, %v50_v39   ;;  %vm147_vm8 = vcmask 294144  }
  0x84   :  { %v56_v40 = vpop.permute.xlu0 %55   ;;  %v62_v41 = vpop.permute.xlu1 %61  }
  0x85   :  { %58 = vst.msk [vmem:[#allocation0] sm:$0x1] %vm57_vm9, %v56_v40   ;;  %vm153_vm9 = vcmask 261344  }
  0x86   :  { %64 = vst.msk [vmem:[#allocation0] sm:$0x1] %vm63_vm10, %v62_v41   ;;  %vm159_vm10 = vcmask 228544  }
  0x88   :  { %v68_v42 = vpop.permute.xlu0 %67   ;;  %v74_v43 = vpop.permute.xlu1 %73  }
  0x89   :  { %70 = vst.msk [vmem:[#allocation0] sm:$0x1] %vm69_vm11, %v68_v42   ;;  %vm165_vm11 = vcmask 195744  }
  0x8a   :  { %76 = vst.msk [vmem:[#allocation0] sm:$0x1] %vm75_vm12, %v74_v43   ;;  %vm171_vm12 = vcmask 162944  }
  0x8c   :  { %v80_v44 = vpop.permute.xlu0 %79   ;;  %v86_v45 = vpop.permute.xlu1 %85  }
  0x8d   :  { %82 = vst.msk [vmem:[#allocation0] sm:$0x1] %vm81_vm13, %v80_v44   ;;  %vm177_vm13 = vcmask 130144  }
  0x8e   :  { %88 = vst.msk [vmem:[#allocation0] sm:$0x1] %vm87_vm14, %v86_v45   ;;  %vm183_vm14 = vcmask 97344  }
  0x90   :  { %v92_v46 = vpop.permute.xlu0 %91   ;;  %v98_v47 = vpop.permute.xlu1 %97  }
  0x91   :  { %94 = vst.msk [vmem:[#allocation0] sm:$0x1] %vm93_vm15, %v92_v46   ;;  %vm189_vm15 = vcmask 64544  }
  0x92   :  { %100 = vst.msk [vmem:[#allocation0] sm:$0x1] %vm99_vm0, %v98_v47  }
  0x94   :  { %v104_v48 = vpop.permute.xlu0 %103   ;;  %v110_v49 = vpop.permute.xlu1 %109  }
  0x95   :  { %106 = vst.msk [vmem:[#allocation0] sm:$0x1] %vm105_vm1, %v104_v48  }
  0x96   :  { %112 = vst.msk [vmem:[#allocation0] sm:$0x1] %vm111_vm2, %v110_v49  }
  0x98   :  { %v116_v50 = vpop.permute.xlu0 %115   ;;  %v122_v51 = vpop.permute.xlu1 %121  }
  0x99   :  { %118 = vst.msk [vmem:[#allocation0] sm:$0x1] %vm117_vm3, %v116_v50  }
  0x9a   :  { %124 = vst.msk [vmem:[#allocation0] sm:$0x1] %vm123_vm4, %v122_v51  }
  0x9c   :  { %v128_v52 = vpop.permute.xlu0 %127   ;;  %v134_v53 = vpop.permute.xlu1 %133  }
  0x9d   :  { %130 = vst.msk [vmem:[#allocation0] sm:$0x1] %vm129_vm5, %v128_v52  }
  0x9e   :  { %136 = vst.msk [vmem:[#allocation0] sm:$0x1] %vm135_vm6, %v134_v53  }
  0xa0   :  { %v140_v54 = vpop.permute.xlu0 %139   ;;  %v146_v55 = vpop.permute.xlu1 %145  }
  0xa1   :  { %142 = vst.msk [vmem:[#allocation0] sm:$0x1] %vm141_vm7, %v140_v54  }
  0xa2   :  { %148 = vst.msk [vmem:[#allocation0] sm:$0x1] %vm147_vm8, %v146_v55  }
  0xa4   :  { %v152_v56 = vpop.permute.xlu0 %151   ;;  %v158_v57 = vpop.permute.xlu1 %157  }
  0xa5   :  { %154 = vst.msk [vmem:[#allocation0] sm:$0x1] %vm153_vm9, %v152_v56  }
  0xa6   :  { %160 = vst.msk [vmem:[#allocation0] sm:$0x1] %vm159_vm10, %v158_v57  }
  0xa8   :  { %v164_v58 = vpop.permute.xlu0 %163   ;;  %v170_v59 = vpop.permute.xlu1 %169  }
  0xa9   :  { %166 = vst.msk [vmem:[#allocation0] sm:$0x1] %vm165_vm11, %v164_v58  }
  0xaa   :  { %172 = vst.msk [vmem:[#allocation0] sm:$0x1] %vm171_vm12, %v170_v59  }
  0xac   :  { %v176_v60 = vpop.permute.xlu0 %175   ;;  %v182_v61 = vpop.permute.xlu1 %181  }
  0xad   :  { %178 = vst.msk [vmem:[#allocation0] sm:$0x1] %vm177_vm13, %v176_v60  }
  0xae   :  { %184 = vst.msk [vmem:[#allocation0] sm:$0x1] %vm183_vm14, %v182_v61  }
  0xb0   :  { %v188_v62 = vpop.permute.xlu0 %187  }
  0xb1   :  { %190 = vst.msk [vmem:[#allocation0] sm:$0x1] %vm189_vm15, %v188_v62  }
  0xb8   :  { %v195_v63 = vld [vmem:[#allocation0] sm:$0x1] }
  0xb9   :  { %198 = vst [vmem:[%s402_s1] sm:$0x1] %v195_v63 }

// kernel: tile.133
= control target key start
LH: loop header
LB: loop body
LE: loop exit
PB: predicated region body
PF: predicated region fallthrough
CT: control target
= control target key end

     0   :  { %s28_s0 = inlined_call_operand.vmem [shape: f32[8], index: 0, kind: input, shape index: {}]   ;;  %s29_s1 = inlined_call_operand.vmem [shape: f32[16,8], index: 1, kind: output, shape index: {}]  }
   0x1   :  { %v4_v0 = vld [vmem:[%s28_s0] ss:$0 sm:$0xff] }
   0x2   :  { %5 = vst [vmem:[%s29_s1] sm:$0xff] %v4_v0  ;;  %8 = vst [vmem:[%s29_s1 + $0x8] sm:$0xff] %v4_v0 }

// kernel: tile.142
= control target key start
LH: loop header
LB: loop body
LE: loop exit
PB: predicated region body
PF: predicated region fallthrough
CT: control target
= control target key end

     0   :  { %s133_s10 = smov 120   ;;  %s134_s11 = smov 104   ;;  %vm3_vm0 = vcmask 64512   ;;  %vm9_vm1 = vcmask 1048512   ;;  %vm15_vm2 = vcmask 982912   ;;  %vm21_vm3 = vcmask 917312   ;;  %s209_s0 = inlined_call_operand.vmem [shape: f32[16,8], index: 0, kind: input, shape index: {}]   ;;  %s210_s1 = inlined_call_operand.vmem [shape: f32[1,128], index: 1, kind: output, shape index: {}]  }
   0x1   :  { %v103_v0 = vld [vmem:[%s209_s0 + $0xf] sm:$0x1]   ;;  %v105_v1 = vld [vmem:[%s209_s0 + $0xd] sm:$0x1]   ;;  %v104_v2 = vld [vmem:[%s209_s0 + $0xe] sm:$0x1]  }
   0x2   :  { %7 = vrot.lane.b32.xlu0 %v103_v0, %s133_s10  ;;  %19 = vrot.lane.b32.xlu1 %v105_v1, %s134_s11  ;;  %v106_v3 = vld [vmem:[%s209_s0 + $0xc] sm:$0x1]   ;;  %s135_s16 = smov 112   ;;  %s136_s17 = smov 96   ;;  %v107_v4 = vld [vmem:[%s209_s0 + $0xb] sm:$0x1]  }
   0x3   :  { %v108_v5 = vld [vmem:[%s209_s0 + $0xa] sm:$0x1]   ;;  %v2_v6 = vld [vmem:[%s209_s0] sm:$0x1]   ;;  %s137_s24 = smov 88   ;;  %s138_s25 = smov 80  }
   0x4   :  { %4 = vst.msk [vmem:[#allocation0] sm:$0x1] %vm3_vm0, %v2_v6   ;;  %v109_v7 = vld [vmem:[%s209_s0 + $0x9] sm:$0x1]   ;;  %v110_v8 = vld [vmem:[%s209_s0 + $0x8] sm:$0x1]  }
   0x5   :  { %s139_s30 = smov 72   ;;  %s140_s2 = smov 64   ;;  %v111_v9 = vld [vmem:[%s209_s0 + $0x7] sm:$0x1]   ;;  %v112_v10 = vld [vmem:[%s209_s0 + $0x6] sm:$0x1]  }
   0x6   :  { %13 = vrot.lane.b32.xlu0 %v104_v2, %s135_s16  ;;  %25 = vrot.lane.b32.xlu1 %v106_v3, %s136_s17  ;;  %s141_s7 = smov 56   ;;  %s142_s8 = smov 48   ;;  %v113_v11 = vld [vmem:[%s209_s0 + $0x5] sm:$0x1]   ;;  %v114_v12 = vld [vmem:[%s209_s0 + $0x4] sm:$0x1]  }
   0x7   :  { %s143_s13 = smov 40   ;;  %s144_s14 = smov 32   ;;  %v115_v13 = vld [vmem:[%s209_s0 + $0x3] sm:$0x1]   ;;  %v116_v14 = vld [vmem:[%s209_s0 + $0x2] sm:$0x1]  }
   0x8   :  { %s145_s19 = smov 24   ;;  %s146_s20 = smov 16   ;;  %v117_v15 = vld [vmem:[%s209_s0 + $0x1] sm:$0x1]   ;;  %vm27_vm4 = vcmask 851712   ;;  %vm33_vm5 = vcmask 786112  }
   0x9   :  { %s147_s0 = smov 8   ;;  %vm39_vm6 = vcmask 720512   ;;  %vm45_vm7 = vcmask 654912   ;;  %vm51_vm8 = vcmask 589312   ;;  %vm57_vm9 = vcmask 523712  }
   0xa   :  { %31 = vrot.lane.b32.xlu0 %v107_v4, %s137_s24  ;;  %37 = vrot.lane.b32.xlu1 %v108_v5, %s138_s25  ;;  %vm63_vm10 = vcmask 458112   ;;  %vm69_vm11 = vcmask 392512   ;;  %vm75_vm12 = vcmask 326912   ;;  %vm81_vm13 = vcmask 261312  }
   0xb   :  { %vm87_vm14 = vcmask 195712   ;;  %vm93_vm15 = vcmask 130112  }
   0xe   :  { %43 = vrot.lane.b32.xlu0 %v109_v7, %s139_s30  ;;  %49 = vrot.lane.b32.xlu1 %v110_v8, %s140_s2 }
  0x12   :  { %55 = vrot.lane.b32.xlu0 %v111_v9, %s141_s7  ;;  %61 = vrot.lane.b32.xlu1 %v112_v10, %s142_s8 }
  0x16   :  { %67 = vrot.lane.b32.xlu0 %v113_v11, %s143_s13  ;;  %73 = vrot.lane.b32.xlu1 %v114_v12, %s144_s14 }
  0x1a   :  { %79 = vrot.lane.b32.xlu0 %v115_v13, %s145_s19  ;;  %85 = vrot.lane.b32.xlu1 %v116_v14, %s146_s20 }
  0x1e   :  { %91 = vrot.lane.b32.xlu0 %v117_v15, %s147_s0 }
  0x74   :  { %v8_v16 = vpop.permute.xlu0 %7   ;;  %v20_v17 = vpop.permute.xlu1 %19  }
  0x75   :  { %10 = vst.msk [vmem:[#allocation0] sm:$0x1] %vm9_vm1, %v8_v16  }
  0x78   :  { %v14_v18 = vpop.permute.xlu0 %13   ;;  %v26_v19 = vpop.permute.xlu1 %25  }
  0x79   :  { %16 = vst.msk [vmem:[#allocation0] sm:$0x1] %vm15_vm2, %v14_v18  }
  0x7a   :  { %22 = vst.msk [vmem:[#allocation0] sm:$0x1] %vm21_vm3, %v20_v17  }
  0x7b   :  { %28 = vst.msk [vmem:[#allocation0] sm:$0x1] %vm27_vm4, %v26_v19  }
  0x7c   :  { %v32_v20 = vpop.permute.xlu0 %31   ;;  %v38_v21 = vpop.permute.xlu1 %37  }
  0x7d   :  { %34 = vst.msk [vmem:[#allocation0] sm:$0x1] %vm33_vm5, %v32_v20  }
  0x7e   :  { %40 = vst.msk [vmem:[#allocation0] sm:$0x1] %vm39_vm6, %v38_v21  }
  0x80   :  { %v44_v22 = vpop.permute.xlu0 %43   ;;  %v50_v23 = vpop.permute.xlu1 %49  }
  0x81   :  { %46 = vst.msk [vmem:[#allocation0] sm:$0x1] %vm45_vm7, %v44_v22  }
  0x82   :  { %52 = vst.msk [vmem:[#allocation0] sm:$0x1] %vm51_vm8, %v50_v23  }
  0x84   :  { %v56_v24 = vpop.permute.xlu0 %55   ;;  %v62_v25 = vpop.permute.xlu1 %61  }
  0x85   :  { %58 = vst.msk [vmem:[#allocation0] sm:$0x1] %vm57_vm9, %v56_v24  }
  0x86   :  { %64 = vst.msk [vmem:[#allocation0] sm:$0x1] %vm63_vm10, %v62_v25  }
  0x88   :  { %v68_v26 = vpop.permute.xlu0 %67   ;;  %v74_v27 = vpop.permute.xlu1 %73  }
  0x89   :  { %70 = vst.msk [vmem:[#allocation0] sm:$0x1] %vm69_vm11, %v68_v26  }
  0x8a   :  { %76 = vst.msk [vmem:[#allocation0] sm:$0x1] %vm75_vm12, %v74_v27  }
  0x8c   :  { %v80_v28 = vpop.permute.xlu0 %79   ;;  %v86_v29 = vpop.permute.xlu1 %85  }
  0x8d   :  { %82 = vst.msk [vmem:[#allocation0] sm:$0x1] %vm81_vm13, %v80_v28  }
  0x8e   :  { %88 = vst.msk [vmem:[#allocation0] sm:$0x1] %vm87_vm14, %v86_v29  }
  0x90   :  { %v92_v30 = vpop.permute.xlu0 %91  }
  0x91   :  { %94 = vst.msk [vmem:[#allocation0] sm:$0x1] %vm93_vm15, %v92_v30  }
  0x98   :  { %v99_v31 = vld [vmem:[#allocation0] sm:$0x1] }
  0x99   :  { %102 = vst [vmem:[%s210_s1] sm:$0x1] %v99_v31 }

// kernel: tile.103
= control target key start
LH: loop header
LB: loop body
LE: loop exit
PB: predicated region body
PF: predicated region fallthrough
CT: control target
= control target key end

     0   :  { %s22_s0 = inlined_call_operand.vmem [shape: f32[16], index: 0, kind: input, shape index: {}]   ;;  %s23_s1 = inlined_call_operand.vmem [shape: f32[8,16], index: 1, kind: output, shape index: {}]  }
   0x1   :  { %v4_v0 = vld [vmem:[%s22_s0] ss:$0 sm:$0xff] }
   0x2   :  { %5 = vst [vmem:[%s23_s1] sm:$0xff] %v4_v0 }

// kernel: tile.112
= control target key start
LH: loop header
LB: loop body
LE: loop exit
PB: predicated region body
PF: predicated region fallthrough
CT: control target
= control target key end

     0   :  { %s69_s10 = smov 112   ;;  %s70_s11 = smov 80   ;;  %vm3_vm0 = vcmask 130048   ;;  %vm9_vm1 = vcmask 1048448   ;;  %vm15_vm2 = vcmask 917248   ;;  %vm21_vm3 = vcmask 786048   ;;  %s113_s0 = inlined_call_operand.vmem [shape: f32[8,16], index: 0, kind: input, shape index: {}]   ;;  %s114_s1 = inlined_call_operand.vmem [shape: f32[1,128], index: 1, kind: output, shape index: {}]  }
   0x1   :  { %v55_v0 = vld [vmem:[%s113_s0 + $0x7] sm:$0x1]   ;;  %v57_v1 = vld [vmem:[%s113_s0 + $0x5] sm:$0x1]   ;;  %v56_v2 = vld [vmem:[%s113_s0 + $0x6] sm:$0x1]  }
   0x2   :  { %7 = vrot.lane.b32.xlu0 %v55_v0, %s69_s10  ;;  %19 = vrot.lane.b32.xlu1 %v57_v1, %s70_s11  ;;  %v58_v3 = vld [vmem:[%s113_s0 + $0x4] sm:$0x1]   ;;  %v2_v4 = vld [vmem:[%s113_s0] sm:$0x1]   ;;  %s71_s18 = smov 96   ;;  %s72_s19 = smov 64  }
   0x3   :  { %4 = vst.msk [vmem:[#allocation0] sm:$0x1] %vm3_vm0, %v2_v4   ;;  %v59_v5 = vld [vmem:[%s113_s0 + $0x3] sm:$0x1]   ;;  %v60_v6 = vld [vmem:[%s113_s0 + $0x2] sm:$0x1]  }
   0x4   :  { %s73_s24 = smov 48   ;;  %s74_s25 = smov 32   ;;  %v61_v7 = vld [vmem:[%s113_s0 + $0x1] sm:$0x1]   ;;  %vm27_vm4 = vcmask 654848   ;;  %vm33_vm5 = vcmask 523648  }
   0x5   :  { %s75_s0 = smov 16   ;;  %vm39_vm6 = vcmask 392448   ;;  %vm45_vm7 = vcmask 261248  }
   0x6   :  { %13 = vrot.lane.b32.xlu0 %v56_v2, %s71_s18  ;;  %25 = vrot.lane.b32.xlu1 %v58_v3, %s72_s19 }
   0xa   :  { %31 = vrot.lane.b32.xlu0 %v59_v5, %s73_s24  ;;  %37 = vrot.lane.b32.xlu1 %v60_v6, %s74_s25 }
   0xe   :  { %43 = vrot.lane.b32.xlu0 %v61_v7, %s75_s0 }
  0x74   :  { %v8_v8 = vpop.permute.xlu0 %7   ;;  %v20_v9 = vpop.permute.xlu1 %19  }
  0x75   :  { %10 = vst.msk [vmem:[#allocation0] sm:$0x1] %vm9_vm1, %v8_v8  }
  0x78   :  { %v14_v10 = vpop.permute.xlu0 %13   ;;  %v26_v11 = vpop.permute.xlu1 %25  }
  0x79   :  { %16 = vst.msk [vmem:[#allocation0] sm:$0x1] %vm15_vm2, %v14_v10  }
  0x7a   :  { %22 = vst.msk [vmem:[#allocation0] sm:$0x1] %vm21_vm3, %v20_v9  }
  0x7b   :  { %28 = vst.msk [vmem:[#allocation0] sm:$0x1] %vm27_vm4, %v26_v11  }
  0x7c   :  { %v32_v12 = vpop.permute.xlu0 %31   ;;  %v38_v13 = vpop.permute.xlu1 %37  }
  0x7d   :  { %34 = vst.msk [vmem:[#allocation0] sm:$0x1] %vm33_vm5, %v32_v12  }
  0x7e   :  { %40 = vst.msk [vmem:[#allocation0] sm:$0x1] %vm39_vm6, %v38_v13  }
  0x80   :  { %v44_v14 = vpop.permute.xlu0 %43  }
  0x81   :  { %46 = vst.msk [vmem:[#allocation0] sm:$0x1] %vm45_vm7, %v44_v14  }
  0x88   :  { %v51_v15 = vld [vmem:[#allocation0] sm:$0x1] }
  0x89   :  { %54 = vst [vmem:[%s114_s1] sm:$0x1] %v51_v15 }

// kernel: tile.99
= control target key start
LH: loop header
LB: loop body
LE: loop exit
PB: predicated region body
PF: predicated region fallthrough
CT: control target
= control target key end

     0   :  { %s7_s6 = smov 3  ;;  %s21_s9 = smov 3  ;;  %vm4_vm0 = vcmask 130048   ;;  %vm11_vm1 = vcmask 1048448   ;;  %vm18_vm2 = vcmask 917248   ;;  %vm25_vm3 = vcmask 786048   ;;  %s121_s0 = inlined_call_operand.vmem [shape: f32[2,8,16], index: 0, kind: input, shape index: {}]   ;;  %s122_s1 = inlined_call_operand.vmem [shape: f32[2,128], index: 1, kind: output, shape index: {}]  }
   0x1   :  { %v63_v0 = vld [vmem:[%s121_s0 + $0x7] ss:$8 sm:%s7_s6]   ;;  %s77_s10 = smov 112   ;;  %v65_v1 = vld [vmem:[%s121_s0 + $0x5] ss:$8 sm:%s21_s9]   ;;  %s14_s13 = smov 3 }
   0x2   :  { %9 = vrot.lane.b32.xlu0 %v63_v0, %s77_s10  ;;  %s78_s14 = smov 80   ;;  %v64_v2 = vld [vmem:[%s121_s0 + $0x6] ss:$8 sm:%s14_s13]   ;;  %s28_s17 = smov 3  ;;  %vm32_vm4 = vcmask 654848   ;;  %vm39_vm5 = vcmask 523648  }
   0x3   :  { %23 = vrot.lane.b32.xlu1 %v65_v1, %s78_s14  ;;  %v66_v3 = vld [vmem:[%s121_s0 + $0x4] ss:$8 sm:%s28_s17]   ;;  %s35_s20 = smov 3  ;;  %s42_s21 = smov 3  ;;  %vm46_vm6 = vcmask 392448   ;;  %vm53_vm7 = vcmask 261248  }
   0x4   :  { %s79_s22 = smov 96   ;;  %s80_s23 = smov 64   ;;  %v67_v4 = vld [vmem:[%s121_s0 + $0x3] ss:$8 sm:%s35_s20]   ;;  %v68_v5 = vld [vmem:[%s121_s0 + $0x2] ss:$8 sm:%s42_s21]  }
   0x5   :  { %s2_s26 = smov 3  ;;  %s49_s29 = smov 3 }
   0x6   :  { %16 = vrot.lane.b32.xlu0 %v64_v2, %s79_s22  ;;  %v3_v6 = vld [vmem:[%s121_s0] ss:$8 sm:%s2_s26]   ;;  %s81_s3 = smov 48   ;;  %s82_s4 = smov 32  }
   0x7   :  { %30 = vrot.lane.b32.xlu1 %v66_v3, %s80_s23  ;;  %5 = vst.msk [vmem:[#allocation0] sm:$0x3] %vm4_vm0, %v3_v6   ;;  %v69_v7 = vld [vmem:[%s121_s0 + $0x1] ss:$8 sm:%s49_s29]   ;;  %s83_s0 = smov 16  }
   0xa   :  { %37 = vrot.lane.b32.xlu0 %v67_v4, %s81_s3 }
   0xb   :  { %44 = vrot.lane.b32.xlu1 %v68_v5, %s82_s4 }
   0xe   :  { %51 = vrot.lane.b32.xlu0 %v69_v7, %s83_s0 }
  0x74   :  { %v10_v8 = vpop.permute.xlu0 %9  }
  0x75   :  { %12 = vst.msk [vmem:[#allocation0] sm:$0x3] %vm11_vm1, %v10_v8   ;;  %v24_v9 = vpop.permute.xlu1 %23  }
  0x78   :  { %v17_v10 = vpop.permute.xlu0 %16  }
  0x79   :  { %19 = vst.msk [vmem:[#allocation0] sm:$0x3] %vm18_vm2, %v17_v10   ;;  %v31_v11 = vpop.permute.xlu1 %30  }
  0x7a   :  { %26 = vst.msk [vmem:[#allocation0] sm:$0x3] %vm25_vm3, %v24_v9  }
  0x7b   :  { %33 = vst.msk [vmem:[#allocation0] sm:$0x3] %vm32_vm4, %v31_v11  }
  0x7c   :  { %v38_v12 = vpop.permute.xlu0 %37  }
  0x7d   :  { %40 = vst.msk [vmem:[#allocation0] sm:$0x3] %vm39_vm5, %v38_v12   ;;  %v45_v13 = vpop.permute.xlu1 %44  }
  0x7e   :  { %47 = vst.msk [vmem:[#allocation0] sm:$0x3] %vm46_vm6, %v45_v13  }
  0x80   :  { %v52_v14 = vpop.permute.xlu0 %51  }
  0x81   :  { %54 = vst.msk [vmem:[#allocation0] sm:$0x3] %vm53_vm7, %v52_v14  }
  0x88   :  { %v59_v15 = vld [vmem:[#allocation0] sm:$0x3] }
  0x89   :  { %62 = vst [vmem:[%s122_s1] sm:$0x3] %v59_v15 }

// kernel: mmdecoder_forward.1
= control target key start
LH: loop header
LB: loop body
LE: loop exit
PB: predicated region body
PF: predicated region fallthrough
CT: control target
= control target key end

     0   :  { %v94_v0 = vlaneseq  ;;  %v6110_v1 = vmov 0.0   ;;  %vm6111_vm0 = vmmov 0   ;;  %vm91_vm1 = vcmask 523264   ;;  %s6113_s28 = smov 32   ;;  %s6114_s22 = smov 64   ;;  %s7850_s2 = inlined_call_operand.vmem [shape: bf16[3,64,128], index: 2, kind: input, shape index: {}]   ;;  %s7851_s0 = inlined_call_operand.vmem [shape: f32[16,64], index: 0, kind: input, shape index: {}]   ;;  %s7852_s3 = inlined_call_operand.vmem [shape: f32[3,128], index: 3, kind: input, shape index: {}]   ;;  %s7853_s4 = inlined_call_operand.vmem [shape: bf16[3,128,128], index: 4, kind: input, shape index: {}]   ;;  %s7854_s5 = inlined_call_operand.vmem [shape: f32[3,128], index: 5, kind: input, shape index: {}]   ;;  %s7855_s14 = inlined_call_operand.vmem [shape: f32[128,128], index: 14, kind: input, shape index: {}]   ;;  %s7856_s1 = inlined_call_operand.vmem [shape: f32[2,128], index: 1, kind: input, shape index: {}]   ;;  %s7857_s15 = inlined_call_operand.vmem [shape: f32[32,16], index: 15, kind: input, shape index: {}]   ;;  %s7858_s16 = inlined_call_operand.vmem [shape: f32[128,256], index: 16, kind: input, shape index: {}]   ;;  %s7859_s6 = inlined_call_operand.vmem [shape: bf16[3,256,128], index: 6, kind: input, shape index: {}]   ;;  %s7860_s7 = inlined_call_operand.vmem [shape: f32[3,128], index: 7, kind: input, shape index: {}]   ;;  %s7861_s8 = inlined_call_operand.vmem [shape: bf16[3,128,128], index: 8, kind: input, shape index: {}]   ;;  %s7862_s9 = inlined_call_operand.vmem [shape: f32[3,128], index: 9, kind: input, shape index: {}]   ;;  %s7863_s17 = inlined_call_operand.vmem [shape: f32[64,32], index: 17, kind: input, shape index: {}]   ;;  %s7864_s18 = inlined_call_operand.vmem [shape: f32[128,256], index: 18, kind: input, shape index: {}]   ;;  %s7865_s10 = inlined_call_operand.vmem [shape: bf16[3,256,128], index: 10, kind: input, shape index: {}]   ;;  %s7866_s11 = inlined_call_operand.vmem [shape: f32[3,128], index: 11, kind: input, shape index: {}]   ;;  %s7867_s12 = inlined_call_operand.vmem [shape: bf16[3,128,128], index: 12, kind: input, shape index: {}]   ;;  %s7868_s19 = inlined_call_operand.vmem [shape: f32[48,64], index: 19, kind: input, shape index: {}]   ;;  %s7869_s20 = inlined_call_operand.vmem [shape: f32[128,96], index: 20, kind: input, shape index: {}]   ;;  %s7870_s13 = inlined_call_operand.vmem [shape: f32[3,128], index: 13, kind: input, shape index: {}]   ;;  %s7871_s21 = inlined_call_operand.vmem [shape: f32[48,96], index: 21, kind: output, shape index: {}]  }
   0x1   :  { %7876 = sst [smem:[#allocation3_spill]] %s7850_s2  ;;  %5520 = vmatprep.subr.bf16.mxu1 %v6110_v1  ;;  %69 = vst [vmem:[#allocation2] sm:$0xff] %v6110_v1  ;;  %70 = vst [vmem:[#allocation2 + $0x8] sm:$0xff] %v6110_v1  ;;  %5544 = vmatprep.subr.bf16.mxu0 %v6110_v1  ;;  %vm133_vm3 = vcmask 1046528   ;;  %vm112_vm5 = vcmask 1040384   ;;  %vm1001_vm10 = vcmask 130048  }
   0x2   :  { %7877 = sst [smem:[#allocation4_spill]] %s7851_s0  ;;  %71 = vst [vmem:[#allocation2 + $0x10] sm:$0xff] %v6110_v1  ;;  %73 = vst [vmem:[#allocation2 + $0x20] sm:$0xff] %v6110_v1  ;;  %5528 = vmatprep.mubr.msk.bf16.mxu1 %vm6111_vm0, %v6110_v1  ;;  %5552 = vmatprep.mubr.msk.bf16.mxu0 %vm6111_vm0, %v6110_v1  ;;  %v6249_v4 = vshrl.u32 %v94_v0, 7  ;;  %vm6115_vm12 = vmmov 1  }
   0x3   :  { %7878 = sst [smem:[#allocation5_spill]] %s7852_s3  ;;  %75 = vst [vmem:[#allocation2 + $0x30] sm:$0xff] %v6110_v1  ;;  %79 = vst [vmem:[#allocation2 + $0x50] sm:$0xff] %v6110_v1 }
   0x4   :  { %7879 = sst [smem:[#allocation6_spill]] %s7853_s4  ;;  %80 = vst [vmem:[#allocation2 + $0x58] sm:$0xff] %v6110_v1  ;;  %87 = vst [vmem:[#allocation2 + $0x90] sm:$0xff] %v6110_v1  ;;  %v6267_v9 = vadd.s32 8, %v6249_v4  ;;  %v97_v12 = vand.u32 7, %v6249_v4  ;;  %v6344_v55 = vsub.s32 0, %v6249_v4 }
   0x5   :  { %7880 = sst [smem:[#allocation7_spill]] %s7854_s5  ;;  %88 = vst [vmem:[#allocation2 + $0x98] sm:$0xff] %v6110_v1  ;;  %s6112_s4 = smov 16  }
   0x6   :  { %7881 = sst [smem:[#allocation8_spill]] %s7855_s14  ;;  %v98_v14 = vand.u32 7, %v6267_v9  ;;  %vm6284_vm2 = vcmp.lt.s32.totalorder %v97_v12, 7  ;;  %vm6321_vm6 = vcmp.ge.s32.totalorder %v97_v12, 1 }
   0x7   :  { %s7882_s26 = sld [smem:[#allocation3_spill]] }
   0x8   :  { %s7883_s30 = sld [smem:[#allocation4_spill]]  ;;  %vm6294_vm4 = vcmp.lt.s32.totalorder %v98_v14, 7  ;;  %v103_v29 = vld [vmem:[#allocation2] sm:$0x80]  ;;  %vm6325_vm7 = vcmp.ge.s32.totalorder %v98_v14, 1 }
   0x9   :  { %v113_v36 = vrot.slane %v103_v29, 7  ;;  %s7892_s27 = sld [smem:[#allocation5_spill]]  ;;  %vm4672_vm8 = vmpackc.low %vm6325_vm7, %vm6321_vm6 }
   0xa   :  { %v125_v15 = vld [vmem:[#allocation2 + $0x30] sm:$0x1]  ;;  %s7893_s5 = sld [smem:[#allocation6_spill]]  ;;  %vm4699_vm9 = vmpackc.low %vm6294_vm4, %vm6284_vm2 }
   0xb   :  { %v137_v16 = vrot.slane %v125_v15, 1  ;;  %s7894_s0 = sld [smem:[#allocation7_spill]] }
   0xd   :  { %v5890_v2 = vld [vmem:[%s7882_s26 + $0x38] sm:$0xff]   ;;  %v5891_v3 = vld [vmem:[%s7882_s26 + $0x30] sm:$0xff]   ;;  %v5892_v8 = vld [vmem:[%s7882_s26 + $0x28] sm:$0xff]  }
   0xe   :  { %5521 = vmatpush3.bf16.msra.mxu1 %v5890_v2  ;;  %v5894_v5 = vld [vmem:[%s7882_s26 + $0x58] sm:$0xff]   ;;  %v89_v6 = vld [vmem:[%s7883_s30] sm:$0xff]  ;;  %v90_v7 = vld [vmem:[%s7883_s30 + $0x8] sm:$0xff] }
   0xf   :  { %5522 = vmatprep.subr.bf16.mxu1 %v6110_v1  ;;  %5545 = vmatpush3.bf16.msra.mxu0 %v5894_v5  ;;  %92 = vst.msk [vmem:[#allocation2 + $0x10] sm:$0xff] %vm91_vm1, %v89_v6  ;;  %93 = vst.msk [vmem:[#allocation2 + $0x20] sm:$0xff] %vm91_vm1, %v90_v7  ;;  %v5896_v10 = vld [vmem:[%s7882_s26 + $0x50] sm:$0xff]   ;;  %v5893_v11 = vld [vmem:[%s7882_s26 + $0x20] sm:$0xff]  }
  0x10   :  { %5546 = vmatprep.subr.bf16.mxu0 %v6110_v1  ;;  %v5898_v13 = vld [vmem:[%s7882_s26 + $0x48] sm:$0xff]   ;;  %v5895_v23 = vld [vmem:[%s7882_s26 + $0x18] sm:$0xff]   ;;  %v5900_v24 = vld [vmem:[%s7882_s26 + $0x40] sm:$0xff]  }
  0x11   :  { %v5897_v33 = vld [vmem:[%s7882_s26 + $0x10] sm:$0xff]   ;;  %v5899_v38 = vld [vmem:[%s7882_s26 + $0x8] sm:$0xff]   ;;  %v5901_v43 = vld [vmem:[%s7882_s26] sm:$0xff]   ;;  %s7895_s26 = sld [smem:[#allocation8_spill]] }
  0x12   :  { %5523 = vmatpush3.bf16.msra.mxu1 %v5891_v3  ;;  %v6349_v57 = vld [vmem:[%s7892_s27] sm:$0x7]  ;;  %v5902_v29 = vld [vmem:[%s7893_s5 + $0x78] sm:$0xff]   ;;  %v5923_v39 = vld [vmem:[%s7893_s5 + $0x90] sm:$0xff]  }
  0x13   :  { %5524 = vmatprep.subr.bf16.mxu1 %v6110_v1  ;;  %5547 = vmatpush3.bf16.msra.mxu0 %v5896_v10  ;;  %v382_v61 = vrot.slane %v6349_v57, %v6344_v55 }
  0x14   :  { %5548 = vmatprep.subr.bf16.mxu0 %v6110_v1 }
  0x16   :  { %5525 = vmatpush3.bf16.msra.mxu1 %v5892_v8  ;;  %v99_v17 = vld [vmem:[#allocation2 + $0x10] sm:$0xff]  ;;  %v100_v18 = vld [vmem:[#allocation2 + $0x20] sm:$0xff] }
  0x17   :  { %5526 = vmatprep.subr.bf16.mxu1 %v6110_v1  ;;  %v124_v20 = vld [vmem:[#allocation2 + $0x10] sm:$0xfe]  ;;  %v135_v21 = vrot.slane %v100_v18, 1  ;;  %v152_v22 = vpack.c.bf16 %v100_v18, %v99_v17  ;;  %5549 = vmatpush3.bf16.msra.mxu0 %v5898_v13  ;;  %v104_v30 = vld [vmem:[#allocation2 + $0x20] sm:$0x7f]  ;;  %v114_v35 = vrot.slane %v99_v17, 7 }
  0x18   :  { %v134_v26 = vrot.slane %v124_v20, 1  ;;  %5550 = vmatprep.subr.bf16.mxu0 %v6110_v1  ;;  %v116_v37 = vrot.slane %v104_v30, 7 }
  0x19   :  { %v138_v28 = vsel %vm133_vm3, %v135_v21, %v137_v16  ;;  %v115_v41 = vsel %vm112_vm5, %v113_v36, %v114_v35  ;;  %v5904_v36 = vld [vmem:[%s7893_s5 + $0x38] sm:$0xff]  }
  0x1a   :  { %5527 = vmatpush3.bf16.msra.mxu1 %v5893_v11  ;;  %v136_v27 = vsel %vm133_vm3, %v134_v26, %v135_v21  ;;  %v142_v32 = vsel %vm6294_vm4, %v138_v28, 0.0  ;;  %v117_v42 = vsel %vm112_vm5, %v114_v35, %v116_v37  ;;  %v120_v44 = vsel %vm6321_vm6, %v115_v41, 0.0  ;;  %v5907_v37 = vld [vmem:[%s7893_s5 + $0x60] sm:$0xff]   ;;  %v5909_v41 = vld [vmem:[%s7893_s5 + $0x58] sm:$0xff]  }
  0x1b   :  { %5532 = vmatprep.subr.bf16.mxu1 %v6110_v1  ;;  %v141_v31 = vsel %vm6284_vm2, %v136_v27, 0.0  ;;  %5551 = vmatpush3.bf16.msra.mxu0 %v5900_v24  ;;  %v121_v45 = vsel %vm6325_vm7, %v117_v42, 0.0  ;;  %v5908_v42 = vld [vmem:[%s7893_s5 + $0x28] sm:$0xff]   ;;  %vm2509_vm7 = vcmask 261120  }
  0x1c   :  { %v298_v34 = vpack.c.bf16 %v142_v32, %v141_v31  ;;  %5576 = vmatprep.subr.bf16.mxu0 %v6110_v1  ;;  %v143_v46 = vpack.c.bf16 %v121_v45, %v120_v44  ;;  %v5903_v31 = vld [vmem:[%s7893_s5 + $0x70] sm:$0xff]   ;;  %v5910_v44 = vld [vmem:[%s7893_s5 + $0x20] sm:$0xff]   ;;  %v5913_v45 = vld [vmem:[%s7893_s5 + $0x48] sm:$0xff]  }
  0x1d   :  { %5529 = vmatmul.mubr.msk.bf16.vlgmr.msra.gmra.mxu1 %vm91_vm1, %v152_v22 }
  0x1e   :  { %5533 = vmatpush3.bf16.msra.mxu1 %v5895_v23  ;;  %5540 = vmatprep.mubr.msk.bf16.mxu1 %vm6111_vm0, %v6110_v1 }
  0x1f   :  { %5534 = vmatprep.subr.bf16.mxu1 %v6110_v1  ;;  %5553 = vmatmul.mubr.msk.bf16.vlgmr.msra.gmra.mxu0 %vm91_vm1, %v298_v34  ;;  %v5905_v34 = vld [vmem:[%s7893_s5 + $0x68] sm:$0xff]  }
  0x20   :  { %5592 = vmatprep.mubr.msk.bf16.mxu0 %vm6111_vm0, %v6110_v1  ;;  %5577 = vmatpush3.bf16.msra.mxu0 %v5904_v36  ;;  %v5925_v36 = vld [vmem:[%s7893_s5 + $0x80] sm:$0xff]  }
  0x21   :  { %5578 = vmatprep.subr.bf16.mxu0 %v6110_v1 }
  0x22   :  { %5535 = vmatpush3.bf16.msra.mxu1 %v5897_v33 }
  0x23   :  { %5536 = vmatprep.subr.bf16.mxu1 %v6110_v1 }
  0x26   :  { %5537 = vmatpush3.bf16.msra.mxu1 %v5899_v38  ;;  %v5906_v38 = vld [vmem:[%s7893_s5 + $0x30] sm:$0xff]  }
  0x27   :  { %5538 = vmatprep.subr.bf16.mxu1 %v6110_v1  ;;  %5579 = vmatpush3.bf16.msra.mxu0 %v5906_v38 }
  0x28   :  { %5580 = vmatprep.subr.bf16.mxu0 %v6110_v1 }
  0x2a   :  { %5539 = vmatpush3.bf16.msra.mxu1 %v5901_v43  ;;  %v5911_v43 = vld [vmem:[%s7893_s5 + $0x50] sm:$0xff]  }
  0x2b   :  { %5556 = vmatprep.subr.bf16.mxu1 %v6110_v1  ;;  %5581 = vmatpush3.bf16.msra.mxu0 %v5908_v42 }
  0x2c   :  { %5582 = vmatprep.subr.bf16.mxu0 %v6110_v1 }
  0x2d   :  { %5541 = vmatmul.mubr.msk.bf16.vlgmr.msra.gmra.mxu1 %vm91_vm1, %v143_v46  ;;  %v5912_v46 = vld [vmem:[%s7893_s5 + $0x18] sm:$0xff]  }
  0x2e   :  { %5572 = vmatprep.mubr.msk.bf16.mxu1 %vm6111_vm0, %v6110_v1  ;;  %5557 = vmatpush3.bf16.msra.mxu1 %v5902_v29 }
  0x2f   :  { %5558 = vmatprep.subr.bf16.mxu1 %v6110_v1  ;;  %5583 = vmatpush3.bf16.msra.mxu0 %v5910_v44 }
  0x30   :  { %5584 = vmatprep.subr.bf16.mxu0 %v6110_v1 }
  0x32   :  { %5559 = vmatpush3.bf16.msra.mxu1 %v5903_v31  ;;  %v5922_v31 = vld [vmem:[%s7893_s5 + $0x98] sm:$0xff]  }
  0x33   :  { %5560 = vmatprep.subr.bf16.mxu1 %v6110_v1  ;;  %5585 = vmatpush3.bf16.msra.mxu0 %v5912_v46 }
  0x34   :  { %5586 = vmatprep.subr.bf16.mxu0 %v6110_v1 }
  0x36   :  { %5561 = vmatpush3.bf16.msra.mxu1 %v5905_v34 }
  0x37   :  { %5562 = vmatprep.subr.bf16.mxu1 %v6110_v1 }
  0x3a   :  { %5563 = vmatpush3.bf16.msra.mxu1 %v5907_v37 }
  0x3b   :  { %5564 = vmatprep.subr.bf16.mxu1 %v6110_v1 }
  0x3e   :  { %5565 = vmatpush3.bf16.msra.mxu1 %v5909_v41 }
  0x3f   :  { %5566 = vmatprep.subr.bf16.mxu1 %v6110_v1 }
  0x42   :  { %5567 = vmatpush3.bf16.msra.mxu1 %v5911_v43 }
  0x43   :  { %5568 = vmatprep.subr.bf16.mxu1 %v6110_v1 }
  0x46   :  { %5569 = vmatpush3.bf16.msra.mxu1 %v5913_v45 }
  0x47   :  { %5570 = vmatprep.subr.bf16.mxu1 %v6110_v1 }
  0xdd   :  { %v223_v47 = vpop.f32.mrf.mxu1 }
  0xdf   :  { %v5530_v48 = vpop.f32.mrf.mxu1  ;;  %v369_v50 = vpop.f32.mrf.mxu0 }
  0xe0   :  { %v5914_v48 = vld [vmem:[%s7893_s5 + $0x10] sm:$0xff]  }
  0xe1   :  { %v226_v49 = vpop.f32.mrf.mxu1  ;;  %v5554_v52 = vpop.f32.mrf.mxu0  ;;  %5587 = vmatpush3.bf16.msra.mxu0 %v5914_v48 }
  0xe2   :  { %5588 = vmatprep.subr.bf16.mxu0 %v6110_v1 }
  0xe3   :  { %v5531_v51 = vpop.f32.mrf.mxu1  ;;  %v372_v53 = vpop.f32.mrf.mxu0 }
  0xe5   :  { %v5555_v54 = vpop.f32.mrf.mxu0 }
  0xed   :  { %v291_v56 = vpop.f32.mrf.mxu1 }
  0xee   :  { %v292_v58 = vadd.f32 %v291_v56, %v223_v47  ;;  %v5915_v47 = vld [vmem:[%s7893_s5 + $0x40] sm:$0xff]  }
  0xef   :  { %v5542_v59 = vpop.f32.mrf.mxu1  ;;  %5571 = vmatpush3.bf16.msra.mxu1 %v5915_v47 }
  0xf0   :  { %v376_v60 = vadd.f32 %v369_v50, %v292_v58  ;;  %5596 = vmatprep.subr.bf16.mxu1 %v6110_v1  ;;  %v5917_v50 = vld [vmem:[%s7893_s5] sm:$0xff]  }
  0xf1   :  { %v294_v62 = vpop.f32.mrf.mxu1 }
  0xf2   :  { %v295_v63 = vadd.f32 %v294_v62, %v226_v49  ;;  %v6353_v2 = vadd.f32 %v382_v61, %v376_v60  ;;  %v5916_v49 = vld [vmem:[%s7893_s5 + $0x8] sm:$0xff]  }
  0xf3   :  { %v5543_v0 = vpop.f32.mrf.mxu1  ;;  %5589 = vmatpush3.bf16.msra.mxu0 %v5916_v49 }
  0xf4   :  { %v377_v3 = vadd.f32 %v372_v53, %v295_v63  ;;  %v403_v6 = vmul.f32 %v6353_v2, %v6353_v2  ;;  %5590 = vmatprep.subr.bf16.mxu0 %v6110_v1  ;;  %v434_v63 = vrot.slane %v6349_v57, 1  ;;  %v6434_v0 = vsub.s32 2, %v6249_v4 }
  0xf6   :  { %v6355_v5 = vadd.f32 %v382_v61, %v377_v3 }
  0xf7   :  { %5591 = vmatpush3.bf16.msra.mxu0 %v5917_v50  ;;  %v6490_v50 = vld [vmem:[%s7894_s0] sm:$0x7] }
  0xf8   :  { %v404_v7 = vmul.f32 %v6355_v5, %v6355_v5  ;;  %v385_v8 = vadd.f32 %v6355_v5, %v6353_v2  ;;  %v809_v25 = vrot.slane %v6490_v50, %v6344_v55 }
  0xfa   :  { %v386_v10 = vrot.slane %v385_v8, 4  ;;  %v405_v11 = vadd.f32 %v404_v7, %v403_v6 }
  0xfc   :  { %v387_v12 = vadd.f32 %v386_v10, %v385_v8  ;;  %v406_v13 = vrot.slane %v405_v11, 4  ;;  %v446_v8 = vrot.slane %v6349_v57, %v6434_v0  ;;  %v455_v57 = vld [vmem:[#allocation2] sm:$0x80] }
  0xfe   :  { %v388_v14 = vrot.slane %v387_v12, 2  ;;  %v407_v15 = vadd.f32 %v406_v13, %v405_v11 }
 0x100   :  { %v389_v16 = vadd.f32 %v388_v14, %v387_v12  ;;  %v408_v17 = vrot.slane %v407_v15, 2 }
 0x102   :  { %v390_v18 = vrot.slane %v389_v16, 1  ;;  %v409_v20 = vadd.f32 %v408_v17, %v407_v15 }
 0x104   :  { %v391_v21 = vadd.f32 %v390_v18, %v389_v16  ;;  %v410_v22 = vrot.slane %v409_v20, 1 }
 0x106   :  { %392 = vrot.lane.b32.xlu0 %v391_v21, %s6112_s4  ;;  %v411_v23 = vadd.f32 %v410_v22, %v409_v20  ;;  %v5918_v20 = vld [vmem:[%s7893_s5 + $0xb8] sm:$0xff]   ;;  %v460_v22 = vrot.slane %v455_v57, 7 }
 0x10a   :  { %412 = vrot.lane.b32.xlu0 %v411_v23, %s6112_s4 }
 0x178   :  { %v393_v24 = vpop.permute.xlu0 %392 }
 0x179   :  { %v394_v26 = vadd.f32 %v393_v24, %v391_v21  ;;  %v5920_v24 = vld [vmem:[%s7893_s5 + $0xa8] sm:$0xff]  }
 0x17b   :  { %395 = vrot.lane.b32.xlu1 %v394_v26, %s6113_s28 }
 0x17c   :  { %v413_v27 = vpop.permute.xlu0 %412 }
 0x17d   :  { %v414_v28 = vadd.f32 %v413_v27, %v411_v23 }
 0x17f   :  { %415 = vrot.lane.b32.xlu1 %v414_v28, %s6113_s28 }
 0x1ed   :  { %v396_v30 = vpop.permute.xlu1 %395 }
 0x1ee   :  { %v397_v32 = vadd.f32 %v396_v30, %v394_v26  ;;  %v5921_v30 = vld [vmem:[%s7893_s5 + $0xa0] sm:$0xff]  }
 0x1f0   :  { %398 = vrot.lane.b32.xlu0 %v397_v32, %s6114_s22 }
 0x1f1   :  { %v416_v33 = vpop.permute.xlu1 %415 }
 0x1f2   :  { %v417_v35 = vadd.f32 %v416_v33, %v414_v28  ;;  %v470_v33 = vld [vmem:[#allocation2 + $0x30] sm:$0x1] }
 0x1f3   :  { %v477_v37 = vrot.slane %v470_v33, 1  ;;  %v897_v33 = vld [vmem:[%s7895_s26 + $0x38] sm:$0xff] }
 0x1f4   :  { %418 = vrot.lane.b32.xlu1 %v417_v35, %s6114_s22 }
 0x262   :  { %v399_v51 = vpop.permute.xlu0 %398 }
 0x263   :  { %v400_v52 = vadd.f32 %v399_v51, %v397_v32  ;;  %v5924_v32 = vld [vmem:[%s7893_s5 + $0x88] sm:$0xff]  }
 0x265   :  { %v402_v53 = vmul.f32 0.0078125, %v400_v52 }
 0x266   :  { %v419_v54 = vpop.permute.xlu1 %418 }
 0x267   :  { %v420_v56 = vadd.f32 %v419_v54, %v417_v35  ;;  %v422_v58 = vmul.f32 %v402_v53, %v402_v53  ;;  %v428_v3 = vrot.slane %v402_v53, %v6344_v55 }
 0x269   :  { %v421_v59 = vmul.f32 0.0078125, %v420_v56  ;;  %v429_v10 = vsub.f32 %v6353_v2, %v428_v3  ;;  %v430_v11 = vsub.f32 %v6355_v5, %v428_v3  ;;  %v5919_v2 = vld [vmem:[%s7893_s5 + $0xb0] sm:$0xff]  }
 0x26b   :  { %v423_v60 = vsub.f32 %v421_v59, %v422_v58 }
 0x26d   :  { %v424_v61 = vmax.f32 %v423_v60, 0.0 }
 0x26f   :  { %v431_v62 = vadd.f32 1e-05, %v424_v61 }
 0x271   :  { %6070 = vrsqrt.f32 %v431_v62 }
 0x27e   :  { %v6071_v6 = vpop.eup %6070 }
 0x27f   :  { %v436_v7 = vmul.f32 %v6071_v6, %v434_v63 }
 0x281   :  { %v440_v12 = vrot.slane %v436_v7, %v6344_v55 }
 0x283   :  { %v441_v13 = vmul.f32 %v440_v12, %v429_v10  ;;  %v442_v14 = vmul.f32 %v440_v12, %v430_v11 }
 0x285   :  { %v447_v15 = vadd.f32 %v446_v8, %v441_v13  ;;  %v448_v16 = vadd.f32 %v446_v8, %v442_v14 }
 0x287   :  { %v449_v17 = vmax.f32 %v447_v15, 0.0  ;;  %v450_v18 = vmax.f32 %v448_v16, 0.0 }
 0x289   :  { %451 = vst [vmem:[#allocation2 + $0x10] sm:$0xff] %v449_v17  ;;  %452 = vst [vmem:[#allocation2 + $0x20] sm:$0xff] %v450_v18  ;;  %v500_v21 = vpack.c.bf16 %v450_v18, %v449_v17  ;;  %v461_v5 = vrot.slane %v449_v17, 7  ;;  %v475_v35 = vrot.slane %v450_v18, 1 }
 0x28b   :  { %5573 = vmatmul.mubr.bf16.vlgmr.msra.gmra.mxu1 %v500_v21  ;;  %v462_v27 = vsel %vm112_vm5, %v460_v22, %v461_v5  ;;  %v478_v41 = vsel %vm133_vm3, %v475_v35, %v477_v37  ;;  %v905_v22 = vld [vmem:[%s7895_s26 + $0x78] sm:$0xff] }
 0x28c   :  { %5597 = vmatpush3.bf16.msra.mxu1 %v5918_v20  ;;  %5612 = vmatprep.mubr.msk.bf16.mxu1 %vm6111_vm0, %v6110_v1  ;;  %v893_v37 = vld [vmem:[%s7895_s26 + $0x18] sm:$0xff] }
 0x28d   :  { %5598 = vmatprep.subr.bf16.mxu1 %v6110_v1  ;;  %5616 = vmatprep.subr.mxu0 %v905_v22 }
 0x290   :  { %v456_v23 = vld [vmem:[#allocation2 + $0x20] sm:$0x7f]  ;;  %5599 = vmatpush3.bf16.msra.mxu1 %v5919_v2  ;;  %v469_v40 = vld [vmem:[#allocation2 + $0x10] sm:$0xfe] }
 0x291   :  { %v463_v26 = vrot.slane %v456_v23, 7  ;;  %5600 = vmatprep.subr.bf16.mxu1 %v6110_v1  ;;  %v474_v34 = vrot.slane %v469_v40, 1  ;;  %v904_v23 = vld [vmem:[%s7895_s26 + $0x70] sm:$0xff]  ;;  %v899_v40 = vld [vmem:[%s7895_s26 + $0x48] sm:$0xff] }
 0x293   :  { %v464_v28 = vsel %vm112_vm5, %v461_v5, %v463_v26  ;;  %v476_v38 = vsel %vm133_vm3, %v474_v34, %v475_v35  ;;  %v903_v26 = vld [vmem:[%s7895_s26 + $0x68] sm:$0xff]  ;;  %v896_v34 = vld [vmem:[%s7895_s26 + $0x30] sm:$0xff] }
 0x294   :  { %v4673_v29 = vpack.c.bf16 %v464_v28, %v462_v27  ;;  %5601 = vmatpush3.bf16.msra.mxu1 %v5920_v24  ;;  %v4700_v42 = vpack.c.bf16 %v478_v41, %v476_v38  ;;  %v895_v35 = vld [vmem:[%s7895_s26 + $0x28] sm:$0xff]  ;;  %v892_v38 = vld [vmem:[%s7895_s26 + $0x10] sm:$0xff] }
 0x295   :  { %5602 = vmatprep.subr.bf16.mxu1 %v6110_v1  ;;  %v891_v41 = vld [vmem:[%s7895_s26 + $0x8] sm:$0xff] }
 0x296   :  { %5593 = vmatmul.mubr.msk.bf16.vlgmr.msra.gmra.mxu0 %vm4672_vm8, %v4673_v29  ;;  %v902_v29 = vld [vmem:[%s7895_s26 + $0x60] sm:$0xff] }
 0x297   :  { %5617 = vmatpush3.msra.mxu0 %v905_v22 }
 0x298   :  { %5603 = vmatpush3.bf16.msra.mxu1 %v5921_v30  ;;  %5618 = vmatprep.subr.mxu0 %v904_v23  ;;  %v901_v30 = vld [vmem:[%s7895_s26 + $0x58] sm:$0xff] }
 0x299   :  { %5604 = vmatprep.subr.bf16.mxu1 %v6110_v1  ;;  %5619 = vmatpush3.msra.mxu0 %v904_v23 }
 0x29a   :  { %5620 = vmatprep.subr.mxu0 %v903_v26 }
 0x29b   :  { %5621 = vmatpush3.msra.mxu0 %v903_v26  ;;  %v998_v26 = vld [vmem:[%s7857_s15 + $0x8] sm:$0xff] }
 0x29c   :  { %5605 = vmatpush3.bf16.msra.mxu1 %v5922_v31  ;;  %5622 = vmatprep.subr.mxu0 %v902_v29 }
 0x29d   :  { %5606 = vmatprep.subr.bf16.mxu1 %v6110_v1  ;;  %5623 = vmatpush3.msra.mxu0 %v902_v29  ;;  %v1129_v29 = vld [vmem:[%s7858_s16 + $0xf0] sm:$0xff] }
 0x29e   :  { %5624 = vmatprep.subr.mxu0 %v901_v30 }
 0x29f   :  { %5625 = vmatpush3.msra.mxu0 %v901_v30  ;;  %v1128_v30 = vld [vmem:[%s7858_s16 + $0xe8] sm:$0xff] }
 0x2a0   :  { %5607 = vmatpush3.bf16.msra.mxu1 %v5923_v39  ;;  %v900_v39 = vld [vmem:[%s7895_s26 + $0x50] sm:$0xff] }
 0x2a1   :  { %5608 = vmatprep.subr.bf16.mxu1 %v6110_v1  ;;  %5626 = vmatprep.subr.mxu0 %v900_v39 }
 0x2a2   :  { %5627 = vmatpush3.msra.mxu0 %v900_v39  ;;  %v1000_v39 = vld [vmem:[%s7857_s15 + $0x18] sm:$0xff] }
 0x2a3   :  { %5628 = vmatprep.subr.mxu0 %v899_v40 }
 0x2a4   :  { %5609 = vmatpush3.bf16.msra.mxu1 %v5924_v32  ;;  %v898_v32 = vld [vmem:[%s7895_s26 + $0x40] sm:$0xff]  ;;  %5629 = vmatpush3.msra.mxu0 %v899_v40  ;;  %v1126_v40 = vld [vmem:[%s7858_s16 + $0xd8] sm:$0xff] }
 0x2a5   :  { %5610 = vmatprep.subr.bf16.mxu1 %v6110_v1  ;;  %5630 = vmatprep.subr.mxu0 %v898_v32 }
 0x2a6   :  { %5631 = vmatpush3.msra.mxu0 %v898_v32  ;;  %v1125_v32 = vld [vmem:[%s7858_s16 + $0xd0] sm:$0xff] }
 0x2a7   :  { %5632 = vmatprep.subr.mxu0 %v897_v33 }
 0x2a8   :  { %5611 = vmatpush3.bf16.msra.mxu1 %v5925_v36  ;;  %5633 = vmatpush3.msra.mxu0 %v897_v33  ;;  %v894_v36 = vld [vmem:[%s7895_s26 + $0x20] sm:$0xff]  ;;  %v1124_v33 = vld [vmem:[%s7858_s16 + $0xc8] sm:$0xff] }
 0x2a9   :  { %5634 = vmatprep.subr.mxu0 %v896_v34 }
 0x2aa   :  { %5635 = vmatpush3.msra.mxu0 %v896_v34  ;;  %v1123_v34 = vld [vmem:[%s7858_s16 + $0xc0] sm:$0xff] }
 0x2ab   :  { %5613 = vmatmul.mubr.msk.bf16.vlgmr.msra.gmra.mxu1 %vm4699_vm9, %v4700_v42  ;;  %5636 = vmatprep.subr.mxu0 %v895_v35  ;;  %v890_v42 = vld [vmem:[%s7895_s26] sm:$0xff] }
 0x2ac   :  { %5637 = vmatpush3.msra.mxu0 %v895_v35  ;;  %v1122_v35 = vld [vmem:[%s7858_s16 + $0xb8] sm:$0xff] }
 0x2ad   :  { %5638 = vmatprep.subr.mxu0 %v894_v36 }
 0x2ae   :  { %5639 = vmatpush3.msra.mxu0 %v894_v36  ;;  %v6613_v36 = vld [vmem:[#allocation2] sm:$0xff] }
 0x2af   :  { %5640 = vmatprep.subr.mxu0 %v893_v37 }
 0x2b0   :  { %5641 = vmatpush3.msra.mxu0 %v893_v37  ;;  %v1121_v37 = vld [vmem:[%s7858_s16 + $0xb0] sm:$0xff] }
 0x2b1   :  { %5642 = vmatprep.subr.mxu0 %v892_v38 }
 0x2b2   :  { %5643 = vmatpush3.msra.mxu0 %v892_v38  ;;  %v1120_v38 = vld [vmem:[%s7858_s16 + $0xa8] sm:$0xff] }
 0x2b3   :  { %5644 = vmatprep.subr.mxu0 %v891_v41 }
 0x2b4   :  { %5645 = vmatpush3.msra.mxu0 %v891_v41  ;;  %v1119_v41 = vld [vmem:[%s7858_s16 + $0xa0] sm:$0xff] }
 0x2b5   :  { %5646 = vmatprep.subr.mxu0 %v890_v42 }
 0x2b6   :  { %5647 = vmatpush3.msra.mxu0 %v890_v42  ;;  %v1118_v42 = vld [vmem:[%s7858_s16 + $0x98] sm:$0xff] }
 0x34b   :  { %v600_v43 = vpop.f32.mrf.mxu1 }
 0x34d   :  { %v5574_v44 = vpop.f32.mrf.mxu1 }
 0x34f   :  { %v603_v45 = vpop.f32.mrf.mxu1 }
 0x351   :  { %v5575_v46 = vpop.f32.mrf.mxu1 }
 0x356   :  { %v689_v47 = vpop.f32.mrf.mxu0 }
 0x357   :  { %v690_v51 = vadd.f32 %v689_v47, %v600_v43 }
 0x358   :  { %v5594_v48 = vpop.f32.mrf.mxu0 }
 0x35a   :  { %v692_v49 = vpop.f32.mrf.mxu0 }
 0x35b   :  { %v693_v54 = vadd.f32 %v692_v49, %v603_v45 }
 0x35c   :  { %v5595_v1 = vpop.f32.mrf.mxu0 }
 0x36b   :  { %v796_v19 = vpop.f32.mrf.mxu1 }
 0x36c   :  { %v803_v52 = vadd.f32 %v796_v19, %v690_v51 }
 0x36d   :  { %v5614_v53 = vpop.f32.mrf.mxu1 }
 0x36e   :  { %v6494_v58 = vadd.f32 %v809_v25, %v803_v52  ;;  %v860_v52 = vrot.slane %v6490_v50, 1 }
 0x36f   :  { %v799_v56 = vpop.f32.mrf.mxu1 }
 0x370   :  { %v804_v59 = vadd.f32 %v799_v56, %v693_v54  ;;  %v829_v62 = vmul.f32 %v6494_v58, %v6494_v58  ;;  %v872_v56 = vrot.slane %v6490_v50, %v6434_v0 }
 0x371   :  { %v5615_v60 = vpop.f32.mrf.mxu1 }
 0x372   :  { %v6496_v61 = vadd.f32 %v809_v25, %v804_v59 }
 0x374   :  { %v812_v63 = vadd.f32 %v6496_v61, %v6494_v58  ;;  %v830_v3 = vmul.f32 %v6496_v61, %v6496_v61 }
 0x376   :  { %v813_v6 = vrot.slane %v812_v63, 4  ;;  %v831_v7 = vadd.f32 %v830_v3, %v829_v62 }
 0x378   :  { %v814_v8 = vadd.f32 %v813_v6, %v812_v63  ;;  %v832_v10 = vrot.slane %v831_v7, 4  ;;  %v877_v6 = vld [vmem:[%s7856_s1] sm:$0x3] }
 0x379   :  { %v881_v50 = vrot.slane %v877_v6, %v6344_v55 }
 0x37a   :  { %v815_v11 = vrot.slane %v814_v8, 2  ;;  %v833_v12 = vadd.f32 %v832_v10, %v831_v7  ;;  %v884_v10 = vsub.s32 1, %v6249_v4 }
 0x37c   :  { %v816_v13 = vadd.f32 %v815_v11, %v814_v8  ;;  %v834_v14 = vrot.slane %v833_v12, 2 }
 0x37e   :  { %v817_v15 = vrot.slane %v816_v13, 1  ;;  %v835_v16 = vadd.f32 %v834_v14, %v833_v12  ;;  %v885_v14 = vrot.slane %v877_v6, %v884_v10  ;;  %v5927_v6 = vld [vmem:[%s7859_s6 + $0xb8] sm:$0xff]   ;;  %v5930_v10 = vld [vmem:[%s7859_s6 + $0xb0] sm:$0xff]  }
 0x380   :  { %v818_v17 = vadd.f32 %v817_v15, %v816_v13  ;;  %v836_v18 = vrot.slane %v835_v16, 1 }
 0x382   :  { %819 = vrot.lane.b32.xlu0 %v818_v17, %s6112_s4  ;;  %v837_v20 = vadd.f32 %v836_v18, %v835_v16  ;;  %v997_v16 = vld [vmem:[%s7857_s15] sm:$0xff] }
 0x383   :  { %5658 = vmatprep.mubr.msk.f32.mxu1 %vm1001_vm10, %v997_v16 }
 0x384   :  { %838 = vrot.lane.b32.xlu1 %v837_v20, %s6112_s4 }
 0x3f4   :  { %v820_v21 = vpop.permute.xlu0 %819 }
 0x3f5   :  { %v821_v57 = vadd.f32 %v820_v21, %v818_v17 }
 0x3f6   :  { %v839_v2 = vpop.permute.xlu1 %838 }
 0x3f7   :  { %v840_v5 = vadd.f32 %v839_v2, %v837_v20  ;;  %822 = vrot.lane.b32.xlu0 %v821_v57, %s6113_s28 }
 0x3f9   :  { %841 = vrot.lane.b32.xlu1 %v840_v5, %s6113_s28 }
 0x469   :  { %v823_v24 = vpop.permute.xlu0 %822 }
 0x46a   :  { %v824_v27 = vadd.f32 %v823_v24, %v821_v57 }
 0x46b   :  { %v842_v28 = vpop.permute.xlu1 %841 }
 0x46c   :  { %v843_v31 = vadd.f32 %v842_v28, %v840_v5  ;;  %825 = vrot.lane.b32.xlu0 %v824_v27, %s6114_s22  ;;  %v999_v28 = vld [vmem:[%s7857_s15 + $0x10] sm:$0xff] }
 0x46e   :  { %844 = vrot.lane.b32.xlu1 %v843_v31, %s6114_s22 }
 0x4de   :  { %v826_v43 = vpop.permute.xlu0 %825 }
 0x4df   :  { %v827_v44 = vadd.f32 %v826_v43, %v824_v27  ;;  %v1130_v27 = vld [vmem:[%s7858_s16 + $0xf8] sm:$0xff]  ;;  %v1117_v43 = vld [vmem:[%s7858_s16 + $0x90] sm:$0xff] }
 0x4e0   :  { %v845_v45 = vpop.permute.xlu1 %844 }
 0x4e1   :  { %v828_v46 = vmul.f32 0.0078125, %v827_v44  ;;  %v846_v47 = vadd.f32 %v845_v45, %v843_v31  ;;  %v1127_v31 = vld [vmem:[%s7858_s16 + $0xe0] sm:$0xff]  ;;  %v1116_v44 = vld [vmem:[%s7858_s16 + $0x88] sm:$0xff] }
 0x4e2   :  { %v1115_v45 = vld [vmem:[%s7858_s16 + $0x80] sm:$0xff] }
 0x4e3   :  { %v848_v48 = vmul.f32 %v828_v46, %v828_v46  ;;  %v847_v49 = vmul.f32 0.0078125, %v846_v47  ;;  %v854_v25 = vrot.slane %v828_v46, %v6344_v55  ;;  %v1114_v46 = vld [vmem:[%s7858_s16 + $0x78] sm:$0xff]  ;;  %v1113_v47 = vld [vmem:[%s7858_s16 + $0x70] sm:$0xff] }
 0x4e5   :  { %v849_v1 = vsub.f32 %v847_v49, %v848_v48  ;;  %v855_v59 = vsub.f32 %v6494_v58, %v854_v25  ;;  %v856_v60 = vsub.f32 %v6496_v61, %v854_v25  ;;  %v1112_v48 = vld [vmem:[%s7858_s16 + $0x68] sm:$0xff]  ;;  %v1111_v49 = vld [vmem:[%s7858_s16 + $0x60] sm:$0xff]  ;;  %v1106_v25 = vld [vmem:[%s7858_s16 + $0x38] sm:$0xff] }
 0x4e7   :  { %v850_v51 = vmax.f32 %v849_v1, 0.0  ;;  %v1110_v1 = vld [vmem:[%s7858_s16 + $0x58] sm:$0xff] }
 0x4e9   :  { %v857_v19 = vadd.f32 1e-05, %v850_v51  ;;  %v1109_v51 = vld [vmem:[%s7858_s16 + $0x50] sm:$0xff] }
 0x4eb   :  { %6072 = vrsqrt.f32 %v857_v19  ;;  %v1108_v19 = vld [vmem:[%s7858_s16 + $0x48] sm:$0xff] }
 0x4f8   :  { %v6073_v53 = vpop.eup %6072 }
 0x4f9   :  { %v862_v54 = vmul.f32 %v6073_v53, %v860_v52  ;;  %v1107_v52 = vld [vmem:[%s7858_s16 + $0x40] sm:$0xff]  ;;  %v1105_v53 = vld [vmem:[%s7858_s16 + $0x30] sm:$0xff] }
 0x4fb   :  { %v866_v62 = vrot.slane %v862_v54, %v6344_v55  ;;  %v1104_v54 = vld [vmem:[%s7858_s16 + $0x28] sm:$0xff] }
 0x4fd   :  { %v867_v63 = vmul.f32 %v866_v62, %v855_v59  ;;  %v868_v3 = vmul.f32 %v866_v62, %v856_v60  ;;  %v1102_v59 = vld [vmem:[%s7858_s16 + $0x18] sm:$0xff]  ;;  %v1101_v60 = vld [vmem:[%s7858_s16 + $0x10] sm:$0xff]  ;;  %v1100_v62 = vld [vmem:[%s7858_s16 + $0x8] sm:$0xff] }
 0x4ff   :  { %v873_v7 = vadd.f32 %v872_v56, %v867_v63  ;;  %v874_v8 = vadd.f32 %v872_v56, %v868_v3  ;;  %v1103_v56 = vld [vmem:[%s7858_s16 + $0x20] sm:$0xff]  ;;  %v5926_v3 = vld [vmem:[%s7859_s6 + $0xf8] sm:$0xff]  }
 0x500   :  { %v1099_v63 = vld [vmem:[%s7858_s16] sm:$0xff]  ;;  %5202 = vmatprep.subr.bf16.mxu0 %v5926_v3 }
 0x501   :  { %v875_v11 = vmax.f32 %v873_v7, 0.0  ;;  %v876_v12 = vmax.f32 %v874_v8, 0.0  ;;  %v5928_v7 = vld [vmem:[%s7859_s6 + $0xf0] sm:$0xff]   ;;  %v5929_v8 = vld [vmem:[%s7859_s6 + $0x78] sm:$0xff]  }
 0x503   :  { %v886_v13 = vmul.f32 %v875_v11, %v875_v11  ;;  %v887_v58 = vmul.f32 %v876_v12, %v876_v12  ;;  %v888_v61 = vmul.f32 %v881_v50, %v875_v11  ;;  %v889_v15 = vmul.f32 %v885_v14, %v876_v12  ;;  %v5936_v50 = vld [vmem:[%s7859_s6 + $0xe0] sm:$0xff]   ;;  %v5931_v14 = vld [vmem:[%s7859_s6 + $0x38] sm:$0xff]  }
 0x505   :  { %5648 = vmatprep.mubr.f32.mxu0 %v886_v13  ;;  %v5938_v13 = vld [vmem:[%s7859_s6 + $0xa0] sm:$0xff]  }
 0x506   :  { %5649 = vmatmul.mubr.f32.vlgmr.msra.gmra.mxu0 %v887_v58 }
 0x507   :  { %5651 = vmatprep.mubr.f32.mxu0 %v888_v61  ;;  %5203 = vmatpush3.bf16.msra.mxu0 %v5927_v6  ;;  %v5933_v61 = vld [vmem:[%s7859_s6 + $0x70] sm:$0xff]  }
 0x508   :  { %5204 = vmatprep.subr.bf16.mxu0 %v5928_v7 }
 0x50a   :  { %5652 = vmatmul.mubr.f32.gmra.mxu0 %v889_v15 }
 0x50b   :  { %5205 = vmatpush3.bf16.msra.mxu0 %v5930_v10 }
 0x5c6   :  { %v5650_v17 = vpop.f32.mrf.mxu0 }
 0x5c7   :  { %6074 = vrsqrt.f32 %v5650_v17  ;;  %v5935_v17 = vld [vmem:[%s7859_s6 + $0x30] sm:$0xff]  }
 0x5c8   :  { %v972_v18 = vpop.f32.mrf.mxu0 }
 0x5c9   :  { %6076 = vrsqrt.f32 %v972_v18  ;;  %v5937_v18 = vld [vmem:[%s7859_s6 + $0x68] sm:$0xff]  }
 0x5ca   :  { %v5653_v20 = vpop.f32.mrf.mxu0 }
 0x5cc   :  { %v982_v5 = vpop.f32.mrf.mxu0 }
 0x5d4   :  { %v6075_v21 = vpop.eup %6074 }
 0x5d5   :  { %v994_v57 = vmul.f32 %v6075_v21, %v5653_v20  ;;  %v5939_v21 = vld [vmem:[%s7859_s6 + $0x28] sm:$0xff]  }
 0x5d6   :  { %v6077_v2 = vpop.eup %6076 }
 0x5d7   :  { %v996_v22 = vmul.f32 %v994_v57, %v876_v12  ;;  %v993_v23 = vmul.f32 %v6077_v2, %v982_v5  ;;  %v5934_v12 = vld [vmem:[%s7859_s6 + $0xa8] sm:$0xff]   ;;  %v5940_v57 = vld [vmem:[%s7859_s6 + $0xd8] sm:$0xff]   ;;  %v5941_v2 = vld [vmem:[%s7859_s6 + $0x60] sm:$0xff]  }
 0x5d8   :  { %v5942_v5 = vld [vmem:[%s7859_s6 + $0x98] sm:$0xff]  }
 0x5d9   :  { %v995_v24 = vmul.f32 %v993_v23, %v875_v11  ;;  %5654 = vmatprep.subr.mxu1 %v996_v22  ;;  %v5932_v11 = vld [vmem:[%s7859_s6 + $0xe8] sm:$0xff]   ;;  %v5944_v23 = vld [vmem:[%s7859_s6 + $0xd0] sm:$0xff]  }
 0x5da   :  { %5655 = vmatpush3.msra.mxu1 %v996_v22  ;;  %5206 = vmatprep.subr.bf16.mxu0 %v5932_v11  ;;  %v5943_v22 = vld [vmem:[%s7859_s6 + $0x20] sm:$0xff]   ;;  %v5961_v11 = vld [vmem:[%s7859_s6 + $0x130] sm:$0xff]  }
 0x5db   :  { %5656 = vmatprep.subr.mxu1 %v995_v24  ;;  %5207 = vmatpush3.bf16.msra.mxu0 %v5934_v12 }
 0x5dc   :  { %5657 = vmatpush3.msra.mxu1 %v995_v24  ;;  %5208 = vmatprep.subr.bf16.mxu0 %v5936_v50  ;;  %v5945_v24 = vld [vmem:[%s7859_s6 + $0x58] sm:$0xff]  }
 0x5dd   :  { %5659 = vmatmul.mubr.msk.f32.vlgmr.msra.gmra.mxu1 %vm1001_vm10, %v998_v26  ;;  %1131 = vmatprep.subr.mxu1 %v1130_v27  ;;  %v5946_v26 = vld [vmem:[%s7859_s6 + $0x90] sm:$0xff]   ;;  %v5947_v27 = vld [vmem:[%s7859_s6 + $0x18] sm:$0xff]  }
 0x5de   :  { %5661 = vmatprep.mubr.msk.f32.mxu1 %vm1001_vm10, %v999_v28  ;;  %1132 = vmatpush1.msra.mxu1 %v1129_v29  ;;  %v5948_v28 = vld [vmem:[%s7859_s6 + $0xc8] sm:$0xff]   ;;  %v5949_v29 = vld [vmem:[%s7859_s6 + $0x50] sm:$0xff]  }
 0x5df   :  { %1133 = vmatprep.subr.mxu1 %v1128_v30  ;;  %5209 = vmatpush3.bf16.msra.mxu0 %v5938_v13  ;;  %v5950_v30 = vld [vmem:[%s7859_s6 + $0x88] sm:$0xff]  }
 0x5e0   :  { %1134 = vmatpush1.msra.mxu1 %v1127_v31  ;;  %5210 = vmatprep.subr.bf16.mxu0 %v5940_v57  ;;  %v5951_v31 = vld [vmem:[%s7859_s6 + $0x10] sm:$0xff]   ;;  %v5964_v57 = vld [vmem:[%s7859_s6 + $0x160] sm:$0xff]  }
 0x5e1   :  { %5662 = vmatmul.mubr.msk.f32.gmra.mxu1 %vm1001_vm10, %v1000_v39  ;;  %1135 = vmatprep.subr.mxu1 %v1126_v40  ;;  %v5952_v39 = vld [vmem:[%s7859_s6 + $0xc0] sm:$0xff]   ;;  %v5953_v40 = vld [vmem:[%s7859_s6 + $0x48] sm:$0xff]  }
 0x5e2   :  { %1136 = vmatpush1.msra.mxu1 %v1125_v32  ;;  %1195 = vmatprep.mubr.f32.mxu1 %v6613_v36  ;;  %v5954_v32 = vld [vmem:[%s7859_s6 + $0x80] sm:$0xff]  }
 0x5e3   :  { %1137 = vmatprep.subr.mxu1 %v1124_v33  ;;  %5211 = vmatpush3.bf16.msra.mxu0 %v5942_v5  ;;  %v5955_v33 = vld [vmem:[%s7859_s6 + $0x8] sm:$0xff]  }
 0x5e4   :  { %1138 = vmatpush1.msra.mxu1 %v1123_v34  ;;  %5212 = vmatprep.subr.bf16.mxu0 %v5944_v23  ;;  %v5956_v34 = vld [vmem:[%s7859_s6 + $0x40] sm:$0xff]  }
 0x5e5   :  { %1139 = vmatprep.subr.mxu1 %v1122_v35  ;;  %v5957_v35 = vld [vmem:[%s7859_s6 + $0x178] sm:$0xff]  }
 0x5e6   :  { %1140 = vmatpush1.msra.mxu1 %v1121_v37 }
 0x5e7   :  { %1141 = vmatprep.subr.mxu1 %v1120_v38  ;;  %5213 = vmatpush3.bf16.msra.mxu0 %v5946_v26 }
 0x5e8   :  { %1142 = vmatpush1.msra.mxu1 %v1119_v41  ;;  %5214 = vmatprep.subr.bf16.mxu0 %v5948_v28  ;;  %v1230_v41 = vand.u32 15, %v6249_v4 }
 0x5e9   :  { %1143 = vmatprep.subr.mxu1 %v1118_v42  ;;  %v1247_v42 = vld [vmem:[#allocation2 + $0x8] sm:$0x80] }
 0x5ea   :  { %1144 = vmatpush1.msra.mxu1 %v1117_v43  ;;  %v1246_v43 = vld [vmem:[#allocation2] sm:$0x80]  ;;  %vm1242_vm11 = vcmp.ge.s32.totalorder %v1230_v41, 1  ;;  %v5970_v41 = vld [vmem:[%s7859_s6 + $0x148] sm:$0xff]  }
 0x5eb   :  { %1145 = vmatprep.subr.mxu1 %v1116_v44  ;;  %5215 = vmatpush3.bf16.msra.mxu0 %v5950_v30  ;;  %vm6812_vm13 = vmpackc.low %vm6115_vm12, %vm1242_vm11 }
 0x5ec   :  { %1146 = vmatpush1.msra.mxu1 %v1115_v45  ;;  %5216 = vmatprep.subr.bf16.mxu0 %v5952_v39 }
 0x5ed   :  { %1147 = vmatprep.subr.mxu1 %v1114_v46 }
 0x5ee   :  { %1148 = vmatpush1.msra.mxu1 %v1113_v47  ;;  %v1271_v47 = vrot.slane %v1247_v42, 7  ;;  %v6898_v42 = vadd.s32 24, %v6249_v4 }
 0x5ef   :  { %1149 = vmatprep.subr.mxu1 %v1112_v48  ;;  %5217 = vmatpush3.bf16.msra.mxu0 %v5954_v32 }
 0x5f0   :  { %1150 = vmatpush1.msra.mxu1 %v1111_v49  ;;  %5258 = vmatprep.subr.bf16.mxu0 %v5957_v35 }
 0x5f1   :  { %1151 = vmatprep.subr.mxu1 %v1110_v1  ;;  %v1268_v1 = vrot.slane %v1246_v43, 7 }
 0x5f2   :  { %1152 = vmatpush1.msra.mxu1 %v1109_v51 }
 0x5f3   :  { %1153 = vmatprep.subr.mxu1 %v1108_v19 }
 0x5f4   :  { %1154 = vmatpush1.msra.mxu1 %v1107_v52  ;;  %v5959_v52 = vld [vmem:[%s7859_s6 + $0x138] sm:$0xff]  }
 0x5f5   :  { %1155 = vmatprep.subr.mxu1 %v1106_v25 }
 0x5f6   :  { %1156 = vmatpush1.msra.mxu1 %v1105_v53 }
 0x5f7   :  { %1157 = vmatprep.subr.mxu1 %v1104_v54 }
 0x5f8   :  { %1158 = vmatpush1.msra.mxu1 %v1103_v56  ;;  %v5960_v56 = vld [vmem:[%s7859_s6 + $0x170] sm:$0xff]  }
 0x5f9   :  { %1159 = vmatprep.subr.mxu1 %v1102_v59 }
 0x5fa   :  { %1160 = vmatpush1.msra.mxu1 %v1101_v60 }
 0x5fb   :  { %1161 = vmatprep.subr.mxu1 %v1100_v62 }
 0x5fc   :  { %1162 = vmatpush1.msra.mxu1 %v1099_v63  ;;  %v1231_v63 = vand.u32 15, %v6267_v9 }
 0x5fd   :  { %5230 = vmatprep.subr.bf16.mxu1 %v5929_v8 }
 0x5fe   :  { %vm1303_vm14 = vcmp.lt.s32.totalorder %v1231_v63, 15 }
 0x5ff   :  { %vm6851_vm15 = vmpackc.low %vm1303_vm14, %vm6115_vm12 }
 0x69d   :  { %v5660_v58 = vpop.f32.mrf.mxu1 }
 0x69f   :  { %v1080_v15 = vpop.f32.mrf.mxu1 }
 0x6a0   :  { %1196 = vmatmul.mubr.f32.vlgmr.msra.gmra.mxu1 %v1080_v15 }
 0x6a1   :  { %1201 = vmatprep.mubr.f32.mxu1 %v6613_v36  ;;  %v5663_v16 = vpop.f32.mrf.mxu1  ;;  %5231 = vmatpush3.bf16.msra.mxu1 %v5931_v14 }
 0x6a2   :  { %5232 = vmatprep.subr.bf16.mxu1 %v5933_v61 }
 0x6a3   :  { %v1090_v20 = vpop.f32.mrf.mxu1 }
 0x6a4   :  { %1202 = vmatmul.mubr.f32.gmra.mxu1 %v5660_v58  ;;  %v5962_v58 = vld [vmem:[%s7859_s6 + $0x168] sm:$0xff]  }
 0x6a5   :  { %1207 = vmatprep.mubr.f32.mxu1 %v6613_v36  ;;  %5233 = vmatpush3.bf16.msra.mxu1 %v5935_v17  ;;  %v1228_v17 = vadd.s32 16, %v6249_v4 }
 0x6a6   :  { %5234 = vmatprep.subr.bf16.mxu1 %v5937_v18 }
 0x6a7   :  { %v1232_v5 = vand.u32 15, %v1228_v17 }
 0x6a8   :  { %1208 = vmatmul.mubr.f32.gmra.mxu1 %v1090_v20  ;;  %v5963_v20 = vld [vmem:[%s7859_s6 + $0x128] sm:$0xff]  }
 0x6a9   :  { %1213 = vmatprep.mubr.f32.mxu1 %v6613_v36  ;;  %5235 = vmatpush3.bf16.msra.mxu1 %v5939_v21  ;;  %v5958_v36 = vld [vmem:[%s7859_s6] sm:$0xff]   ;;  %vm1244_vm0 = vcmp.ge.s32.totalorder %v1232_v5, 1  ;;  %v5996_v21 = vld [vmem:[%s7861_s8 + $0x88] sm:$0xff]  }
 0x6aa   :  { %5236 = vmatprep.subr.bf16.mxu1 %v5941_v2  ;;  %vm6880_vm2 = vmpackc.low %vm6115_vm12, %vm1244_vm0 }
 0x6ac   :  { %1214 = vmatmul.mubr.f32.gmra.mxu1 %v5663_v16 }
 0x6ad   :  { %5237 = vmatpush3.bf16.msra.mxu1 %v5943_v22  ;;  %v5965_v22 = vld [vmem:[%s7859_s6 + $0x120] sm:$0xff]  }
 0x6ae   :  { %5238 = vmatprep.subr.bf16.mxu1 %v5945_v24  ;;  %v5966_v24 = vld [vmem:[%s7859_s6 + $0x158] sm:$0xff]  }
 0x6b1   :  { %5239 = vmatpush3.bf16.msra.mxu1 %v5947_v27 }
 0x6b2   :  { %5240 = vmatprep.subr.bf16.mxu1 %v5949_v29 }
 0x6b5   :  { %5241 = vmatpush3.bf16.msra.mxu1 %v5951_v31  ;;  %v5967_v31 = vld [vmem:[%s7859_s6 + $0x118] sm:$0xff]  }
 0x6b6   :  { %5242 = vmatprep.subr.bf16.mxu1 %v5953_v40  ;;  %v5968_v40 = vld [vmem:[%s7859_s6 + $0x150] sm:$0xff]  }
 0x6b9   :  { %5243 = vmatpush3.bf16.msra.mxu1 %v5955_v33 }
 0x6ba   :  { %5244 = vmatprep.subr.bf16.mxu1 %v5956_v34  ;;  %v5997_v34 = vld [vmem:[%s7861_s8 + $0x80] sm:$0xff]  }
 0x6bd   :  { %5245 = vmatpush3.bf16.msra.mxu1 %v5958_v36 }
 0x760   :  { %v1197_v37 = vpop.f32.mrf.mxu1 }
 0x761   :  { %1220 = vst [vmem:[#allocation2 + $0x10] sm:$0xff] %v1197_v37  ;;  %v1269_v49 = vrot.slane %v1197_v37, 7 }
 0x762   :  { %v1199_v38 = vpop.f32.mrf.mxu1 }
 0x763   :  { %1221 = vst [vmem:[#allocation2 + $0x18] sm:$0xff] %v1199_v38  ;;  %v1272_v45 = vrot.slane %v1199_v38, 7  ;;  %v1270_v7 = vsel %vm112_vm5, %v1268_v1, %v1269_v49  ;;  %v1233_v1 = vand.u32 15, %v6898_v42 }
 0x764   :  { %v6788_v44 = vpop.f32.mrf.mxu1 }
 0x765   :  { %v1274_v46 = vrot.slane %v6788_v44, 7  ;;  %v1394_v53 = vpack.c.bf16 %v6788_v44, %v1197_v37  ;;  %v1273_v59 = vsel %vm112_vm5, %v1271_v47, %v1272_v45  ;;  %v5972_v47 = vld [vmem:[%s7859_s6 + $0x140] sm:$0xff]   ;;  %vm1305_vm4 = vcmp.lt.s32.totalorder %v1233_v1, 15 }
 0x766   :  { %v6791_v48 = vpop.f32.mrf.mxu1  ;;  %vm6920_vm6 = vmpackc.low %vm1305_vm4, %vm6115_vm12 }
 0x767   :  { %v1276_v51 = vrot.slane %v6791_v48, 7  ;;  %v1395_v19 = vpack.c.bf16 %v6791_v48, %v1199_v38  ;;  %v1275_v54 = vsel %vm112_vm5, %v1269_v49, %v1274_v46  ;;  %v1328_v9 = vrot.slane %v6791_v48, 1  ;;  %v5969_v38 = vld [vmem:[%s7859_s6 + $0x110] sm:$0xff]  }
 0x768   :  { %v6798_v25 = vpop.f32.mrf.mxu1  ;;  %v4774_v10 = vpack.c.bf16 %v1275_v54, %v1270_v7  ;;  %v1306_v43 = vld [vmem:[#allocation2 + $0x10] sm:$0xfe] }
 0x769   :  { %1559 = vmatprep.mubr.bf16.mxu0 %v1395_v19  ;;  %v1277_v60 = vsel %vm112_vm5, %v1272_v45, %v1276_v51  ;;  %v1278_v28 = vrot.slane %v6798_v25, 7  ;;  %v5971_v45 = vld [vmem:[%s7859_s6 + $0x108] sm:$0xff]   ;;  %v1330_v48 = vrot.slane %v6798_v25, 1  ;;  %v1324_v49 = vrot.slane %v1306_v43, 1 }
 0x76a   :  { %v6817_v3 = vpop.f32.mrf.mxu1  ;;  %1560 = vmatmul.mubr.bf16.vlgmr.msra.gmra.mxu0 %v1394_v53  ;;  %v4771_v6 = vpack.c.bf16 %v1277_v60, %v1273_v59  ;;  %v1307_v8 = vld [vmem:[#allocation2 + $0x18] sm:$0xfe]  ;;  %v5973_v53 = vld [vmem:[%s7859_s6 + $0x100] sm:$0xff]   ;;  %v1308_v60 = vld [vmem:[#allocation2 + $0x50] sm:$0x1] }
 0x76b   :  { %5259 = vmatpush3.bf16.msra.mxu0 %v5959_v52  ;;  %v1332_v12 = vrot.slane %v6817_v3, 1  ;;  %v1327_v50 = vrot.slane %v1307_v8, 1  ;;  %v1280_v26 = vrot.slane %v6817_v3, 7  ;;  %v1279_v36 = vsel %vm112_vm5, %v1274_v46, %v1278_v28  ;;  %v1309_v46 = vld [vmem:[#allocation2 + $0x58] sm:$0x1] }
 0x76c   :  { %v6824_v13 = vpop.f32.mrf.mxu1  ;;  %4772 = vmatprep.mubr.msk.bf16.mxu1 %vm6812_vm13, %v4771_v6  ;;  %5260 = vmatprep.subr.bf16.mxu0 %v5960_v56  ;;  %v1340_v19 = vrot.slane %v1309_v46, 1  ;;  %v1325_v52 = vrot.slane %v6788_v44, 1  ;;  %v1338_v8 = vrot.slane %v1308_v60, 1 }
 0x76d   :  { %1226 = vst [vmem:[#allocation2 + $0x40] sm:$0xff] %v6824_v13  ;;  %4775 = vmatmul.mubr.msk.bf16.vlgmr.msra.gmra.mxu1 %vm6812_vm13, %v4774_v10  ;;  %v1396_v61 = vpack.c.bf16 %v6824_v13, %v6798_v25  ;;  %v1329_v15 = vsel %vm133_vm3, %v1327_v50, %v1328_v9  ;;  %v1333_v16 = vsel %vm133_vm3, %v1328_v9, %v1332_v12  ;;  %v1334_v6 = vrot.slane %v6824_v13, 1 }
 0x76e   :  { %v6835_v14 = vpop.f32.mrf.mxu1  ;;  %v4831_v2 = vpack.c.bf16 %v1333_v16, %v1329_v15  ;;  %v1281_v32 = vsel %vm112_vm5, %v1276_v51, %v1280_v26  ;;  %v1331_v54 = vsel %vm133_vm3, %v1325_v52, %v1330_v48  ;;  %v1326_v56 = vsel %vm133_vm3, %v1324_v49, %v1325_v52 }
 0x76f   :  { %1227 = vst [vmem:[#allocation2 + $0x48] sm:$0xff] %v6835_v14  ;;  %5261 = vmatpush3.bf16.msra.mxu0 %v5961_v11  ;;  %v1397_v18 = vpack.c.bf16 %v6835_v14, %v6817_v3  ;;  %v1336_v51 = vrot.slane %v6835_v14, 1  ;;  %v4834_v44 = vpack.c.bf16 %v1331_v54, %v1326_v56  ;;  %v1335_v3 = vsel %vm133_vm3, %v1330_v48, %v1334_v6 }
 0x770   :  { %5262 = vmatprep.subr.bf16.mxu0 %v5962_v58  ;;  %v1339_v10 = vsel %vm133_vm3, %v1334_v6, %v1338_v8 }
 0x771   :  { %1567 = vmatprep.mubr.bf16.mxu0 %v1397_v18  ;;  %v1337_v25 = vsel %vm133_vm3, %v1332_v12, %v1336_v51  ;;  %v1341_v59 = vsel %vm133_vm3, %v1336_v51, %v1340_v19  ;;  %v4840_v11 = vpack.c.bf16 %v1339_v10, %v1335_v3 }
 0x772   :  { %1568 = vmatmul.mubr.bf16.gmra.mxu0 %v1396_v61  ;;  %v4837_v7 = vpack.c.bf16 %v1341_v59, %v1337_v25 }
 0x773   :  { %5263 = vmatpush3.bf16.msra.mxu0 %v5963_v20  ;;  %4832 = vmatprep.mubr.msk.bf16.mxu0 %vm6851_vm15, %v4831_v2 }
 0x774   :  { %v1248_v23 = vld [vmem:[#allocation2 + $0x40] sm:$0x7f]  ;;  %5264 = vmatprep.subr.bf16.mxu0 %v5964_v57 }
 0x775   :  { %v1282_v27 = vrot.slane %v1248_v23, 7 }
 0x776   :  { %v1249_v29 = vld [vmem:[#allocation2 + $0x48] sm:$0x7f] }
 0x777   :  { %v1284_v30 = vrot.slane %v1249_v29, 7  ;;  %5265 = vmatpush3.bf16.msra.mxu0 %v5965_v22  ;;  %v1283_v39 = vsel %vm112_vm5, %v1278_v28, %v1282_v27 }
 0x778   :  { %5266 = vmatprep.subr.bf16.mxu0 %v5966_v24  ;;  %v4780_v37 = vpack.c.bf16 %v1283_v39, %v1279_v36 }
 0x779   :  { %v1285_v33 = vsel %vm112_vm5, %v1280_v26, %v1284_v30 }
 0x77a   :  { %v4777_v35 = vpack.c.bf16 %v1285_v33, %v1281_v32 }
 0x77b   :  { %5267 = vmatpush3.bf16.msra.mxu0 %v5967_v31  ;;  %v6936_v31 = vld [vmem:[%s7860_s7] sm:$0x7]  ;;  %s6116_s7 = smov 8  }
 0x77c   :  { %4778 = vmatprep.mubr.msk.bf16.mxu1 %vm6880_vm2, %v4777_v35  ;;  %5268 = vmatprep.subr.bf16.mxu0 %v5968_v40  ;;  %v1911_v43 = vrot.slane %v6936_v31, %v6344_v55 }
 0x77d   :  { %4781 = vmatmul.mubr.msk.bf16.gmra.mxu1 %vm6880_vm2, %v4780_v37 }
 0x77f   :  { %5269 = vmatpush3.bf16.msra.mxu0 %v5969_v38 }
 0x780   :  { %5270 = vmatprep.subr.bf16.mxu0 %v5970_v41 }
 0x783   :  { %5271 = vmatpush3.bf16.msra.mxu0 %v5971_v45 }
 0x784   :  { %5272 = vmatprep.subr.bf16.mxu0 %v5972_v47 }
 0x787   :  { %5273 = vmatpush3.bf16.msra.mxu0 %v5973_v53 }
 0x78a   :  { %4835 = vmatmul.mubr.msk.bf16.vlgmr.msra.gmra.mxu0 %vm6851_vm15, %v4834_v44 }
 0x78b   :  { %4838 = vmatprep.mubr.msk.bf16.mxu0 %vm6920_vm6, %v4837_v7 }
 0x792   :  { %4841 = vmatmul.mubr.msk.bf16.gmra.mxu0 %vm6920_vm6, %v4840_v11 }
 0x82a   :  { %v5218_v12 = vpop.f32.mrf.mxu0 }
 0x82c   :  { %v5219_v50 = vpop.f32.mrf.mxu0 }
 0x82d   :  { %v5246_v13 = vpop.f32.mrf.mxu1  ;;  %v5220_v28 = vadd.f32 %v5219_v50, %v5218_v12 }
 0x82e   :  { %v5221_v9 = vpop.f32.mrf.mxu0 }
 0x82f   :  { %v5247_v14 = vpop.f32.mrf.mxu1 }
 0x830   :  { %v5222_v58 = vpop.f32.mrf.mxu0  ;;  %v5248_v23 = vadd.f32 %v5247_v14, %v5246_v13 }
 0x831   :  { %v5249_v15 = vpop.f32.mrf.mxu1  ;;  %v5223_v29 = vadd.f32 %v5222_v58, %v5221_v9 }
 0x832   :  { %v5224_v61 = vpop.f32.mrf.mxu0  ;;  %v1707_v40 = vadd.f32 %v5248_v23, %v5220_v28 }
 0x833   :  { %v5250_v17 = vpop.f32.mrf.mxu1 }
 0x834   :  { %v5225_v16 = vpop.f32.mrf.mxu0  ;;  %v5251_v24 = vadd.f32 %v5250_v17, %v5249_v15 }
 0x835   :  { %v5226_v38 = vadd.f32 %v5225_v16, %v5224_v61 }
 0x836   :  { %v5227_v18 = vpop.f32.mrf.mxu0  ;;  %v1710_v32 = vadd.f32 %v5251_v24, %v5223_v29 }
 0x838   :  { %v5228_v57 = vpop.f32.mrf.mxu0 }
 0x839   :  { %v5229_v19 = vadd.f32 %v5228_v57, %v5227_v18 }
 0x83d   :  { %v5252_v20 = vpop.f32.mrf.mxu1 }
 0x83f   :  { %v5253_v2 = vpop.f32.mrf.mxu1 }
 0x840   :  { %v5254_v33 = vadd.f32 %v5253_v2, %v5252_v20 }
 0x841   :  { %v5255_v26 = vpop.f32.mrf.mxu1 }
 0x842   :  { %v1715_v47 = vadd.f32 %v5254_v33, %v5226_v38  ;;  %v5977_v38 = vld [vmem:[%s7861_s8 + $0x68] sm:$0xff]  }
 0x843   :  { %v5256_v36 = vpop.f32.mrf.mxu1 }
 0x844   :  { %v5257_v48 = vadd.f32 %v5256_v36, %v5255_v26 }
 0x846   :  { %v1718_v56 = vadd.f32 %v5257_v48, %v5229_v19  ;;  %v5983_v48 = vld [vmem:[%s7861_s8 + $0x50] sm:$0xff]   ;;  %v5984_v19 = vld [vmem:[%s7861_s8 + $0x18] sm:$0xff]  }
 0x84a   :  { %v5274_v5 = vpop.f32.mrf.mxu0 }
 0x84c   :  { %v5275_v22 = vpop.f32.mrf.mxu0 }
 0x84d   :  { %v5276_v30 = vadd.f32 %v5275_v22, %v5274_v5 }
 0x84e   :  { %v5277_v27 = vpop.f32.mrf.mxu0 }
 0x84f   :  { %v1903_v41 = vadd.f32 %v5276_v30, %v1707_v40  ;;  %v5974_v40 = vld [vmem:[%s7861_s8 + $0x78] sm:$0xff]  }
 0x850   :  { %v5278_v39 = vpop.f32.mrf.mxu0  ;;  %5664 = vmatprep.subr.bf16.mxu1 %v5974_v40 }
 0x851   :  { %v5279_v35 = vadd.f32 %v5278_v39, %v5277_v27  ;;  %v6942_v52 = vadd.f32 %v1911_v43, %v1903_v41  ;;  %5665 = vmatpush3.bf16.msra.mxu1 %v5974_v40  ;;  %v5976_v41 = vld [vmem:[%s7861_s8 + $0x38] sm:$0xff]  }
 0x852   :  { %v5280_v37 = vpop.f32.mrf.mxu0  ;;  %5684 = vmatprep.subr.bf16.mxu0 %v5976_v41 }
 0x853   :  { %v1904_v45 = vadd.f32 %v5279_v35, %v1710_v32  ;;  %v1939_v44 = vmul.f32 %v6942_v52, %v6942_v52  ;;  %v5975_v32 = vld [vmem:[%s7861_s8 + $0x70] sm:$0xff]   ;;  %5685 = vmatpush3.bf16.msra.mxu0 %v5976_v41  ;;  %v5992_v41 = vld [vmem:[%s7861_s8 + $0xa8] sm:$0xff]  }
 0x854   :  { %v5281_v46 = vpop.f32.mrf.mxu0  ;;  %5666 = vmatprep.subr.bf16.mxu1 %v5975_v32 }
 0x855   :  { %v6940_v49 = vadd.f32 %v1911_v43, %v1904_v45  ;;  %v5282_v1 = vadd.f32 %v5281_v46, %v5280_v37  ;;  %5667 = vmatpush3.bf16.msra.mxu1 %v5975_v32  ;;  %v5978_v45 = vld [vmem:[%s7861_s8 + $0x30] sm:$0xff]   ;;  %v5981_v46 = vld [vmem:[%s7861_s8 + $0x58] sm:$0xff]  }
 0x856   :  { %v5283_v51 = vpop.f32.mrf.mxu0  ;;  %5668 = vmatprep.subr.bf16.mxu1 %v5977_v38  ;;  %5686 = vmatprep.subr.bf16.mxu0 %v5978_v45 }
 0x857   :  { %v1905_v53 = vadd.f32 %v5282_v1, %v1715_v47  ;;  %v1940_v25 = vmul.f32 %v6940_v49, %v6940_v49  ;;  %v1916_v6 = vadd.f32 %v6940_v49, %v6942_v52  ;;  %5687 = vmatpush3.bf16.msra.mxu0 %v5978_v45  ;;  %v5980_v47 = vld [vmem:[%s7861_s8 + $0x28] sm:$0xff]   ;;  %v5982_v1 = vld [vmem:[%s7861_s8 + $0x20] sm:$0xff]  }
 0x858   :  { %v5284_v54 = vpop.f32.mrf.mxu0  ;;  %5688 = vmatprep.subr.bf16.mxu0 %v5980_v47 }
 0x859   :  { %v6946_v59 = vadd.f32 %v1911_v43, %v1905_v53  ;;  %v5285_v60 = vadd.f32 %v5284_v54, %v5283_v51  ;;  %v1943_v3 = vadd.f32 %v1940_v25, %v1939_v44  ;;  %5669 = vmatpush3.bf16.msra.mxu1 %v5977_v38  ;;  %v5985_v51 = vld [vmem:[%s7861_s8 + $0x48] sm:$0xff]   ;;  %v5987_v53 = vld [vmem:[%s7861_s8 + $0x40] sm:$0xff]   ;;  %v5986_v54 = vld [vmem:[%s7861_s8 + $0x10] sm:$0xff]  }
 0x85a   :  { %v5990_v25 = vld [vmem:[%s7861_s8 + $0xb8] sm:$0xff]  }
 0x85b   :  { %v1941_v7 = vmul.f32 %v6946_v59, %v6946_v59  ;;  %v1906_v8 = vadd.f32 %v5285_v60, %v1718_v56  ;;  %v1917_v10 = vadd.f32 %v1916_v6, %v6946_v59  ;;  %5689 = vmatpush3.bf16.msra.mxu0 %v5980_v47  ;;  %v5988_v56 = vld [vmem:[%s7861_s8 + $0x8] sm:$0xff]   ;;  %v5989_v60 = vld [vmem:[%s7861_s8] sm:$0xff]  }
 0x85c   :  { %5690 = vmatprep.subr.bf16.mxu0 %v5982_v1 }
 0x85d   :  { %v6955_v11 = vadd.f32 %v1911_v43, %v1906_v8  ;;  %v1944_v12 = vadd.f32 %v1943_v3, %v1941_v7  ;;  %v5979_v43 = vld [vmem:[%s7861_s8 + $0x60] sm:$0xff]  }
 0x85e   :  { %5670 = vmatprep.subr.bf16.mxu1 %v5979_v43 }
 0x85f   :  { %v1918_v50 = vadd.f32 %v1917_v10, %v6955_v11  ;;  %v1942_v9 = vmul.f32 %v6955_v11, %v6955_v11  ;;  %5671 = vmatpush3.bf16.msra.mxu1 %v5979_v43  ;;  %5691 = vmatpush3.bf16.msra.mxu0 %v5982_v1 }
 0x860   :  { %5672 = vmatprep.subr.bf16.mxu1 %v5981_v46  ;;  %5692 = vmatprep.subr.bf16.mxu0 %v5984_v19 }
 0x861   :  { %v1919_v13 = vrot.slane %v1918_v50, 4  ;;  %v1945_v58 = vadd.f32 %v1944_v12, %v1942_v9 }
 0x863   :  { %v1920_v14 = vadd.f32 %v1919_v13, %v1918_v50  ;;  %v1946_v61 = vrot.slane %v1945_v58, 4  ;;  %5673 = vmatpush3.bf16.msra.mxu1 %v5981_v46  ;;  %5693 = vmatpush3.bf16.msra.mxu0 %v5984_v19 }
 0x864   :  { %5674 = vmatprep.subr.bf16.mxu1 %v5983_v48  ;;  %5694 = vmatprep.subr.bf16.mxu0 %v5986_v54 }
 0x865   :  { %v1921_v15 = vrot.slane %v1920_v14, 2  ;;  %v1947_v16 = vadd.f32 %v1946_v61, %v1945_v58  ;;  %v1979_v58 = vrot.slane %v6936_v31, 1 }
 0x867   :  { %v1922_v17 = vadd.f32 %v1921_v15, %v1920_v14  ;;  %v1948_v18 = vrot.slane %v1947_v16, 2  ;;  %5675 = vmatpush3.bf16.msra.mxu1 %v5983_v48  ;;  %5695 = vmatpush3.bf16.msra.mxu0 %v5986_v54 }
 0x868   :  { %5676 = vmatprep.subr.bf16.mxu1 %v5985_v51  ;;  %5696 = vmatprep.subr.bf16.mxu0 %v5988_v56 }
 0x869   :  { %v1923_v20 = vrot.slane %v1922_v17, 1  ;;  %v1949_v57 = vadd.f32 %v1948_v18, %v1947_v16  ;;  %v1993_v16 = vrot.slane %v6936_v31, %v6434_v0 }
 0x86b   :  { %v1924_v2 = vadd.f32 %v1923_v20, %v1922_v17  ;;  %v1950_v5 = vrot.slane %v1949_v57, 1  ;;  %5677 = vmatpush3.bf16.msra.mxu1 %v5985_v51  ;;  %5697 = vmatpush3.bf16.msra.mxu0 %v5988_v56  ;;  %v5993_v56 = vld [vmem:[%s7861_s8 + $0xa0] sm:$0xff]  }
 0x86c   :  { %5678 = vmatprep.subr.bf16.mxu1 %v5987_v53  ;;  %5698 = vmatprep.subr.bf16.mxu0 %v5989_v60 }
 0x86d   :  { %1925 = vrot.lane.b32.xlu0 %v1924_v2, %s6116_s7  ;;  %v1951_v22 = vadd.f32 %v1950_v5, %v1949_v57 }
 0x86f   :  { %1952 = vrot.lane.b32.xlu1 %v1951_v22, %s6116_s7  ;;  %5679 = vmatpush3.bf16.msra.mxu1 %v5987_v53 }
 0x870   :  { %5704 = vmatprep.subr.bf16.mxu1 %v5990_v25  ;;  %5699 = vmatpush3.bf16.msra.mxu0 %v5989_v60 }
 0x8df   :  { %v1926_v23 = vpop.permute.xlu0 %1925 }
 0x8e0   :  { %v1927_v24 = vadd.f32 %v1926_v23, %v1924_v2 }
 0x8e1   :  { %v1953_v26 = vpop.permute.xlu1 %1952 }
 0x8e2   :  { %v1954_v27 = vadd.f32 %v1953_v26, %v1951_v22  ;;  %1928 = vrot.lane.b32.xlu0 %v1927_v24, %s6112_s4  ;;  %v2010_v26 = vld [vmem:[#allocation2] sm:$0x80] }
 0x8e3   :  { %v2017_v31 = vrot.slane %v2010_v26, 7 }
 0x8e4   :  { %1955 = vrot.lane.b32.xlu1 %v1954_v27, %s6112_s4 }
 0x954   :  { %v1929_v28 = vpop.permute.xlu0 %1928 }
 0x955   :  { %v1930_v29 = vadd.f32 %v1929_v28, %v1927_v24 }
 0x956   :  { %v1956_v30 = vpop.permute.xlu1 %1955 }
 0x957   :  { %v1957_v39 = vadd.f32 %v1956_v30, %v1954_v27  ;;  %1931 = vrot.lane.b32.xlu0 %v1930_v29, %s6113_s28 }
 0x959   :  { %1958 = vrot.lane.b32.xlu1 %v1957_v39, %s6113_s28 }
 0x9c9   :  { %v1932_v33 = vpop.permute.xlu0 %1931 }
 0x9ca   :  { %v1933_v35 = vadd.f32 %v1932_v33, %v1930_v29 }
 0x9cb   :  { %v1959_v36 = vpop.permute.xlu1 %1958 }
 0x9cc   :  { %v1960_v37 = vadd.f32 %v1959_v36, %v1957_v39  ;;  %1934 = vrot.lane.b32.xlu0 %v1933_v35, %s6114_s22 }
 0x9ce   :  { %1961 = vrot.lane.b32.xlu1 %v1960_v37, %s6114_s22 }
 0xa3e   :  { %v1935_v44 = vpop.permute.xlu0 %1934 }
 0xa3f   :  { %v1936_v6 = vadd.f32 %v1935_v44, %v1933_v35  ;;  %v5991_v35 = vld [vmem:[%s7861_s8 + $0xb0] sm:$0xff]   ;;  %v5994_v44 = vld [vmem:[%s7861_s8 + $0x98] sm:$0xff]  }
 0xa40   :  { %v1962_v7 = vpop.permute.xlu1 %1961 }
 0xa41   :  { %v1938_v8 = vmul.f32 0.001953125, %v1936_v6  ;;  %v1963_v3 = vadd.f32 %v1962_v7, %v1960_v37  ;;  %v5995_v6 = vld [vmem:[%s7861_s8 + $0x90] sm:$0xff]  }
 0xa42   :  { %v2035_v7 = vld [vmem:[#allocation2 + $0x50] sm:$0x1] }
 0xa43   :  { %v1965_v10 = vmul.f32 %v1938_v8, %v1938_v8  ;;  %v1964_v12 = vmul.f32 0.001953125, %v1963_v3  ;;  %v1971_v14 = vrot.slane %v1938_v8, %v6344_v55  ;;  %v2046_v3 = vrot.slane %v2035_v7, 1 }
 0xa45   :  { %v1966_v50 = vsub.f32 %v1964_v12, %v1965_v10  ;;  %v1972_v17 = vsub.f32 %v6942_v52, %v1971_v14  ;;  %v1973_v18 = vsub.f32 %v6940_v49, %v1971_v14  ;;  %v1974_v20 = vsub.f32 %v6946_v59, %v1971_v14 }
 0xa46   :  { %v1975_v57 = vsub.f32 %v6955_v11, %v1971_v14 }
 0xa47   :  { %v1967_v9 = vmax.f32 %v1966_v50, 0.0 }
 0xa49   :  { %v1976_v13 = vadd.f32 1e-05, %v1967_v9 }
 0xa4b   :  { %6078 = vrsqrt.f32 %v1976_v13 }
 0xa58   :  { %v6079_v61 = vpop.eup %6078 }
 0xa59   :  { %v1981_v15 = vmul.f32 %v6079_v61, %v1979_v58 }
 0xa5b   :  { %v1985_v2 = vrot.slane %v1981_v15, %v6344_v55 }
 0xa5d   :  { %v1986_v5 = vmul.f32 %v1985_v2, %v1972_v17  ;;  %v1987_v22 = vmul.f32 %v1985_v2, %v1973_v18  ;;  %v1988_v23 = vmul.f32 %v1985_v2, %v1974_v20  ;;  %v1989_v24 = vmul.f32 %v1985_v2, %v1975_v57  ;;  %v7068_v57 = vld [vmem:[%s7862_s9] sm:$0x7] }
 0xa5f   :  { %v1994_v27 = vadd.f32 %v1993_v16, %v1986_v5  ;;  %v1995_v28 = vadd.f32 %v1993_v16, %v1987_v22  ;;  %v1996_v29 = vadd.f32 %v1993_v16, %v1988_v23  ;;  %v1997_v30 = vadd.f32 %v1993_v16, %v1989_v24 }
 0xa61   :  { %v1998_v39 = vmax.f32 %v1994_v27, 0.0  ;;  %v1999_v52 = vmax.f32 %v1995_v28, 0.0  ;;  %v2000_v40 = vmax.f32 %v1996_v29, 0.0  ;;  %v2001_v49 = vmax.f32 %v1997_v30, 0.0 }
 0xa62   :  { %v2411_v27 = vrot.slane %v7068_v57, %v6344_v55 }
 0xa63   :  { %2005 = vst [vmem:[#allocation2 + $0x40] sm:$0xff] %v2001_v49  ;;  %2002 = vst [vmem:[#allocation2 + $0x10] sm:$0xff] %v1998_v39  ;;  %v2018_v59 = vrot.slane %v1998_v39, 7  ;;  %v2020_v11 = vrot.slane %v1999_v52, 7  ;;  %v2074_v32 = vpack.c.bf16 %v1999_v52, %v1998_v39  ;;  %v2075_v33 = vpack.c.bf16 %v2001_v49, %v2000_v40 }
 0xa64   :  { %v2040_v43 = vrot.slane %v1999_v52, 1  ;;  %v2022_v45 = vrot.slane %v2000_v40, 7  ;;  %v2042_v46 = vrot.slane %v2000_v40, 1  ;;  %v2044_v8 = vrot.slane %v2001_v49, 1 }
 0xa65   :  { %5680 = vmatprep.mubr.bf16.mxu1 %v2074_v32  ;;  %v2019_v36 = vsel %vm112_vm5, %v2017_v31, %v2018_v59  ;;  %v2021_v37 = vsel %vm112_vm5, %v2018_v59, %v2020_v11 }
 0xa66   :  { %5681 = vmatmul.mubr.bf16.vlgmr.msra.gmra.mxu1 %v2075_v33  ;;  %v4875_v38 = vpack.c.bf16 %v2021_v37, %v2019_v36  ;;  %v2043_v53 = vsel %vm133_vm3, %v2040_v43, %v2042_v46  ;;  %v2023_v62 = vsel %vm112_vm5, %v2020_v11, %v2022_v45  ;;  %v2045_v10 = vsel %vm133_vm3, %v2042_v46, %v2044_v8 }
 0xa67   :  { %5705 = vmatpush3.bf16.msra.mxu1 %v5990_v25  ;;  %v2047_v12 = vsel %vm133_vm3, %v2044_v8, %v2046_v3 }
 0xa68   :  { %5700 = vmatprep.mubr.msk.bf16.mxu0 %vm6812_vm13, %v4875_v38  ;;  %5706 = vmatprep.subr.bf16.mxu1 %v5991_v35  ;;  %v4908_v50 = vpack.c.bf16 %v2047_v12, %v2045_v10 }
 0xa6a   :  { %v2034_v47 = vld [vmem:[#allocation2 + $0x10] sm:$0xfe]  ;;  %v2011_v48 = vld [vmem:[#allocation2 + $0x40] sm:$0x7f] }
 0xa6b   :  { %v2039_v1 = vrot.slane %v2034_v47, 1  ;;  %v2024_v51 = vrot.slane %v2011_v48, 7  ;;  %5707 = vmatpush3.bf16.msra.mxu1 %v5991_v35 }
 0xa6c   :  { %5708 = vmatprep.subr.bf16.mxu1 %v5992_v41 }
 0xa6d   :  { %v2041_v19 = vsel %vm133_vm3, %v2039_v1, %v2040_v43  ;;  %v2025_v54 = vsel %vm112_vm5, %v2022_v45, %v2024_v51 }
 0xa6e   :  { %v4905_v25 = vpack.c.bf16 %v2043_v53, %v2041_v19  ;;  %v4878_v60 = vpack.c.bf16 %v2025_v54, %v2023_v62 }
 0xa6f   :  { %5709 = vmatpush3.bf16.msra.mxu1 %v5992_v41 }
 0xa70   :  { %5720 = vmatprep.mubr.msk.bf16.mxu1 %vm6851_vm15, %v4905_v25  ;;  %5701 = vmatmul.mubr.msk.bf16.vlgmr.msra.gmra.mxu0 %vm6880_vm2, %v4878_v60 }
 0xa71   :  { %5710 = vmatprep.subr.bf16.mxu1 %v5993_v56 }
 0xa73   :  { %5711 = vmatpush3.bf16.msra.mxu1 %v5993_v56 }
 0xa74   :  { %5712 = vmatprep.subr.bf16.mxu1 %v5994_v44 }
 0xa77   :  { %5713 = vmatpush3.bf16.msra.mxu1 %v5994_v44 }
 0xa78   :  { %5714 = vmatprep.subr.bf16.mxu1 %v5995_v6 }
 0xa7b   :  { %5715 = vmatpush3.bf16.msra.mxu1 %v5995_v6 }
 0xa7c   :  { %5716 = vmatprep.subr.bf16.mxu1 %v5996_v21 }
 0xa7f   :  { %5717 = vmatpush3.bf16.msra.mxu1 %v5996_v21 }
 0xa80   :  { %5718 = vmatprep.subr.bf16.mxu1 %v5997_v34 }
 0xa83   :  { %5719 = vmatpush3.bf16.msra.mxu1 %v5997_v34 }
 0xa86   :  { %5721 = vmatmul.mubr.msk.bf16.vlgmr.msra.gmra.mxu1 %vm6920_vm6, %v4908_v50 }
 0xb26   :  { %v5682_v9 = vpop.f32.mrf.mxu1 }
 0xb28   :  { %v2175_v13 = vpop.f32.mrf.mxu1 }
 0xb2a   :  { %v5683_v14 = vpop.f32.mrf.mxu1 }
 0xb2c   :  { %v2178_v15 = vpop.f32.mrf.mxu1 }
 0xb30   :  { %v5702_v58 = vpop.f32.mrf.mxu0 }
 0xb31   :  { %v2281_v5 = vadd.f32 %v5702_v58, %v5682_v9  ;;  %v2501_v9 = vld [vmem:[%s7863_s17] sm:$0xff] }
 0xb32   :  { %v2272_v61 = vpop.f32.mrf.mxu0  ;;  %5732 = vmatprep.mubr.msk.f32.mxu0 %vm2509_vm7, %v2501_v9  ;;  %v2651_v9 = vld [vmem:[%s7864_s18 + $0x60] sm:$0xff] }
 0xb33   :  { %v2273_v18 = vadd.f32 %v2272_v61, %v2175_v13 }
 0xb34   :  { %v5703_v16 = vpop.f32.mrf.mxu0 }
 0xb35   :  { %v2284_v23 = vadd.f32 %v5703_v16, %v5683_v14 }
 0xb36   :  { %v2275_v20 = vpop.f32.mrf.mxu0 }
 0xb37   :  { %v2276_v24 = vadd.f32 %v2275_v20, %v2178_v15 }
 0xb46   :  { %v5722_v17 = vpop.f32.mrf.mxu1 }
 0xb47   :  { %v2405_v26 = vadd.f32 %v5722_v17, %v2281_v5  ;;  %v2478_v5 = vrot.slane %v7068_v57, 1 }
 0xb48   :  { %v2388_v2 = vpop.f32.mrf.mxu1 }
 0xb49   :  { %v2403_v22 = vadd.f32 %v2388_v2, %v2273_v18  ;;  %v7074_v39 = vadd.f32 %v2411_v27, %v2405_v26 }
 0xb4a   :  { %v5723_v63 = vpop.f32.mrf.mxu1 }
 0xb4b   :  { %v7072_v29 = vadd.f32 %v2411_v27, %v2403_v22  ;;  %v2406_v30 = vadd.f32 %v5723_v63, %v2284_v23  ;;  %v2440_v32 = vmul.f32 %v7074_v39, %v7074_v39 }
 0xb4c   :  { %v2391_v28 = vpop.f32.mrf.mxu1 }
 0xb4d   :  { %v2404_v31 = vadd.f32 %v2391_v28, %v2276_v24  ;;  %v2438_v40 = vmul.f32 %v7072_v29, %v7072_v29  ;;  %v7080_v49 = vadd.f32 %v2411_v27, %v2406_v30  ;;  %v2492_v24 = vrot.slane %v7068_v57, %v6434_v0 }
 0xb4f   :  { %v7076_v52 = vadd.f32 %v2411_v27, %v2404_v31  ;;  %v2441_v36 = vmul.f32 %v7080_v49, %v7080_v49 }
 0xb51   :  { %v2416_v59 = vadd.f32 %v7076_v52, %v7072_v29  ;;  %v2439_v11 = vmul.f32 %v7076_v52, %v7076_v52 }
 0xb53   :  { %v2417_v33 = vadd.f32 %v2416_v59, %v7074_v39  ;;  %v2442_v35 = vadd.f32 %v2439_v11, %v2438_v40 }
 0xb55   :  { %v2443_v37 = vadd.f32 %v2442_v35, %v2440_v32  ;;  %v2418_v38 = vadd.f32 %v2417_v33, %v7080_v49 }
 0xb57   :  { %v2419_v41 = vrot.slane %v2418_v38, 4  ;;  %v2444_v43 = vadd.f32 %v2443_v37, %v2441_v36 }
 0xb59   :  { %v2420_v45 = vadd.f32 %v2419_v41, %v2418_v38  ;;  %v2445_v46 = vrot.slane %v2444_v43, 4  ;;  %v2503_v41 = vld [vmem:[%s7863_s17 + $0x10] sm:$0xff] }
 0xb5b   :  { %v2421_v47 = vrot.slane %v2420_v45, 2  ;;  %v2446_v48 = vadd.f32 %v2445_v46, %v2444_v43  ;;  %v2669_v43 = vld [vmem:[%s7864_s18 + $0xf0] sm:$0xff]  ;;  %v2667_v46 = vld [vmem:[%s7864_s18 + $0xe0] sm:$0xff] }
 0xb5d   :  { %v2422_v1 = vadd.f32 %v2421_v47, %v2420_v45  ;;  %v2447_v51 = vrot.slane %v2446_v48, 2  ;;  %v2668_v45 = vld [vmem:[%s7864_s18 + $0xe8] sm:$0xff]  ;;  %v2504_v47 = vld [vmem:[%s7863_s17 + $0x18] sm:$0xff] }
 0xb5f   :  { %v2423_v19 = vrot.slane %v2422_v1, 1  ;;  %v2448_v53 = vadd.f32 %v2447_v51, %v2446_v48  ;;  %v2666_v48 = vld [vmem:[%s7864_s18 + $0xd8] sm:$0xff]  ;;  %v2665_v51 = vld [vmem:[%s7864_s18 + $0xd0] sm:$0xff] }
 0xb61   :  { %v2424_v62 = vadd.f32 %v2423_v19, %v2422_v1  ;;  %v2449_v54 = vrot.slane %v2448_v53, 1  ;;  %v2505_v1 = vld [vmem:[%s7863_s17 + $0x20] sm:$0xff]  ;;  %v2664_v19 = vld [vmem:[%s7864_s18 + $0xc8] sm:$0xff] }
 0xb63   :  { %2425 = vrot.lane.b32.xlu0 %v2424_v62, %s6116_s7  ;;  %v2450_v56 = vadd.f32 %v2449_v54, %v2448_v53  ;;  %v2663_v53 = vld [vmem:[%s7864_s18 + $0xc0] sm:$0xff]  ;;  %v2662_v54 = vld [vmem:[%s7864_s18 + $0xb8] sm:$0xff] }
 0xb65   :  { %2451 = vrot.lane.b32.xlu1 %v2450_v56, %s6116_s7 }
 0xbd5   :  { %v2426_v25 = vpop.permute.xlu0 %2425 }
 0xbd6   :  { %v2427_v60 = vadd.f32 %v2426_v25, %v2424_v62  ;;  %v2506_v62 = vld [vmem:[%s7863_s17 + $0x28] sm:$0xff]  ;;  %v2661_v25 = vld [vmem:[%s7864_s18 + $0xb0] sm:$0xff] }
 0xbd7   :  { %v2452_v44 = vpop.permute.xlu1 %2451 }
 0xbd8   :  { %v2453_v6 = vadd.f32 %v2452_v44, %v2450_v56  ;;  %2428 = vrot.lane.b32.xlu0 %v2427_v60, %s6112_s4  ;;  %v2507_v56 = vld [vmem:[%s7863_s17 + $0x30] sm:$0xff]  ;;  %v2659_v44 = vld [vmem:[%s7864_s18 + $0xa0] sm:$0xff] }
 0xbda   :  { %2454 = vrot.lane.b32.xlu1 %v2453_v6, %s6112_s4 }
 0xc4a   :  { %v2429_v21 = vpop.permute.xlu0 %2428 }
 0xc4b   :  { %v2430_v7 = vadd.f32 %v2429_v21, %v2427_v60  ;;  %v2660_v60 = vld [vmem:[%s7864_s18 + $0xa8] sm:$0xff]  ;;  %v2658_v21 = vld [vmem:[%s7864_s18 + $0x98] sm:$0xff] }
 0xc4c   :  { %v2455_v34 = vpop.permute.xlu1 %2454 }
 0xc4d   :  { %v2456_v8 = vadd.f32 %v2455_v34, %v2453_v6  ;;  %2431 = vrot.lane.b32.xlu0 %v2430_v7, %s6113_s28  ;;  %v2508_v6 = vld [vmem:[%s7863_s17 + $0x38] sm:$0xff]  ;;  %v2656_v34 = vld [vmem:[%s7864_s18 + $0x88] sm:$0xff] }
 0xc4f   :  { %2457 = vrot.lane.b32.xlu1 %v2456_v8, %s6113_s28 }
 0xcbf   :  { %v2432_v3 = vpop.permute.xlu0 %2431 }
 0xcc0   :  { %v2433_v10 = vadd.f32 %v2432_v3, %v2430_v7  ;;  %v2657_v7 = vld [vmem:[%s7864_s18 + $0x90] sm:$0xff]  ;;  %v2654_v3 = vld [vmem:[%s7864_s18 + $0x78] sm:$0xff] }
 0xcc1   :  { %v2458_v12 = vpop.permute.xlu1 %2457 }
 0xcc2   :  { %v2459_v50 = vadd.f32 %v2458_v12, %v2456_v8  ;;  %2434 = vrot.lane.b32.xlu0 %v2433_v10, %s6114_s22  ;;  %v2655_v8 = vld [vmem:[%s7864_s18 + $0x80] sm:$0xff]  ;;  %v2653_v12 = vld [vmem:[%s7864_s18 + $0x70] sm:$0xff] }
 0xcc4   :  { %2460 = vrot.lane.b32.xlu1 %v2459_v50, %s6114_s22 }
 0xd34   :  { %v2435_v13 = vpop.permute.xlu0 %2434 }
 0xd35   :  { %v2436_v58 = vadd.f32 %v2435_v13, %v2433_v10  ;;  %v7192_v10 = vld [vmem:[#allocation2] sm:$0xff]  ;;  %v2650_v13 = vld [vmem:[%s7864_s18 + $0x58] sm:$0xff] }
 0xd36   :  { %v2461_v14 = vpop.permute.xlu1 %2460 }
 0xd37   :  { %v2437_v61 = vmul.f32 0.001953125, %v2436_v58  ;;  %v2462_v15 = vadd.f32 %v2461_v14, %v2459_v50  ;;  %v2652_v50 = vld [vmem:[%s7864_s18 + $0x68] sm:$0xff]  ;;  %v2649_v58 = vld [vmem:[%s7864_s18 + $0x50] sm:$0xff] }
 0xd38   :  { %v2648_v14 = vld [vmem:[%s7864_s18 + $0x48] sm:$0xff] }
 0xd39   :  { %v2464_v16 = vmul.f32 %v2437_v61, %v2437_v61  ;;  %v2463_v17 = vmul.f32 0.001953125, %v2462_v15  ;;  %v2470_v22 = vrot.slane %v2437_v61, %v6344_v55  ;;  %v2647_v61 = vld [vmem:[%s7864_s18 + $0x40] sm:$0xff]  ;;  %v2646_v15 = vld [vmem:[%s7864_s18 + $0x38] sm:$0xff] }
 0xd3b   :  { %v2465_v18 = vsub.f32 %v2463_v17, %v2464_v16  ;;  %v2474_v26 = vsub.f32 %v7080_v49, %v2470_v22  ;;  %v2473_v28 = vsub.f32 %v7074_v39, %v2470_v22  ;;  %v2472_v30 = vsub.f32 %v7076_v52, %v2470_v22  ;;  %v2502_v52 = vld [vmem:[%s7863_s17 + $0x8] sm:$0xff]  ;;  %v2645_v16 = vld [vmem:[%s7864_s18 + $0x30] sm:$0xff] }
 0xd3c   :  { %v2471_v11 = vsub.f32 %v7072_v29, %v2470_v22  ;;  %v2670_v29 = vld [vmem:[%s7864_s18 + $0xf8] sm:$0xff]  ;;  %v2644_v17 = vld [vmem:[%s7864_s18 + $0x28] sm:$0xff]  ;;  %v2639_v22 = vld [vmem:[%s7864_s18] sm:$0xff] }
 0xd3d   :  { %v2466_v20 = vmax.f32 %v2465_v18, 0.0  ;;  %v2643_v18 = vld [vmem:[%s7864_s18 + $0x20] sm:$0xff] }
 0xd3f   :  { %v2475_v2 = vadd.f32 1e-05, %v2466_v20  ;;  %v2642_v20 = vld [vmem:[%s7864_s18 + $0x18] sm:$0xff] }
 0xd41   :  { %6080 = vrsqrt.f32 %v2475_v2  ;;  %v2641_v2 = vld [vmem:[%s7864_s18 + $0x10] sm:$0xff] }
 0xd4e   :  { %v6081_v63 = vpop.eup %6080 }
 0xd4f   :  { %v2480_v23 = vmul.f32 %v6081_v63, %v2478_v5  ;;  %v2640_v5 = vld [vmem:[%s7864_s18 + $0x8] sm:$0xff]  ;;  %v5998_v63 = vld [vmem:[%s7865_s10 + $0xf8] sm:$0xff]  }
 0xd50   :  { %5328 = vmatprep.subr.bf16.mxu1 %v5998_v63 }
 0xd51   :  { %v2484_v27 = vrot.slane %v2480_v23, %v6344_v55  ;;  %v5999_v23 = vld [vmem:[%s7865_s10 + $0xb8] sm:$0xff]  }
 0xd52   :  { %5329 = vmatpush3.bf16.msra.mxu1 %v5999_v23 }
 0xd53   :  { %v2488_v31 = vmul.f32 %v2484_v27, %v2474_v26  ;;  %v2487_v40 = vmul.f32 %v2484_v27, %v2473_v28  ;;  %v2486_v59 = vmul.f32 %v2484_v27, %v2472_v30  ;;  %v2485_v35 = vmul.f32 %v2484_v27, %v2471_v11  ;;  %v6001_v26 = vld [vmem:[%s7865_s10 + $0xf0] sm:$0xff]   ;;  %v6005_v28 = vld [vmem:[%s7865_s10 + $0xe8] sm:$0xff]   ;;  %v6002_v11 = vld [vmem:[%s7865_s10 + $0x38] sm:$0xff]  }
 0xd54   :  { %5330 = vmatprep.subr.bf16.mxu1 %v6001_v26  ;;  %v6003_v27 = vld [vmem:[%s7865_s10 + $0xb0] sm:$0xff]   ;;  %v6007_v30 = vld [vmem:[%s7865_s10 + $0xa8] sm:$0xff]  }
 0xd55   :  { %v2496_v32 = vadd.f32 %v2492_v24, %v2488_v31  ;;  %v2495_v33 = vadd.f32 %v2492_v24, %v2487_v40  ;;  %v2494_v37 = vadd.f32 %v2492_v24, %v2486_v59  ;;  %v2493_v38 = vadd.f32 %v2492_v24, %v2485_v35  ;;  %v6000_v24 = vld [vmem:[%s7865_s10 + $0x78] sm:$0xff]   ;;  %v6009_v31 = vld [vmem:[%s7865_s10 + $0xe0] sm:$0xff]   ;;  %v6006_v35 = vld [vmem:[%s7865_s10 + $0x30] sm:$0xff]  }
 0xd56   :  { %5331 = vmatpush3.bf16.msra.mxu1 %v6003_v27  ;;  %v6011_v40 = vld [vmem:[%s7865_s10 + $0xa0] sm:$0xff]  }
 0xd57   :  { %v2500_v36 = vmax.f32 %v2496_v32, 0.0  ;;  %v2499_v57 = vmax.f32 %v2495_v33, 0.0  ;;  %v2498_v49 = vmax.f32 %v2494_v37, 0.0  ;;  %v2497_v39 = vmax.f32 %v2493_v38, 0.0  ;;  %5332 = vmatprep.subr.bf16.mxu1 %v6005_v28  ;;  %v6004_v32 = vld [vmem:[%s7865_s10 + $0x70] sm:$0xff]  }
 0xd59   :  { %5724 = vmatprep.subr.mxu0 %v2500_v36 }
 0xd5a   :  { %5725 = vmatpush3.msra.mxu0 %v2500_v36  ;;  %5333 = vmatpush3.bf16.msra.mxu1 %v6007_v30  ;;  %v6008_v36 = vld [vmem:[%s7865_s10 + $0x68] sm:$0xff]  }
 0xd5b   :  { %5726 = vmatprep.subr.mxu0 %v2499_v57  ;;  %5334 = vmatprep.subr.bf16.mxu1 %v6009_v31  ;;  %v6033_v31 = vld [vmem:[%s7865_s10 + $0x130] sm:$0xff]  }
 0xd5c   :  { %5727 = vmatpush3.msra.mxu0 %v2499_v57  ;;  %v6010_v57 = vld [vmem:[%s7865_s10 + $0x28] sm:$0xff]  }
 0xd5d   :  { %5728 = vmatprep.subr.mxu0 %v2498_v49 }
 0xd5e   :  { %5729 = vmatpush3.msra.mxu0 %v2498_v49  ;;  %5335 = vmatpush3.bf16.msra.mxu1 %v6011_v40 }
 0xd5f   :  { %5730 = vmatprep.subr.mxu0 %v2497_v39 }
 0xd60   :  { %5731 = vmatpush3.msra.mxu0 %v2497_v39 }
 0xd61   :  { %5733 = vmatmul.mubr.msk.f32.vlgmr.msra.gmra.mxu0 %vm2509_vm7, %v2502_v52  ;;  %2671 = vmatprep.subr.mxu0 %v2670_v29 }
 0xd62   :  { %5735 = vmatprep.mubr.msk.f32.mxu0 %vm2509_vm7, %v2503_v41  ;;  %2672 = vmatpush1.msra.mxu0 %v2669_v43  ;;  %v6012_v41 = vld [vmem:[%s7865_s10 + $0x60] sm:$0xff]   ;;  %v6013_v43 = vld [vmem:[%s7865_s10 + $0xd8] sm:$0xff]  }
 0xd63   :  { %2673 = vmatprep.subr.mxu0 %v2668_v45  ;;  %v6014_v45 = vld [vmem:[%s7865_s10 + $0x20] sm:$0xff]   ;;  %5336 = vmatprep.subr.bf16.mxu1 %v6013_v43 }
 0xd64   :  { %2674 = vmatpush1.msra.mxu0 %v2667_v46  ;;  %v6015_v46 = vld [vmem:[%s7865_s10 + $0x98] sm:$0xff]  }
 0xd65   :  { %5736 = vmatmul.mubr.msk.f32.gmra.mxu0 %vm2509_vm7, %v2504_v47  ;;  %2675 = vmatprep.subr.mxu0 %v2666_v48  ;;  %v6016_v47 = vld [vmem:[%s7865_s10 + $0x58] sm:$0xff]   ;;  %v6017_v48 = vld [vmem:[%s7865_s10 + $0xd0] sm:$0xff]  }
 0xd66   :  { %5738 = vmatprep.mubr.msk.f32.mxu0 %vm2509_vm7, %v2505_v1  ;;  %2676 = vmatpush1.msra.mxu0 %v2665_v51  ;;  %v6018_v1 = vld [vmem:[%s7865_s10 + $0x18] sm:$0xff]   ;;  %v6019_v51 = vld [vmem:[%s7865_s10 + $0x90] sm:$0xff]  }
 0xd67   :  { %2677 = vmatprep.subr.mxu0 %v2664_v19  ;;  %5337 = vmatpush3.bf16.msra.mxu1 %v6015_v46  ;;  %v6020_v19 = vld [vmem:[%s7865_s10 + $0x50] sm:$0xff]  }
 0xd68   :  { %2678 = vmatpush1.msra.mxu0 %v2663_v53  ;;  %5338 = vmatprep.subr.bf16.mxu1 %v6017_v48  ;;  %v6021_v53 = vld [vmem:[%s7865_s10 + $0xc8] sm:$0xff]  }
 0xd69   :  { %5739 = vmatmul.mubr.msk.f32.gmra.mxu0 %vm2509_vm7, %v2506_v62  ;;  %2679 = vmatprep.subr.mxu0 %v2662_v54  ;;  %v6022_v62 = vld [vmem:[%s7865_s10 + $0x10] sm:$0xff]   ;;  %v6023_v54 = vld [vmem:[%s7865_s10 + $0x88] sm:$0xff]  }
 0xd6a   :  { %5741 = vmatprep.mubr.msk.f32.mxu0 %vm2509_vm7, %v2507_v56  ;;  %2680 = vmatpush1.msra.mxu0 %v2661_v25  ;;  %v6024_v56 = vld [vmem:[%s7865_s10 + $0x48] sm:$0xff]   ;;  %v6025_v25 = vld [vmem:[%s7865_s10 + $0xc0] sm:$0xff]  }
 0xd6b   :  { %2681 = vmatprep.subr.mxu0 %v2660_v60  ;;  %5339 = vmatpush3.bf16.msra.mxu1 %v6019_v51  ;;  %v6026_v60 = vld [vmem:[%s7865_s10 + $0x8] sm:$0xff]   ;;  %v6037_v51 = vld [vmem:[%s7865_s10 + $0x120] sm:$0xff]  }
 0xd6c   :  { %2682 = vmatpush1.msra.mxu0 %v2659_v44  ;;  %5340 = vmatprep.subr.bf16.mxu1 %v6021_v53  ;;  %v6027_v44 = vld [vmem:[%s7865_s10 + $0x80] sm:$0xff]   ;;  %v6038_v53 = vld [vmem:[%s7865_s10 + $0x158] sm:$0xff]  }
 0xd6d   :  { %5742 = vmatmul.mubr.msk.f32.gmra.mxu0 %vm2509_vm7, %v2508_v6  ;;  %2683 = vmatprep.subr.mxu0 %v2658_v21  ;;  %v6028_v6 = vld [vmem:[%s7865_s10 + $0x40] sm:$0xff]  }
 0xd6e   :  { %2684 = vmatpush1.msra.mxu0 %v2657_v7  ;;  %2735 = vmatprep.mubr.f32.mxu0 %v7192_v10  ;;  %v6029_v21 = vld [vmem:[%s7865_s10] sm:$0xff]   ;;  %v6030_v7 = vld [vmem:[%s7865_s10 + $0x178] sm:$0xff]  }
 0xd6f   :  { %2685 = vmatprep.subr.mxu0 %v2656_v34  ;;  %5341 = vmatpush3.bf16.msra.mxu1 %v6023_v54 }
 0xd70   :  { %2686 = vmatpush1.msra.mxu0 %v2655_v8  ;;  %5342 = vmatprep.subr.bf16.mxu1 %v6025_v25 }
 0xd71   :  { %2687 = vmatprep.subr.mxu0 %v2654_v3  ;;  %v2804_v3 = vand.u32 31, %v6249_v4 }
 0xd72   :  { %2688 = vmatpush1.msra.mxu0 %v2653_v12  ;;  %v2836_v12 = vld [vmem:[#allocation2] sm:$0x80] }
 0xd73   :  { %2689 = vmatprep.subr.mxu0 %v2652_v50  ;;  %5343 = vmatpush3.bf16.msra.mxu1 %v6027_v44  ;;  %vm2828_vm8 = vcmp.ge.s32.totalorder %v2804_v3, 1  ;;  %v6040_v3 = vld [vmem:[%s7865_s10 + $0x150] sm:$0xff]  }
 0xd74   :  { %2690 = vmatpush1.msra.mxu0 %v2651_v9  ;;  %5408 = vmatprep.subr.bf16.mxu1 %v6030_v7  ;;  %vm7367_vm9 = vmpackc.low %vm6115_vm12, %vm2828_vm8 }
 0xd75   :  { %2691 = vmatprep.subr.mxu0 %v2650_v13 }
 0xd76   :  { %2692 = vmatpush1.msra.mxu0 %v2649_v58 }
 0xd77   :  { %2693 = vmatprep.subr.mxu0 %v2648_v14 }
 0xd78   :  { %2694 = vmatpush1.msra.mxu0 %v2647_v61  ;;  %v2874_v61 = vrot.slane %v2836_v12, 7 }
 0xd79   :  { %2695 = vmatprep.subr.mxu0 %v2646_v15 }
 0xd7a   :  { %2696 = vmatpush1.msra.mxu0 %v2645_v16 }
 0xd7b   :  { %2697 = vmatprep.subr.mxu0 %v2644_v17 }
 0xd7c   :  { %2698 = vmatpush1.msra.mxu0 %v2643_v18  ;;  %v6031_v18 = vld [vmem:[%s7865_s10 + $0x138] sm:$0xff]  }
 0xd7d   :  { %2699 = vmatprep.subr.mxu0 %v2642_v20 }
 0xd7e   :  { %2700 = vmatpush1.msra.mxu0 %v2641_v2 }
 0xd7f   :  { %2701 = vmatprep.subr.mxu0 %v2640_v5 }
 0xd80   :  { %2702 = vmatpush1.msra.mxu0 %v2639_v22  ;;  %v6032_v22 = vld [vmem:[%s7865_s10 + $0x170] sm:$0xff]  }
 0xd81   :  { %5368 = vmatprep.subr.bf16.mxu0 %v6000_v24  ;;  %v6065_v24 = vld [vmem:[%s7867_s12 + $0xa0] sm:$0xff]  }
 0xe21   :  { %v5734_v59 = vpop.f32.mrf.mxu0 }
 0xe23   :  { %v2600_v33 = vpop.f32.mrf.mxu0 }
 0xe24   :  { %2736 = vmatmul.mubr.f32.vlgmr.msra.gmra.mxu0 %v2600_v33 }
 0xe25   :  { %2741 = vmatprep.mubr.f32.mxu0 %v7192_v10  ;;  %5369 = vmatpush3.bf16.msra.mxu0 %v6002_v11  ;;  %v5737_v37 = vpop.f32.mrf.mxu0 }
 0xe26   :  { %5370 = vmatprep.subr.bf16.mxu0 %v6004_v32 }
 0xe27   :  { %v2610_v38 = vpop.f32.mrf.mxu0 }
 0xe28   :  { %2742 = vmatmul.mubr.f32.gmra.mxu0 %v5734_v59  ;;  %v6034_v59 = vld [vmem:[%s7865_s10 + $0x168] sm:$0xff]  }
 0xe29   :  { %2747 = vmatprep.mubr.f32.mxu0 %v7192_v10  ;;  %5371 = vmatpush3.bf16.msra.mxu0 %v6006_v35  ;;  %v5740_v49 = vpop.f32.mrf.mxu0 }
 0xe2a   :  { %5372 = vmatprep.subr.bf16.mxu0 %v6008_v36  ;;  %v2800_v36 = vadd.s32 32, %v6249_v4 }
 0xe2b   :  { %v2620_v39 = vpop.f32.mrf.mxu0 }
 0xe2c   :  { %2748 = vmatmul.mubr.f32.gmra.mxu0 %v2610_v38  ;;  %v6035_v38 = vld [vmem:[%s7865_s10 + $0x128] sm:$0xff]   ;;  %v2808_v48 = vand.u32 31, %v2800_v36 }
 0xe2d   :  { %2753 = vmatprep.mubr.f32.mxu0 %v7192_v10  ;;  %5373 = vmatpush3.bf16.msra.mxu0 %v6010_v57  ;;  %v5743_v52 = vpop.f32.mrf.mxu0 }
 0xe2e   :  { %5374 = vmatprep.subr.bf16.mxu0 %v6012_v41  ;;  %vm2832_vm10 = vcmp.ge.s32.totalorder %v2808_v48, 1 }
 0xe2f   :  { %v2630_v29 = vpop.f32.mrf.mxu0  ;;  %vm7447_vm11 = vmpackc.low %vm6115_vm12, %vm2832_vm10 }
 0xe30   :  { %2754 = vmatmul.mubr.f32.gmra.mxu0 %v5737_v37 }
 0xe31   :  { %2759 = vmatprep.mubr.f32.mxu0 %v7192_v10  ;;  %5375 = vmatpush3.bf16.msra.mxu0 %v6014_v45 }
 0xe32   :  { %5376 = vmatprep.subr.bf16.mxu0 %v6016_v47 }
 0xe34   :  { %2760 = vmatmul.mubr.f32.gmra.mxu0 %v2620_v39 }
 0xe35   :  { %2765 = vmatprep.mubr.f32.mxu0 %v7192_v10  ;;  %5377 = vmatpush3.bf16.msra.mxu0 %v6018_v1 }
 0xe36   :  { %5378 = vmatprep.subr.bf16.mxu0 %v6020_v19 }
 0xe38   :  { %2766 = vmatmul.mubr.f32.gmra.mxu0 %v5740_v49 }
 0xe39   :  { %2771 = vmatprep.mubr.f32.mxu0 %v7192_v10  ;;  %5379 = vmatpush3.bf16.msra.mxu0 %v6022_v62 }
 0xe3a   :  { %5380 = vmatprep.subr.bf16.mxu0 %v6024_v56 }
 0xe3c   :  { %2772 = vmatmul.mubr.f32.gmra.mxu0 %v2630_v29  ;;  %v6036_v29 = vld [vmem:[%s7865_s10 + $0x160] sm:$0xff]  }
 0xe3d   :  { %2777 = vmatprep.mubr.f32.mxu0 %v7192_v10  ;;  %5381 = vmatpush3.bf16.msra.mxu0 %v6026_v60  ;;  %v2837_v10 = vld [vmem:[#allocation2 + $0x8] sm:$0x80] }
 0xe3e   :  { %5382 = vmatprep.subr.bf16.mxu0 %v6028_v6  ;;  %v2877_v58 = vrot.slane %v2837_v10, 7  ;;  %v6039_v6 = vld [vmem:[%s7865_s10 + $0x118] sm:$0xff]  }
 0xe40   :  { %2778 = vmatmul.mubr.f32.gmra.mxu0 %v5743_v52 }
 0xe41   :  { %5383 = vmatpush3.bf16.msra.mxu0 %v6029_v21 }
 0xee4   :  { %v2737_v34 = vpop.f32.mrf.mxu0 }
 0xee5   :  { %2784 = vst [vmem:[#allocation2 + $0x10] sm:$0xff] %v2737_v34  ;;  %v2875_v15 = vrot.slane %v2737_v34, 7 }
 0xee6   :  { %v2739_v8 = vpop.f32.mrf.mxu0 }
 0xee7   :  { %2785 = vst [vmem:[#allocation2 + $0x18] sm:$0xff] %v2739_v8  ;;  %v2878_v9 = vrot.slane %v2739_v8, 7  ;;  %v2876_v27 = vsel %vm112_vm5, %v2874_v61, %v2875_v15 }
 0xee8   :  { %v7347_v50 = vpop.f32.mrf.mxu0 }
 0xee9   :  { %v2880_v13 = vrot.slane %v7347_v50, 7  ;;  %v3106_v5 = vpack.c.bf16 %v7347_v50, %v2737_v34  ;;  %v2879_v63 = vsel %vm112_vm5, %v2877_v58, %v2878_v9 }
 0xeea   :  { %v7350_v14 = vpop.f32.mrf.mxu0 }
 0xeeb   :  { %v2882_v16 = vrot.slane %v7350_v14, 7  ;;  %v3107_v17 = vpack.c.bf16 %v7350_v14, %v2739_v8  ;;  %v2881_v2 = vsel %vm112_vm5, %v2875_v15, %v2880_v13 }
 0xeec   :  { %v7357_v20 = vpop.f32.mrf.mxu0  ;;  %v4986_v30 = vpack.c.bf16 %v2881_v2, %v2876_v27  ;;  %v2948_v27 = vld [vmem:[#allocation2 + $0x10] sm:$0xfe] }
 0xeed   :  { %3275 = vmatprep.mubr.bf16.mxu1 %v3107_v17  ;;  %v2883_v23 = vsel %vm112_vm5, %v2878_v9, %v2882_v16  ;;  %v2884_v35 = vrot.slane %v7357_v20, 7 }
 0xeee   :  { %v7371_v26 = vpop.f32.mrf.mxu0  ;;  %3276 = vmatmul.mubr.bf16.vlgmr.msra.gmra.mxu1 %v3106_v5  ;;  %v4983_v28 = vpack.c.bf16 %v2883_v23, %v2879_v63  ;;  %v2949_v21 = vld [vmem:[#allocation2 + $0x18] sm:$0xfe]  ;;  %v6042_v5 = vld [vmem:[%s7865_s10 + $0x148] sm:$0xff]  }
 0xeef   :  { %5409 = vmatpush3.bf16.msra.mxu1 %v6031_v18  ;;  %v2886_v11 = vrot.slane %v7371_v26, 7  ;;  %v2885_v47 = vsel %vm112_vm5, %v2880_v13, %v2884_v35  ;;  %v3003_v15 = vrot.slane %v2949_v21, 1  ;;  %v6041_v18 = vld [vmem:[%s7865_s10 + $0x110] sm:$0xff]  }
 0xef0   :  { %v7377_v40 = vpop.f32.mrf.mxu0  ;;  %4984 = vmatprep.mubr.msk.bf16.mxu0 %vm7367_vm9, %v4983_v28  ;;  %5410 = vmatprep.subr.bf16.mxu1 %v6032_v22  ;;  %v3004_v22 = vrot.slane %v7350_v14, 1  ;;  %v6043_v14 = vld [vmem:[%s7865_s10 + $0x108] sm:$0xff]  }
 0xef1   :  { %4987 = vmatmul.mubr.msk.bf16.vlgmr.msra.gmra.mxu0 %vm7367_vm9, %v4986_v30  ;;  %v2888_v32 = vrot.slane %v7377_v40, 7  ;;  %v3108_v39 = vpack.c.bf16 %v7377_v40, %v7357_v20  ;;  %v2887_v41 = vsel %vm112_vm5, %v2882_v16, %v2886_v11  ;;  %v3008_v16 = vrot.slane %v7371_v26, 1 }
 0xef2   :  { %v7388_v33 = vpop.f32.mrf.mxu0  ;;  %v3005_v23 = vsel %vm133_vm3, %v3003_v15, %v3004_v22 }
 0xef3   :  { %2791 = vst [vmem:[#allocation2 + $0x48] sm:$0xff] %v7388_v33  ;;  %5411 = vmatpush3.bf16.msra.mxu1 %v6033_v31  ;;  %v2890_v37 = vrot.slane %v7388_v33, 7  ;;  %v3109_v57 = vpack.c.bf16 %v7388_v33, %v7371_v26  ;;  %v2889_v52 = vsel %vm112_vm5, %v2884_v35, %v2888_v32  ;;  %v3009_v26 = vsel %vm133_vm3, %v3004_v22, %v3008_v16  ;;  %v6044_v31 = vld [vmem:[%s7865_s10 + $0x140] sm:$0xff]  }
 0xef4   :  { %v7399_v49 = vpop.f32.mrf.mxu0  ;;  %5412 = vmatprep.subr.bf16.mxu1 %v6034_v59  ;;  %v3068_v1 = vpack.c.bf16 %v2889_v52, %v2885_v47  ;;  %v2807_v59 = vand.u32 31, %v6898_v42  ;;  %v3006_v35 = vrot.slane %v7357_v20, 1  ;;  %v3012_v42 = vrot.slane %v7388_v33, 1  ;;  %v4466_v33 = vld [vmem:[%s7869_s20 + $0x78] sm:$0xff] }
 0xef5   :  { %3283 = vmatprep.mubr.bf16.mxu1 %v3109_v57  ;;  %v2891_v43 = vsel %vm112_vm5, %v2886_v11, %v2890_v37  ;;  %v2892_v25 = vrot.slane %v7399_v49, 7  ;;  %v3470_v11 = vpack.c.bf16 %v3009_v26, %v3005_v23  ;;  %v3001_v57 = vrot.slane %v7347_v50, 1  ;;  %v4464_v23 = vld [vmem:[%s7869_s20 + $0x68] sm:$0xff] }
 0xef6   :  { %v7409_v45 = vpop.f32.mrf.mxu0  ;;  %3284 = vmatmul.mubr.bf16.gmra.mxu1 %v3108_v39  ;;  %v3069_v46 = vpack.c.bf16 %v2891_v43, %v2887_v41  ;;  %vm2943_vm13 = vcmp.lt.s32.totalorder %v2807_v59, 31  ;;  %v3013_v48 = vsel %vm133_vm3, %v3008_v16, %v3012_v42 }
 0xef7   :  { %2793 = vst [vmem:[#allocation2 + $0x58] sm:$0xff] %v7409_v45  ;;  %5413 = vmatpush3.bf16.msra.mxu1 %v6035_v38  ;;  %v2894_v62 = vrot.slane %v7409_v45, 7  ;;  %v2893_v61 = vsel %vm112_vm5, %v2888_v32, %v2892_v25  ;;  %v3000_v32 = vrot.slane %v2948_v27, 1  ;;  %v3016_v36 = vrot.slane %v7409_v45, 1  ;;  %vm7500_vm14 = vmpackc.low %vm2943_vm13, %vm6115_vm12 }
 0xef8   :  { %v7416_v19 = vpop.f32.mrf.mxu0  ;;  %3444 = vmatprep.mubr.bf16.mxu0 %v3069_v46  ;;  %5414 = vmatprep.subr.bf16.mxu1 %v6036_v29  ;;  %v3007_v29 = vsel %vm133_vm3, %v3001_v57, %v3006_v35 }
 0xef9   :  { %3445 = vmatmul.mubr.bf16.gmra.mxu0 %v3068_v1  ;;  %v2896_v54 = vrot.slane %v7416_v19, 7  ;;  %v3110_v34 = vpack.c.bf16 %v7416_v19, %v7399_v49  ;;  %v2895_v10 = vsel %vm112_vm5, %v2890_v37, %v2894_v62  ;;  %v6045_v37 = vld [vmem:[%s7865_s10 + $0x100] sm:$0xff]   ;;  %v3002_v20 = vsel %vm133_vm3, %v3000_v32, %v3001_v57 }
 0xefa   :  { %v7423_v56 = vpop.f32.mrf.mxu0  ;;  %v3469_v47 = vpack.c.bf16 %v3007_v29, %v3002_v20 }
 0xefb   :  { %5415 = vmatpush3.bf16.msra.mxu1 %v6037_v51  ;;  %v2898_v60 = vrot.slane %v7423_v56, 7  ;;  %v3111_v44 = vpack.c.bf16 %v7423_v56, %v7409_v45  ;;  %v2897_v8 = vsel %vm112_vm5, %v2892_v25, %v2896_v54  ;;  %v3017_v45 = vsel %vm133_vm3, %v3012_v42, %v3016_v36 }
 0xefc   :  { %v7432_v7 = vpop.f32.mrf.mxu0  ;;  %5416 = vmatprep.subr.bf16.mxu1 %v6038_v53  ;;  %v4992_v17 = vpack.c.bf16 %v2897_v8, %v2893_v61  ;;  %v5043_v53 = vpack.c.bf16 %v3017_v45, %v3013_v48  ;;  %v2803_v8 = vadd.s32 56, %v6249_v4  ;;  %v3018_v4 = vrot.slane %v7416_v19, 1 }
 0xefd   :  { %3291 = vmatprep.mubr.bf16.mxu1 %v3111_v44  ;;  %v2899_v12 = vsel %vm112_vm5, %v2894_v62, %v2898_v60  ;;  %v2900_v41 = vrot.slane %v7432_v7, 7  ;;  %v3014_v62 = vrot.slane %v7399_v49, 1  ;;  %v3022_v61 = vrot.slane %v7432_v7, 1 }
 0xefe   :  { %v7451_v13 = vpop.f32.mrf.mxu0  ;;  %3292 = vmatmul.mubr.bf16.gmra.mxu1 %v3110_v34  ;;  %v4989_v58 = vpack.c.bf16 %v2899_v12, %v2895_v10  ;;  %v3010_v34 = vrot.slane %v7377_v40, 1  ;;  %v2965_v10 = vld [vmem:[#allocation2 + $0x98] sm:$0x1]  ;;  %v2811_v40 = vand.u32 31, %v2803_v8 }
 0xeff   :  { %5417 = vmatpush3.bf16.msra.mxu1 %v6039_v6  ;;  %v2902_v39 = vrot.slane %v7451_v13, 7  ;;  %v2901_v44 = vsel %vm112_vm5, %v2896_v54, %v2900_v41  ;;  %v3024_v6 = vrot.slane %v7451_v13, 1  ;;  %v3032_v15 = vrot.slane %v2965_v10, 1 }
 0xf00   :  { %v7458_v2 = vpop.f32.mrf.mxu0  ;;  %4990 = vmatprep.mubr.msk.bf16.mxu0 %vm7447_vm11, %v4989_v58  ;;  %5418 = vmatprep.subr.bf16.mxu1 %v6040_v3  ;;  %v3015_v49 = vsel %vm133_vm3, %v3010_v34, %v3014_v62  ;;  %v3011_v54 = vsel %vm133_vm3, %v3006_v35, %v3010_v34  ;;  %v3023_v16 = vsel %vm133_vm3, %v3018_v4, %v3022_v61  ;;  %vm2947_vm15 = vcmp.lt.s32.totalorder %v2811_v40, 31 }
 0xf01   :  { %2798 = vst [vmem:[#allocation2 + $0x80] sm:$0xff] %v7458_v2  ;;  %4993 = vmatmul.mubr.msk.bf16.gmra.mxu0 %vm7447_vm11, %v4992_v17  ;;  %v3112_v30 = vpack.c.bf16 %v7458_v2, %v7432_v7  ;;  %v2903_v1 = vsel %vm112_vm5, %v2898_v60, %v2902_v39  ;;  %v3020_v60 = vrot.slane %v7423_v56, 1  ;;  %v5046_v12 = vpack.c.bf16 %v3015_v49, %v3011_v54  ;;  %vm7532_vm0 = vmpackc.low %vm2947_vm15, %vm6115_vm12 }
 0xf02   :  { %v7469_v63 = vpop.f32.mrf.mxu0  ;;  %v3019_v7 = vsel %vm133_vm3, %v3014_v62, %v3018_v4  ;;  %v3026_v26 = vrot.slane %v7458_v2, 1 }
 0xf03   :  { %2799 = vst [vmem:[#allocation2 + $0x88] sm:$0xff] %v7469_v63  ;;  %5419 = vmatpush3.bf16.msra.mxu1 %v6041_v18  ;;  %v3113_v28 = vpack.c.bf16 %v7469_v63, %v7451_v13  ;;  %v3025_v3 = vsel %vm133_vm3, %v3020_v60, %v3024_v6  ;;  %v3021_v13 = vsel %vm133_vm3, %v3016_v36, %v3020_v60  ;;  %v3028_v56 = vrot.slane %v7469_v63, 1 }
 0xf04   :  { %5420 = vmatprep.subr.bf16.mxu1 %v6042_v5  ;;  %v3474_v58 = vpack.c.bf16 %v3025_v3, %v3021_v13  ;;  %v2964_v5 = vld [vmem:[#allocation2 + $0x90] sm:$0x1]  ;;  %v3473_v22 = vpack.c.bf16 %v3023_v16, %v3019_v7  ;;  %v3027_v27 = vsel %vm133_vm3, %v3022_v61, %v3026_v26 }
 0xf05   :  { %3299 = vmatprep.mubr.bf16.mxu1 %v3113_v28  ;;  %v3029_v17 = vsel %vm133_vm3, %v3024_v6, %v3028_v56  ;;  %v3033_v18 = vsel %vm133_vm3, %v3028_v56, %v3032_v15  ;;  %v3030_v19 = vrot.slane %v2964_v5, 1 }
 0xf06   :  { %3300 = vmatmul.mubr.bf16.gmra.mxu1 %v3112_v30  ;;  %v5049_v63 = vpack.c.bf16 %v3033_v18, %v3029_v17  ;;  %v7554_v17 = vld [vmem:[%s7866_s11] sm:$0x7]  ;;  %s6117_s11 = smov 4  }
 0xf07   :  { %5421 = vmatpush3.bf16.msra.mxu1 %v6043_v14  ;;  %3638 = vmatprep.mubr.bf16.mxu1 %v3470_v11  ;;  %v3031_v28 = vsel %vm133_vm3, %v3026_v26, %v3030_v19 }
 0xf08   :  { %v2838_v38 = vld [vmem:[#allocation2 + $0x80] sm:$0x7f]  ;;  %5422 = vmatprep.subr.bf16.mxu1 %v6044_v31  ;;  %v5052_v14 = vpack.c.bf16 %v3031_v28, %v3027_v27 }
 0xf09   :  { %v2904_v52 = vrot.slane %v2838_v38, 7 }
 0xf0a   :  { %v2839_v43 = vld [vmem:[#allocation2 + $0x88] sm:$0x7f] }
 0xf0b   :  { %v2906_v46 = vrot.slane %v2839_v43, 7  ;;  %5423 = vmatpush3.bf16.msra.mxu1 %v6045_v37  ;;  %v2905_v50 = vsel %vm112_vm5, %v2900_v41, %v2904_v52 }
 0xf0c   :  { %v3072_v21 = vpack.c.bf16 %v2905_v50, %v2901_v44 }
 0xf0d   :  { %v2907_v51 = vsel %vm112_vm5, %v2902_v39, %v2906_v46 }
 0xf0e   :  { %v3073_v25 = vpack.c.bf16 %v2907_v51, %v2903_v1  ;;  %3639 = vmatmul.mubr.bf16.vlgmr.msra.gmra.mxu1 %v3469_v47 }
 0xf0f   :  { %5044 = vmatprep.mubr.msk.bf16.mxu1 %vm7500_vm14, %v5043_v53 }
 0xf10   :  { %3460 = vmatprep.mubr.bf16.mxu0 %v3073_v25 }
 0xf11   :  { %3461 = vmatmul.mubr.bf16.gmra.mxu0 %v3072_v21 }
 0xf16   :  { %5047 = vmatmul.mubr.msk.bf16.gmra.mxu1 %vm7500_vm14, %v5046_v12 }
 0xf17   :  { %3654 = vmatprep.mubr.bf16.mxu1 %v3474_v58 }
 0xf1e   :  { %3655 = vmatmul.mubr.bf16.gmra.mxu1 %v3473_v22 }
 0xf1f   :  { %5050 = vmatprep.mubr.msk.bf16.mxu1 %vm7532_vm0, %v5049_v63 }
 0xf26   :  { %5053 = vmatmul.mubr.msk.bf16.gmra.mxu1 %vm7532_vm0, %v5052_v14 }
 0xfae   :  { %v5344_v30 = vpop.f32.mrf.mxu1 }
 0xfb0   :  { %v5345_v31 = vpop.f32.mrf.mxu1 }
 0xfb1   :  { %v5384_v59 = vpop.f32.mrf.mxu0  ;;  %v5346_v13 = vadd.f32 %v5345_v31, %v5344_v30  ;;  %v3683_v30 = vrot.slane %v7554_v17, %v6344_v55 }
 0xfb2   :  { %v5347_v11 = vpop.f32.mrf.mxu1 }
 0xfb3   :  { %v5385_v32 = vpop.f32.mrf.mxu0 }
 0xfb4   :  { %v5348_v35 = vpop.f32.mrf.mxu1  ;;  %v5386_v8 = vadd.f32 %v5385_v32, %v5384_v59 }
 0xfb5   :  { %v5387_v2 = vpop.f32.mrf.mxu0  ;;  %v5349_v3 = vadd.f32 %v5348_v35, %v5347_v11 }
 0xfb6   :  { %v5350_v36 = vpop.f32.mrf.mxu1  ;;  %v3439_v18 = vadd.f32 %v5386_v8, %v5346_v13 }
 0xfb7   :  { %v5388_v37 = vpop.f32.mrf.mxu0 }
 0xfb8   :  { %v5351_v57 = vpop.f32.mrf.mxu1  ;;  %v5389_v34 = vadd.f32 %v5388_v37, %v5387_v2 }
 0xfb9   :  { %v5390_v42 = vpop.f32.mrf.mxu0  ;;  %v5352_v58 = vadd.f32 %v5351_v57, %v5350_v36 }
 0xfba   :  { %v5353_v38 = vpop.f32.mrf.mxu1  ;;  %v3442_v40 = vadd.f32 %v5389_v34, %v5349_v3 }
 0xfbb   :  { %v5391_v20 = vpop.f32.mrf.mxu0 }
 0xfbc   :  { %v5354_v39 = vpop.f32.mrf.mxu1  ;;  %v5392_v54 = vadd.f32 %v5391_v20, %v5390_v42 }
 0xfbd   :  { %v5393_v43 = vpop.f32.mrf.mxu0  ;;  %v5355_v7 = vadd.f32 %v5354_v39, %v5353_v38 }
 0xfbe   :  { %v5356_v52 = vpop.f32.mrf.mxu1  ;;  %v3447_v5 = vadd.f32 %v5392_v54, %v5352_v58 }
 0xfbf   :  { %v5394_v50 = vpop.f32.mrf.mxu0 }
 0xfc0   :  { %v5357_v29 = vpop.f32.mrf.mxu1  ;;  %v5395_v56 = vadd.f32 %v5394_v50, %v5393_v43 }
 0xfc1   :  { %v5396_v1 = vpop.f32.mrf.mxu0  ;;  %v5358_v11 = vadd.f32 %v5357_v29, %v5356_v52 }
 0xfc2   :  { %v5359_v41 = vpop.f32.mrf.mxu1  ;;  %v3450_v28 = vadd.f32 %v5395_v56, %v5355_v7 }
 0xfc3   :  { %v5397_v62 = vpop.f32.mrf.mxu0 }
 0xfc4   :  { %v5360_v45 = vpop.f32.mrf.mxu1  ;;  %v5398_v26 = vadd.f32 %v5397_v62, %v5396_v1 }
 0xfc5   :  { %v5399_v6 = vpop.f32.mrf.mxu0  ;;  %v5361_v43 = vadd.f32 %v5360_v45, %v5359_v41 }
 0xfc6   :  { %v7543_v46 = vpop.f32.mrf.mxu1  ;;  %v3455_v36 = vadd.f32 %v5398_v26, %v5358_v11 }
 0xfc7   :  { %v5400_v49 = vpop.f32.mrf.mxu0 }
 0xfc8   :  { %v7545_v47 = vpop.f32.mrf.mxu1  ;;  %v5401_v37 = vadd.f32 %v5400_v49, %v5399_v6 }
 0xfc9   :  { %v5364_v41 = vadd.f32 %v7545_v47, %v7543_v46 }
 0xfca   :  { %v7547_v48 = vpop.f32.mrf.mxu1  ;;  %v3458_v29 = vadd.f32 %v5401_v37, %v5361_v43 }
 0xfcc   :  { %v7549_v51 = vpop.f32.mrf.mxu1 }
 0xfcd   :  { %v5367_v46 = vadd.f32 %v7549_v51, %v7547_v48 }
 0xfce   :  { %v5424_v53 = vpop.f32.mrf.mxu1 }
 0xfd0   :  { %v5425_v25 = vpop.f32.mrf.mxu1 }
 0xfd1   :  { %v5402_v61 = vpop.f32.mrf.mxu0  ;;  %v5426_v15 = vadd.f32 %v5425_v25, %v5424_v53 }
 0xfd2   :  { %v5427_v44 = vpop.f32.mrf.mxu1 }
 0xfd3   :  { %v5403_v19 = vpop.f32.mrf.mxu0  ;;  %v3671_v14 = vadd.f32 %v5426_v15, %v3439_v18 }
 0xfd4   :  { %v5428_v21 = vpop.f32.mrf.mxu1  ;;  %v5404_v62 = vadd.f32 %v5403_v19, %v5402_v61 }
 0xfd5   :  { %v5429_v10 = vadd.f32 %v5428_v21, %v5427_v44  ;;  %v5405_v57 = vpop.f32.mrf.mxu0  ;;  %v7560_v42 = vadd.f32 %v3683_v30, %v3671_v14 }
 0xfd6   :  { %v5430_v60 = vpop.f32.mrf.mxu1 }
 0xfd7   :  { %v3672_v22 = vadd.f32 %v5429_v10, %v3442_v40  ;;  %v5406_v25 = vpop.f32.mrf.mxu0  ;;  %v3722_v6 = vmul.f32 %v7560_v42, %v7560_v42 }
 0xfd8   :  { %v5431_v12 = vpop.f32.mrf.mxu1  ;;  %v5407_v8 = vadd.f32 %v5406_v25, %v5405_v57 }
 0xfd9   :  { %v5432_v4 = vadd.f32 %v5431_v12, %v5430_v60  ;;  %v7558_v32 = vadd.f32 %v3683_v30, %v3672_v22  ;;  %v3463_v12 = vadd.f32 %v5404_v62, %v5364_v41 }
 0xfda   :  { %v5433_v16 = vpop.f32.mrf.mxu1 }
 0xfdb   :  { %v3673_v31 = vadd.f32 %v5432_v4, %v3447_v5  ;;  %v3723_v1 = vmul.f32 %v7558_v32, %v7558_v32  ;;  %v3692_v45 = vadd.f32 %v7558_v32, %v7560_v42 }
 0xfdc   :  { %v5434_v63 = vpop.f32.mrf.mxu1 }
 0xfdd   :  { %v5435_v27 = vadd.f32 %v5434_v63, %v5433_v16  ;;  %v7562_v39 = vadd.f32 %v3683_v30, %v3673_v31  ;;  %v3730_v3 = vadd.f32 %v3723_v1, %v3722_v6  ;;  %v3466_v16 = vadd.f32 %v5407_v8, %v5367_v46  ;;  %v6048_v46 = vld [vmem:[%s7867_s12 + $0x38] sm:$0xff]  }
 0xfde   :  { %v5436_v59 = vpop.f32.mrf.mxu1  ;;  %5768 = vmatprep.subr.bf16.mxu1 %v6048_v46 }
 0xfdf   :  { %v3674_v35 = vadd.f32 %v5435_v27, %v3450_v28  ;;  %v3724_v21 = vmul.f32 %v7562_v39, %v7562_v39  ;;  %v3693_v13 = vadd.f32 %v3692_v45, %v7562_v39  ;;  %5769 = vmatpush3.bf16.msra.mxu1 %v6048_v46 }
 0xfe0   :  { %v5437_v2 = vpop.f32.mrf.mxu1 }
 0xfe1   :  { %v5438_v38 = vadd.f32 %v5437_v2, %v5436_v59  ;;  %v7566_v53 = vadd.f32 %v3683_v30, %v3674_v35  ;;  %v3731_v47 = vadd.f32 %v3730_v3, %v3724_v21 }
 0xfe2   :  { %v5439_v20 = vpop.f32.mrf.mxu1 }
 0xfe3   :  { %v3675_v50 = vadd.f32 %v5438_v38, %v3455_v36  ;;  %v3725_v54 = vmul.f32 %v7566_v53, %v7566_v53  ;;  %v3694_v56 = vadd.f32 %v3693_v13, %v7566_v53 }
 0xfe4   :  { %v5440_v52 = vpop.f32.mrf.mxu1 }
 0xfe5   :  { %v5441_v44 = vadd.f32 %v5440_v52, %v5439_v20  ;;  %v7576_v60 = vadd.f32 %v3683_v30, %v3675_v50  ;;  %v3732_v18 = vadd.f32 %v3731_v47, %v3725_v54 }
 0xfe6   :  { %v5442_v34 = vpop.f32.mrf.mxu1 }
 0xfe7   :  { %v3676_v49 = vadd.f32 %v5441_v44, %v3458_v29  ;;  %v3726_v15 = vmul.f32 %v7576_v60, %v7576_v60  ;;  %v3695_v7 = vadd.f32 %v3694_v56, %v7576_v60 }
 0xfe8   :  { %v5443_v10 = vpop.f32.mrf.mxu1 }
 0xfe9   :  { %v7581_v58 = vadd.f32 %v3683_v30, %v3676_v49  ;;  %v5444_v61 = vadd.f32 %v5443_v10, %v5442_v34  ;;  %v3733_v48 = vadd.f32 %v3732_v18, %v3726_v15  ;;  %v6049_v15 = vld [vmem:[%s7867_s12 + $0x68] sm:$0xff]  }
 0xfea   :  { %v5445_v40 = vpop.f32.mrf.mxu1  ;;  %v6052_v18 = vld [vmem:[%s7867_s12 + $0x28] sm:$0xff]  }
 0xfeb   :  { %v3677_v4 = vadd.f32 %v5444_v61, %v3463_v12  ;;  %v3727_v22 = vmul.f32 %v7581_v58, %v7581_v58  ;;  %v3696_v51 = vadd.f32 %v3695_v7, %v7581_v58  ;;  %v6046_v12 = vld [vmem:[%s7867_s12 + $0x78] sm:$0xff]   ;;  %v6047_v61 = vld [vmem:[%s7867_s12 + $0x70] sm:$0xff]   ;;  %v6054_v7 = vld [vmem:[%s7867_s12 + $0x20] sm:$0xff]  }
 0xfec   :  { %v5446_v5 = vpop.f32.mrf.mxu1  ;;  %5744 = vmatprep.subr.bf16.mxu0 %v6046_v12 }
 0xfed   :  { %v7591_v63 = vadd.f32 %v3683_v30, %v3677_v4  ;;  %v5447_v26 = vadd.f32 %v5446_v5, %v5445_v40  ;;  %v3734_v28 = vadd.f32 %v3733_v48, %v3727_v22  ;;  %5745 = vmatpush3.bf16.msra.mxu0 %v6046_v12  ;;  %v6050_v4 = vld [vmem:[%s7867_s12 + $0x30] sm:$0xff]   ;;  %v6053_v5 = vld [vmem:[%s7867_s12 + $0x58] sm:$0xff]   ;;  %v6057_v48 = vld [vmem:[%s7867_s12 + $0x48] sm:$0xff]  }
 0xfee   :  { %5746 = vmatprep.subr.bf16.mxu0 %v6047_v61  ;;  %5770 = vmatprep.subr.bf16.mxu1 %v6050_v4  ;;  %v6055_v22 = vld [vmem:[%s7867_s12 + $0x50] sm:$0xff]  }
 0xfef   :  { %v3728_v19 = vmul.f32 %v7591_v63, %v7591_v63  ;;  %v3678_v27 = vadd.f32 %v5447_v26, %v3466_v16  ;;  %v3697_v14 = vadd.f32 %v3696_v51, %v7591_v63  ;;  %5771 = vmatpush3.bf16.msra.mxu1 %v6050_v4  ;;  %v6051_v16 = vld [vmem:[%s7867_s12 + $0x60] sm:$0xff]   ;;  %v6056_v26 = vld [vmem:[%s7867_s12 + $0x18] sm:$0xff]   ;;  %v6058_v51 = vld [vmem:[%s7867_s12 + $0x10] sm:$0xff]  }
 0xff0   :  { %5772 = vmatprep.subr.bf16.mxu1 %v6052_v18 }
 0xff1   :  { %v7597_v31 = vadd.f32 %v3683_v30, %v3678_v27  ;;  %v3735_v59 = vadd.f32 %v3734_v28, %v3728_v19  ;;  %5747 = vmatpush3.bf16.msra.mxu0 %v6047_v61  ;;  %v6059_v19 = vld [vmem:[%s7867_s12 + $0x40] sm:$0xff]   ;;  %v6060_v27 = vld [vmem:[%s7867_s12 + $0x8] sm:$0xff]  }
 0xff2   :  { %5748 = vmatprep.subr.bf16.mxu0 %v6049_v15  ;;  %v6061_v28 = vld [vmem:[%s7867_s12] sm:$0xff]  }
 0xff3   :  { %v3698_v11 = vadd.f32 %v3697_v14, %v7597_v31  ;;  %v3729_v35 = vmul.f32 %v7597_v31, %v7597_v31  ;;  %5773 = vmatpush3.bf16.msra.mxu1 %v6052_v18  ;;  %v7661_v14 = vld [vmem:[%s7867_s12 + $0xb8] sm:$0xff]  }
 0xff4   :  { %5774 = vmatprep.subr.bf16.mxu1 %v6054_v7 }
 0xff5   :  { %v3699_v2 = vrot.slane %v3698_v11, 4  ;;  %v3736_v36 = vadd.f32 %v3735_v59, %v3729_v35  ;;  %5749 = vmatpush3.bf16.msra.mxu0 %v6049_v15 }
 0xff6   :  { %5750 = vmatprep.subr.bf16.mxu0 %v6051_v16 }
 0xff7   :  { %v3700_v37 = vadd.f32 %v3699_v2, %v3698_v11  ;;  %v3737_v57 = vrot.slane %v3736_v36, 4  ;;  %5775 = vmatpush3.bf16.msra.mxu1 %v6054_v7 }
 0xff8   :  { %5776 = vmatprep.subr.bf16.mxu1 %v6056_v26 }
 0xff9   :  { %v3701_v38 = vrot.slane %v3700_v37, 2  ;;  %v3738_v20 = vadd.f32 %v3737_v57, %v3736_v36  ;;  %5751 = vmatpush3.bf16.msra.mxu0 %v6051_v16 }
 0xffa   :  { %5752 = vmatprep.subr.bf16.mxu0 %v6053_v5 }
 0xffb   :  { %v3702_v43 = vadd.f32 %v3701_v38, %v3700_v37  ;;  %v3739_v50 = vrot.slane %v3738_v20, 2  ;;  %5777 = vmatpush3.bf16.msra.mxu1 %v6056_v26 }
 0xffc   :  { %5778 = vmatprep.subr.bf16.mxu1 %v6058_v51 }
 0xffd   :  { %v3703_v1 = vrot.slane %v3702_v43, 1  ;;  %v3740_v52 = vadd.f32 %v3739_v50, %v3738_v20  ;;  %5753 = vmatpush3.bf16.msra.mxu0 %v6053_v5  ;;  %v3777_v50 = vrot.slane %v7554_v17, 1 }
 0xffe   :  { %5754 = vmatprep.subr.bf16.mxu0 %v6055_v22 }
 0xfff   :  { %v3704_v29 = vadd.f32 %v3703_v1, %v3702_v43  ;;  %v3741_v62 = vrot.slane %v3740_v52, 1  ;;  %5779 = vmatpush3.bf16.msra.mxu1 %v6058_v51 }
0x1000   :  { %5780 = vmatprep.subr.bf16.mxu1 %v6060_v27 }
0x1001   :  { %3705 = vrot.lane.b32.xlu0 %v3704_v29, %s6117_s11  ;;  %v3742_v30 = vadd.f32 %v3741_v62, %v3740_v52  ;;  %5755 = vmatpush3.bf16.msra.mxu0 %v6055_v22  ;;  %v3828_v52 = vld [vmem:[#allocation2] sm:$0x80] }
0x1002   :  { %5756 = vmatprep.subr.bf16.mxu0 %v6057_v48 }
0x1003   :  { %3743 = vrot.lane.b32.xlu1 %v3742_v30, %s6117_s11  ;;  %5781 = vmatpush3.bf16.msra.mxu1 %v6060_v27  ;;  %v6063_v27 = vld [vmem:[%s7867_s12 + $0xb0] sm:$0xff]  }
0x1004   :  { %5782 = vmatprep.subr.bf16.mxu1 %v6061_v28 }
0x1005   :  { %5757 = vmatpush3.bf16.msra.mxu0 %v6057_v48 }
0x1006   :  { %5758 = vmatprep.subr.bf16.mxu0 %v6059_v19 }
0x1007   :  { %5783 = vmatpush3.bf16.msra.mxu1 %v6061_v28 }
0x1009   :  { %5759 = vmatpush3.bf16.msra.mxu0 %v6059_v19 }
0x100a   :  { %5792 = vmatprep.subr.bf16.mxu0 %v7661_v14 }
0x1073   :  { %v3706_v25 = vpop.permute.xlu0 %3705 }
0x1074   :  { %v3707_v44 = vadd.f32 %v3706_v25, %v3704_v29 }
0x1075   :  { %v3744_v6 = vpop.permute.xlu1 %3743 }
0x1076   :  { %v3745_v21 = vadd.f32 %v3744_v6, %v3742_v30  ;;  %3708 = vrot.lane.b32.xlu0 %v3707_v44, %s6116_s7  ;;  %v3795_v30 = vrot.slane %v7554_v17, %v6434_v0 }
0x1078   :  { %3746 = vrot.lane.b32.xlu1 %v3745_v21, %s6116_s7 }
0x10e8   :  { %v3709_v34 = vpop.permute.xlu0 %3708 }
0x10e9   :  { %v3710_v41 = vadd.f32 %v3709_v34, %v3707_v44  ;;  %v3839_v44 = vrot.slane %v3828_v52, 7 }
0x10ea   :  { %v3747_v45 = vpop.permute.xlu1 %3746 }
0x10eb   :  { %v3748_v49 = vadd.f32 %v3747_v45, %v3745_v21  ;;  %3711 = vrot.lane.b32.xlu0 %v3710_v41, %s6112_s4 }
0x10ed   :  { %3749 = vrot.lane.b32.xlu1 %v3748_v49, %s6112_s4 }
0x115d   :  { %v3712_v8 = vpop.permute.xlu0 %3711 }
0x115e   :  { %v3713_v3 = vadd.f32 %v3712_v8, %v3710_v41 }
0x115f   :  { %v3750_v54 = vpop.permute.xlu1 %3749 }
0x1160   :  { %v3751_v10 = vadd.f32 %v3750_v54, %v3748_v49  ;;  %3714 = vrot.lane.b32.xlu0 %v3713_v3, %s6113_s28 }
0x1162   :  { %3752 = vrot.lane.b32.xlu1 %v3751_v10, %s6113_s28 }
0x11d2   :  { %v3715_v13 = vpop.permute.xlu0 %3714 }
0x11d3   :  { %v3716_v47 = vadd.f32 %v3715_v13, %v3713_v3 }
0x11d4   :  { %v3753_v40 = vpop.permute.xlu1 %3752 }
0x11d5   :  { %v3754_v56 = vadd.f32 %v3753_v40, %v3751_v10  ;;  %3717 = vrot.lane.b32.xlu0 %v3716_v47, %s6114_s22 }
0x11d7   :  { %3755 = vrot.lane.b32.xlu1 %v3754_v56, %s6114_s22 }
0x1247   :  { %v3718_v59 = vpop.permute.xlu0 %3717 }
0x1248   :  { %v3719_v11 = vadd.f32 %v3718_v59, %v3716_v47 }
0x1249   :  { %v3756_v35 = vpop.permute.xlu1 %3755 }
0x124a   :  { %v3721_v2 = vmul.f32 0.00048828125, %v3719_v11  ;;  %v3757_v36 = vadd.f32 %v3756_v35, %v3754_v56 }
0x124c   :  { %v3759_v37 = vmul.f32 %v3721_v2, %v3721_v2  ;;  %v3758_v57 = vmul.f32 0.00048828125, %v3757_v36  ;;  %v3765_v1 = vrot.slane %v3721_v2, %v6344_v55 }
0x124e   :  { %v3760_v38 = vsub.f32 %v3758_v57, %v3759_v37  ;;  %v3766_v25 = vsub.f32 %v7560_v42, %v3765_v1  ;;  %v3767_v6 = vsub.f32 %v7558_v32, %v3765_v1  ;;  %v3768_v21 = vsub.f32 %v7562_v39, %v3765_v1 }
0x124f   :  { %v3769_v34 = vsub.f32 %v7566_v53, %v3765_v1  ;;  %v3770_v45 = vsub.f32 %v7576_v60, %v3765_v1  ;;  %v3771_v49 = vsub.f32 %v7581_v58, %v3765_v1  ;;  %v3772_v8 = vsub.f32 %v7591_v63, %v3765_v1 }
0x1250   :  { %v3761_v20 = vmax.f32 %v3760_v38, 0.0  ;;  %v3773_v3 = vsub.f32 %v7597_v31, %v3765_v1 }
0x1252   :  { %v3774_v43 = vadd.f32 1e-05, %v3761_v20 }
0x1254   :  { %6082 = vrsqrt.f32 %v3774_v43 }
0x1261   :  { %v6083_v29 = vpop.eup %6082 }
0x1262   :  { %v3779_v62 = vmul.f32 %v6083_v29, %v3777_v50  ;;  %v6064_v50 = vld [vmem:[%s7867_s12 + $0xa8] sm:$0xff]  }
0x1264   :  { %v3783_v41 = vrot.slane %v3779_v62, %v6344_v55 }
0x1266   :  { %v3784_v0 = vmul.f32 %v3783_v41, %v3766_v25  ;;  %v3786_v17 = vmul.f32 %v3783_v41, %v3768_v21  ;;  %v3787_v42 = vmul.f32 %v3783_v41, %v3769_v34  ;;  %v3785_v54 = vmul.f32 %v3783_v41, %v3767_v6 }
0x1267   :  { %v3788_v10 = vmul.f32 %v3783_v41, %v3770_v45  ;;  %v3789_v32 = vmul.f32 %v3783_v41, %v3771_v49  ;;  %v3790_v12 = vmul.f32 %v3783_v41, %v3772_v8  ;;  %v3791_v39 = vmul.f32 %v3783_v41, %v3773_v3  ;;  %v6066_v8 = vld [vmem:[%s7867_s12 + $0x98] sm:$0xff]   ;;  %v6067_v3 = vld [vmem:[%s7867_s12 + $0x90] sm:$0xff]  }
0x1268   :  { %v3796_v13 = vadd.f32 %v3795_v30, %v3784_v0  ;;  %v3798_v53 = vadd.f32 %v3795_v30, %v3786_v17  ;;  %v3799_v61 = vadd.f32 %v3795_v30, %v3787_v42  ;;  %v3797_v46 = vadd.f32 %v3795_v30, %v3785_v54  ;;  %v6068_v0 = vld [vmem:[%s7867_s12 + $0x88] sm:$0xff]   ;;  %v6069_v17 = vld [vmem:[%s7867_s12 + $0x80] sm:$0xff]  }
0x1269   :  { %v3800_v47 = vadd.f32 %v3795_v30, %v3788_v10  ;;  %v3801_v60 = vadd.f32 %v3795_v30, %v3789_v32  ;;  %v3802_v40 = vadd.f32 %v3795_v30, %v3790_v12  ;;  %v3803_v58 = vadd.f32 %v3795_v30, %v3791_v39 }
0x126a   :  { %v3804_v56 = vmax.f32 %v3796_v13, 0.0  ;;  %v3805_v63 = vmax.f32 %v3797_v46, 0.0  ;;  %v7677_v15 = vmax.f32 %v3798_v53, 0.0  ;;  %v7679_v31 = vmax.f32 %v3799_v61, 0.0  ;;  %v3873_v61 = vld [vmem:[#allocation2 + $0x90] sm:$0x1] }
0x126b   :  { %v7681_v4 = vmax.f32 %v3800_v47, 0.0  ;;  %v7683_v16 = vmax.f32 %v3801_v60, 0.0  ;;  %v7685_v18 = vmax.f32 %v3802_v40, 0.0  ;;  %v7687_v5 = vmax.f32 %v3803_v58, 0.0 }
0x126c   :  { %3812 = vst [vmem:[#allocation2 + $0x10] sm:$0xff] %v3804_v56  ;;  %3813 = vst [vmem:[#allocation2 + $0x20] sm:$0xff] %v3805_v63  ;;  %v3840_v7 = vrot.slane %v3804_v56, 7  ;;  %v3842_v22 = vrot.slane %v3805_v63, 7  ;;  %v3930_v26 = vpack.c.bf16 %v3805_v63, %v3804_v56  ;;  %v3844_v48 = vrot.slane %v7677_v15, 7 }
0x126d   :  { %3814 = vst [vmem:[#allocation2 + $0x30] sm:$0xff] %v7677_v15  ;;  %3815 = vst [vmem:[#allocation2 + $0x40] sm:$0xff] %v7679_v31  ;;  %v3846_v51 = vrot.slane %v7679_v31, 7  ;;  %v3931_v19 = vpack.c.bf16 %v7679_v31, %v7677_v15  ;;  %v3848_v28 = vrot.slane %v7681_v4, 7  ;;  %v3850_v59 = vrot.slane %v7683_v16, 7 }
0x126e   :  { %3816 = vst [vmem:[#allocation2 + $0x50] sm:$0xff] %v7681_v4  ;;  %3819 = vst [vmem:[#allocation2 + $0x80] sm:$0xff] %v7687_v5  ;;  %5760 = vmatprep.mubr.bf16.mxu0 %v3930_v26  ;;  %v3932_v11 = vpack.c.bf16 %v7683_v16, %v7681_v4  ;;  %v3841_v35 = vsel %vm112_vm5, %v3839_v44, %v3840_v7  ;;  %v3843_v2 = vsel %vm112_vm5, %v3840_v7, %v3842_v22  ;;  %v4459_v7 = vld [vmem:[%s7869_s20 + $0x40] sm:$0xff]  ;;  %v4457_v26 = vld [vmem:[%s7869_s20 + $0x30] sm:$0xff] }
0x126f   :  { %5761 = vmatmul.mubr.bf16.vlgmr.msra.gmra.mxu0 %v3931_v19  ;;  %v3845_v36 = vsel %vm112_vm5, %v3842_v22, %v3844_v48  ;;  %v5087_v37 = vpack.c.bf16 %v3843_v2, %v3841_v35  ;;  %v3847_v57 = vsel %vm112_vm5, %v3844_v48, %v3846_v51  ;;  %v3849_v38 = vsel %vm112_vm5, %v3846_v51, %v3848_v28  ;;  %v4458_v22 = vld [vmem:[%s7869_s20 + $0x38] sm:$0xff]  ;;  %v4456_v48 = vld [vmem:[%s7869_s20 + $0x28] sm:$0xff]  ;;  %v4455_v51 = vld [vmem:[%s7869_s20 + $0x20] sm:$0xff] }
0x1270   :  { %5793 = vmatpush3.bf16.msra.mxu0 %v7661_v14  ;;  %5764 = vmatprep.mubr.bf16.mxu0 %v3932_v11  ;;  %v3911_v20 = vpack.c.bf16 %v3847_v57, %v3845_v36  ;;  %v3851_v43 = vsel %vm112_vm5, %v3848_v28, %v3850_v59  ;;  %v3878_v1 = vrot.slane %v3805_v63, 1  ;;  %v3880_v14 = vrot.slane %v7677_v15, 1  ;;  %v4332_v15 = vld [vmem:[%s7868_s19] sm:$0xff]  ;;  %v4454_v19 = vld [vmem:[%s7869_s20 + $0x18] sm:$0xff] }
0x1271   :  { %5794 = vmatprep.subr.bf16.mxu0 %v6063_v27  ;;  %5784 = vmatprep.mubr.msk.bf16.mxu1 %vm7367_vm9, %v5087_v37  ;;  %v5090_v52 = vpack.c.bf16 %v3851_v43, %v3849_v38  ;;  %v3852_v29 = vrot.slane %v7685_v18, 7  ;;  %v3933_v44 = vpack.c.bf16 %v7687_v5, %v7685_v18  ;;  %v3882_v42 = vrot.slane %v7679_v31, 1  ;;  %v4465_v31 = vld [vmem:[%s7869_s20 + $0x70] sm:$0xff] }
0x1272   :  { %5785 = vmatmul.mubr.bf16.vlgmr.msra.gmra.mxu1 %v3911_v20  ;;  %v3881_v34 = vsel %vm133_vm3, %v3878_v1, %v3880_v14  ;;  %v3884_v54 = vrot.slane %v7681_v4, 1  ;;  %v3886_v10 = vrot.slane %v7683_v16, 1  ;;  %v3888_v32 = vrot.slane %v7685_v18, 1  ;;  %v4463_v4 = vld [vmem:[%s7869_s20 + $0x60] sm:$0xff]  ;;  %v4462_v16 = vld [vmem:[%s7869_s20 + $0x58] sm:$0xff]  ;;  %v4461_v18 = vld [vmem:[%s7869_s20 + $0x50] sm:$0xff] }
0x1273   :  { %v3872_v62 = vld [vmem:[#allocation2 + $0x10] sm:$0xfe]  ;;  %5788 = vmatprep.mubr.msk.bf16.mxu1 %vm7447_vm11, %v5090_v52  ;;  %v3853_v9 = vsel %vm112_vm5, %v3850_v59, %v3852_v29  ;;  %v3883_v39 = vsel %vm133_vm3, %v3880_v14, %v3882_v42  ;;  %v3890_v47 = vrot.slane %v7687_v5, 1  ;;  %v3892_v40 = vrot.slane %v3873_v61, 1  ;;  %v4460_v5 = vld [vmem:[%s7869_s20 + $0x48] sm:$0xff] }
0x1274   :  { %5795 = vmatpush3.bf16.msra.mxu0 %v6063_v27  ;;  %v3877_v30 = vrot.slane %v3872_v62, 1  ;;  %v3885_v12 = vsel %vm133_vm3, %v3882_v42, %v3884_v54  ;;  %v3887_v13 = vsel %vm133_vm3, %v3884_v54, %v3886_v10  ;;  %v3889_v53 = vsel %vm133_vm3, %v3886_v10, %v3888_v32  ;;  %v4453_v27 = vld [vmem:[%s7869_s20 + $0x10] sm:$0xff] }
0x1275   :  { %v3829_v25 = vld [vmem:[#allocation2 + $0x80] sm:$0x7f]  ;;  %5796 = vmatprep.subr.bf16.mxu0 %v6064_v50  ;;  %v5117_v46 = vpack.c.bf16 %v3885_v12, %v3883_v39  ;;  %v4179_v60 = vpack.c.bf16 %v3889_v53, %v3887_v13  ;;  %v3891_v58 = vsel %vm133_vm3, %v3888_v32, %v3890_v47  ;;  %v3893_v56 = vsel %vm133_vm3, %v3890_v47, %v3892_v40 }
0x1276   :  { %v3854_v6 = vrot.slane %v3829_v25, 7  ;;  %v3879_v21 = vsel %vm133_vm3, %v3877_v30, %v3878_v1  ;;  %v5120_v63 = vpack.c.bf16 %v3893_v56, %v3891_v58 }
0x1277   :  { %5765 = vmatmul.mubr.bf16.gmra.mxu0 %v3933_v44  ;;  %v4177_v41 = vpack.c.bf16 %v3881_v34, %v3879_v21 }
0x1278   :  { %v3855_v45 = vsel %vm112_vm5, %v3852_v29, %v3854_v6  ;;  %5797 = vmatpush3.bf16.msra.mxu0 %v6064_v50 }
0x1279   :  { %v3913_v49 = vpack.c.bf16 %v3855_v45, %v3853_v9  ;;  %5808 = vmatprep.mubr.bf16.mxu0 %v4177_v41  ;;  %5798 = vmatprep.subr.bf16.mxu0 %v6065_v24 }
0x127b   :  { %5789 = vmatmul.mubr.bf16.gmra.mxu1 %v3913_v49 }
0x127c   :  { %5799 = vmatpush3.bf16.msra.mxu0 %v6065_v24  ;;  %5832 = vmatprep.mubr.msk.f32.mxu1 %vm91_vm1, %v4332_v15  ;;  %v4319_v24 = vld [vmem:[%s7870_s13] sm:$0x7] }
0x127d   :  { %5800 = vmatprep.subr.bf16.mxu0 %v6066_v8  ;;  %v4323_v49 = vrot.slane %v4319_v24, %v6344_v55 }
0x1280   :  { %5801 = vmatpush3.bf16.msra.mxu0 %v6066_v8 }
0x1281   :  { %5802 = vmatprep.subr.bf16.mxu0 %v6067_v3 }
0x1284   :  { %5803 = vmatpush3.bf16.msra.mxu0 %v6067_v3 }
0x1285   :  { %5804 = vmatprep.subr.bf16.mxu0 %v6068_v0 }
0x1288   :  { %5805 = vmatpush3.bf16.msra.mxu0 %v6068_v0 }
0x1289   :  { %5806 = vmatprep.subr.bf16.mxu0 %v6069_v17 }
0x128c   :  { %5807 = vmatpush3.bf16.msra.mxu0 %v6069_v17 }
0x128d   :  { %5841 = vmatprep.subr.mxu0 %v4466_v33 }
0x128f   :  { %5809 = vmatmul.mubr.msk.bf16.vlgmr.msra.gmra.mxu0 %vm7500_vm14, %v5117_v46 }
0x1290   :  { %5812 = vmatprep.mubr.bf16.mxu0 %v4179_v60  ;;  %5842 = vmatpush3.msra.mxu0 %v4466_v33  ;;  %v4333_v33 = vld [vmem:[%s7868_s19 + $0x8] sm:$0xff] }
0x1291   :  { %5843 = vmatprep.subr.mxu0 %v4465_v31 }
0x1292   :  { %5844 = vmatpush3.msra.mxu0 %v4465_v31  ;;  %v4334_v31 = vld [vmem:[%s7868_s19 + $0x10] sm:$0xff] }
0x1293   :  { %5845 = vmatprep.subr.mxu0 %v4464_v23 }
0x1294   :  { %5846 = vmatpush3.msra.mxu0 %v4464_v23  ;;  %v4335_v23 = vld [vmem:[%s7868_s19 + $0x18] sm:$0xff] }
0x1295   :  { %5847 = vmatprep.subr.mxu0 %v4463_v4 }
0x1296   :  { %5848 = vmatpush3.msra.mxu0 %v4463_v4  ;;  %v4336_v4 = vld [vmem:[%s7868_s19 + $0x20] sm:$0xff] }
0x1297   :  { %5813 = vmatmul.mubr.msk.bf16.gmra.mxu0 %vm7532_vm0, %v5120_v63  ;;  %5849 = vmatprep.subr.mxu0 %v4462_v16 }
0x1298   :  { %5850 = vmatpush3.msra.mxu0 %v4462_v16  ;;  %v4337_v16 = vld [vmem:[%s7868_s19 + $0x28] sm:$0xff] }
0x1299   :  { %5851 = vmatprep.subr.mxu0 %v4461_v18 }
0x129a   :  { %5852 = vmatpush3.msra.mxu0 %v4461_v18  ;;  %v4452_v18 = vld [vmem:[%s7869_s20 + $0x8] sm:$0xff] }
0x129b   :  { %5853 = vmatprep.subr.mxu0 %v4460_v5 }
0x129c   :  { %5854 = vmatpush3.msra.mxu0 %v4460_v5  ;;  %v4451_v5 = vld [vmem:[%s7869_s20] sm:$0xff] }
0x129d   :  { %5855 = vmatprep.subr.mxu0 %v4459_v7 }
0x129e   :  { %5856 = vmatpush3.msra.mxu0 %v4459_v7 }
0x129f   :  { %5857 = vmatprep.subr.mxu0 %v4458_v22 }
0x12a0   :  { %5858 = vmatpush3.msra.mxu0 %v4458_v22 }
0x12a1   :  { %5859 = vmatprep.subr.mxu0 %v4457_v26 }
0x12a2   :  { %5860 = vmatpush3.msra.mxu0 %v4457_v26 }
0x12a3   :  { %5861 = vmatprep.subr.mxu0 %v4456_v48 }
0x12a4   :  { %5862 = vmatpush3.msra.mxu0 %v4456_v48 }
0x12a5   :  { %5863 = vmatprep.subr.mxu0 %v4455_v51 }
0x12a6   :  { %5864 = vmatpush3.msra.mxu0 %v4455_v51 }
0x12a7   :  { %5865 = vmatprep.subr.mxu0 %v4454_v19 }
0x12a8   :  { %5866 = vmatpush3.msra.mxu0 %v4454_v19 }
0x12a9   :  { %5867 = vmatprep.subr.mxu0 %v4453_v27 }
0x12aa   :  { %5868 = vmatpush3.msra.mxu0 %v4453_v27 }
0x12ab   :  { %5869 = vmatprep.subr.mxu0 %v4452_v18 }
0x12ac   :  { %5870 = vmatpush3.msra.mxu0 %v4452_v18 }
0x12ad   :  { %5871 = vmatprep.subr.mxu0 %v4451_v5 }
0x12ae   :  { %5872 = vmatpush3.msra.mxu0 %v4451_v5 }
0x132f   :  { %v5762_v28 = vpop.f32.mrf.mxu0 }
0x1331   :  { %v4033_v59 = vpop.f32.mrf.mxu0 }
0x1332   :  { %v5786_v35 = vpop.f32.mrf.mxu1 }
0x1333   :  { %v5763_v11 = vpop.f32.mrf.mxu0  ;;  %v4155_v39 = vadd.f32 %v5786_v35, %v5762_v28 }
0x1334   :  { %v4146_v36 = vpop.f32.mrf.mxu1 }
0x1335   :  { %v4036_v2 = vpop.f32.mrf.mxu0  ;;  %v4147_v55 = vadd.f32 %v4146_v36, %v4033_v59 }
0x1336   :  { %v5787_v57 = vpop.f32.mrf.mxu1 }
0x1337   :  { %v5766_v37 = vpop.f32.mrf.mxu0  ;;  %v4158_v10 = vadd.f32 %v5787_v57, %v5763_v11 }
0x1338   :  { %v4149_v20 = vpop.f32.mrf.mxu1 }
0x1339   :  { %v4049_v38 = vpop.f32.mrf.mxu0  ;;  %v4150_v61 = vadd.f32 %v4149_v20, %v4036_v2 }
0x133b   :  { %v5767_v43 = vpop.f32.mrf.mxu0  ;;  %v5790_v50 = vpop.f32.mrf.mxu1 }
0x133c   :  { %v4171_v34 = vadd.f32 %v5790_v50, %v5766_v37 }
0x133d   :  { %v4052_v1 = vpop.f32.mrf.mxu0  ;;  %v4162_v14 = vpop.f32.mrf.mxu1 }
0x133e   :  { %v4163_v17 = vadd.f32 %v4162_v14, %v4049_v38 }
0x133f   :  { %v5791_v30 = vpop.f32.mrf.mxu1 }
0x1340   :  { %v4174_v41 = vadd.f32 %v5791_v30, %v5767_v43 }
0x1341   :  { %v4165_v6 = vpop.f32.mrf.mxu1 }
0x1342   :  { %v4166_v45 = vadd.f32 %v4165_v6, %v4052_v1 }
0x134f   :  { %v5810_v52 = vpop.f32.mrf.mxu0 }
0x1350   :  { %v4313_v46 = vadd.f32 %v5810_v52, %v4155_v39 }
0x1351   :  { %v4280_v29 = vpop.f32.mrf.mxu0 }
0x1352   :  { %v4326_v58 = vadd.f32 %v4323_v49, %v4313_v46  ;;  %v4311_v56 = vadd.f32 %v4280_v29, %v4147_v55 }
0x1353   :  { %v5811_v62 = vpop.f32.mrf.mxu0 }
0x1354   :  { %v4314_v13 = vadd.f32 %v5811_v62, %v4158_v10  ;;  %v4324_v15 = vadd.f32 %v4323_v49, %v4311_v56 }
0x1355   :  { %v4283_v25 = vpop.f32.mrf.mxu0 }
0x1356   :  { %v4327_v60 = vadd.f32 %v4323_v49, %v4314_v13  ;;  %v4312_v40 = vadd.f32 %v4283_v25, %v4150_v61 }
0x1357   :  { %v5814_v44 = vpop.f32.mrf.mxu0 }
0x1358   :  { %v4317_v8 = vadd.f32 %v5814_v44, %v4171_v34  ;;  %v4325_v63 = vadd.f32 %v4323_v49, %v4312_v40 }
0x1359   :  { %v4296_v21 = vpop.f32.mrf.mxu0 }
0x135a   :  { %v4330_v32 = vadd.f32 %v4323_v49, %v4317_v8  ;;  %v4315_v12 = vadd.f32 %v4296_v21, %v4163_v17 }
0x135b   :  { %v5815_v9 = vpop.f32.mrf.mxu0 }
0x135c   :  { %v4318_v3 = vadd.f32 %v5815_v9, %v4174_v41  ;;  %v4328_v47 = vadd.f32 %v4323_v49, %v4315_v12 }
0x135d   :  { %v4299_v0 = vpop.f32.mrf.mxu0 }
0x135e   :  { %v4331_v42 = vadd.f32 %v4323_v49, %v4318_v3  ;;  %v4316_v54 = vadd.f32 %v4299_v0, %v4166_v45 }
0x1360   :  { %5816 = vmatprep.subr.mxu1 %v4331_v42  ;;  %v4329_v53 = vadd.f32 %v4323_v49, %v4316_v54 }
0x1361   :  { %5817 = vmatpush3.msra.mxu1 %v4331_v42 }
0x1362   :  { %5818 = vmatprep.subr.mxu1 %v4330_v32 }
0x1363   :  { %5819 = vmatpush3.msra.mxu1 %v4330_v32 }
0x1364   :  { %5820 = vmatprep.subr.mxu1 %v4329_v53 }
0x1365   :  { %5821 = vmatpush3.msra.mxu1 %v4329_v53 }
0x1366   :  { %5822 = vmatprep.subr.mxu1 %v4328_v47 }
0x1367   :  { %5823 = vmatpush3.msra.mxu1 %v4328_v47 }
0x1368   :  { %5824 = vmatprep.subr.mxu1 %v4327_v60 }
0x1369   :  { %5825 = vmatpush3.msra.mxu1 %v4327_v60 }
0x136a   :  { %5826 = vmatprep.subr.mxu1 %v4326_v58 }
0x136b   :  { %5827 = vmatpush3.msra.mxu1 %v4326_v58 }
0x136c   :  { %5828 = vmatprep.subr.mxu1 %v4325_v63 }
0x136d   :  { %5829 = vmatpush3.msra.mxu1 %v4325_v63 }
0x136e   :  { %5830 = vmatprep.subr.mxu1 %v4324_v15 }
0x136f   :  { %5831 = vmatpush3.msra.mxu1 %v4324_v15 }
0x1370   :  { %5833 = vmatmul.mubr.msk.f32.vlgmr.msra.gmra.mxu1 %vm91_vm1, %v4333_v33 }
0x1371   :  { %5835 = vmatprep.mubr.msk.f32.mxu1 %vm91_vm1, %v4334_v31 }
0x1374   :  { %5836 = vmatmul.mubr.msk.f32.gmra.mxu1 %vm91_vm1, %v4335_v23 }
0x1375   :  { %5838 = vmatprep.mubr.msk.f32.mxu1 %vm91_vm1, %v4336_v4 }
0x1378   :  { %5839 = vmatmul.mubr.msk.f32.gmra.mxu1 %vm91_vm1, %v4337_v16  ;;  %vm4598_vm1 = vcmask 785408  }
0x1430   :  { %v5834_v7 = vpop.f32.mrf.mxu1 }
0x1432   :  { %v4422_v22 = vpop.f32.mrf.mxu1 }
0x1433   :  { %5873 = vmatprep.mubr.f32.mxu0 %v4422_v22 }
0x1434   :  { %v5837_v26 = vpop.f32.mrf.mxu1  ;;  %5874 = vmatmul.mubr.f32.vlgmr.msra.gmra.mxu0 %v5834_v7 }
0x1436   :  { %v4432_v48 = vpop.f32.mrf.mxu1 }
0x1437   :  { %5876 = vmatprep.mubr.f32.mxu0 %v4432_v48 }
0x1438   :  { %v5840_v51 = vpop.f32.mrf.mxu1  ;;  %5877 = vmatmul.mubr.f32.gmra.mxu0 %v5837_v26 }
0x143a   :  { %v4442_v19 = vpop.f32.mrf.mxu1 }
0x143b   :  { %5879 = vmatprep.mubr.f32.mxu0 %v4442_v19 }
0x143c   :  { %5880 = vmatmul.mubr.f32.gmra.mxu0 %v5840_v51 }
0x14f4   :  { %v5875_v27 = vpop.f32.mrf.mxu0 }
0x14f5   :  { %v5129_v28 = vmul.f32 -1.442695, %v5875_v27 }
0x14f6   :  { %v4533_v59 = vpop.f32.mrf.mxu0 }
0x14f7   :  { %6084 = vpow2.f32 %v5129_v28  ;;  %v5128_v11 = vmul.f32 -1.442695, %v4533_v59 }
0x14f8   :  { %v5878_v35 = vpop.f32.mrf.mxu0 }
0x14f9   :  { %6086 = vpow2.f32 %v5128_v11  ;;  %v5131_v2 = vmul.f32 -1.442695, %v5878_v35 }
0x14fa   :  { %v4543_v36 = vpop.f32.mrf.mxu0 }
0x14fb   :  { %6088 = vpow2.f32 %v5131_v2  ;;  %v5130_v37 = vmul.f32 -1.442695, %v4543_v36 }
0x14fc   :  { %v5881_v57 = vpop.f32.mrf.mxu0 }
0x14fd   :  { %6090 = vpow2.f32 %v5130_v37  ;;  %v5133_v38 = vmul.f32 -1.442695, %v5881_v57 }
0x14fe   :  { %v4553_v20 = vpop.f32.mrf.mxu0 }
0x14ff   :  { %6092 = vpow2.f32 %v5133_v38  ;;  %v5132_v43 = vmul.f32 -1.442695, %v4553_v20 }
0x1501   :  { %6094 = vpow2.f32 %v5132_v43 }
0x1504   :  { %v6085_v50 = vpop.eup %6084 }
0x1505   :  { %v4581_v1 = vadd.f32 1.0, %v6085_v50 }
0x1506   :  { %v6087_v52 = vpop.eup %6086 }
0x1507   :  { %6096 = vrcp.f32 %v4581_v1  ;;  %v4580_v14 = vadd.f32 1.0, %v6087_v52 }
0x1508   :  { %v6089_v29 = vpop.eup %6088 }
0x1509   :  { %6098 = vrcp.f32 %v4580_v14  ;;  %v4583_v62 = vadd.f32 1.0, %v6089_v29 }
0x150a   :  { %v6091_v30 = vpop.eup %6090 }
0x150b   :  { %6100 = vrcp.f32 %v4583_v62  ;;  %v4582_v25 = vadd.f32 1.0, %v6091_v30 }
0x150c   :  { %v6093_v44 = vpop.eup %6092 }
0x150d   :  { %6102 = vrcp.f32 %v4582_v25  ;;  %v4585_v6 = vadd.f32 1.0, %v6093_v44 }
0x150e   :  { %v6095_v24 = vpop.eup %6094 }
0x150f   :  { %6104 = vrcp.f32 %v4585_v6  ;;  %v4584_v21 = vadd.f32 1.0, %v6095_v24 }
0x1511   :  { %6106 = vrcp.f32 %v4584_v21 }
0x1514   :  { %v6097_v34 = vpop.eup %6096 }
0x1515   :  { %4600 = vst.msk [vmem:[%s7871_s21 + $0x8] sm:$0xff] %vm4598_vm1, %v6097_v34 }
0x1516   :  { %v6099_v41 = vpop.eup %6098 }
0x1517   :  { %4599 = vst.msk [vmem:[%s7871_s21] sm:$0xff] %vm4598_vm1, %v6099_v41 }
0x1518   :  { %v6101_v9 = vpop.eup %6100 }
0x1519   :  { %4602 = vst.msk [vmem:[%s7871_s21 + $0x18] sm:$0xff] %vm4598_vm1, %v6101_v9 }
0x151a   :  { %v6103_v45 = vpop.eup %6102 }
0x151b   :  { %4601 = vst.msk [vmem:[%s7871_s21 + $0x10] sm:$0xff] %vm4598_vm1, %v6103_v45 }
0x151c   :  { %v6105_v49 = vpop.eup %6104 }
0x151d   :  { %4604 = vst.msk [vmem:[%s7871_s21 + $0x28] sm:$0xff] %vm4598_vm1, %v6105_v49 }
0x151e   :  { %v6107_v8 = vpop.eup %6106 }
0x151f   :  { %4603 = vst.msk [vmem:[%s7871_s21 + $0x20] sm:$0xff] %vm4598_vm1, %v6107_v8 }

</bundles_post_ra>
